<compile_context>
chip_gen: v5e
topology: v5e:2x2
jax: 0.10.0
libtpu: 0.0.40
codegen_flags: <defaults>
</compile_context>

<pallas_src>
import math

import jax
import jax.numpy as jnp
from jax.experimental import pallas as pl
from jax.experimental.pallas import tpu as pltpu

_SILU_SCALE = 1.0 / 0.6  # GemNet ScaledSiLU factor (Dense with activation="silu")


def _scaled_silu(x):
    # manual silu (x * sigmoid(x)) * scale -- exp lowers to the EUP inside Pallas
    return x * (1.0 / (1.0 + jnp.exp(-x))) * _SILU_SCALE


# --------------------- fused pair-core kernel (the hot path) -----------------
def _pair_core_kernel(rad_ref, x2_ref, wf_ref, o_ref, acc_ref):
    """Per atom-block:
         rad_ref: (TA, R*K)      flattened radial basis rows
         x2_ref:  (K, TA, P)     scattered pair embeddings, K-major slabs
         wf_ref:  (R, P, A)      (W_bil @ W_up) * scale, reshaped
         o_ref:   (TA, A)        output atom embeddings
         acc_ref: (TA, A) f32    VMEM accumulator scratch
    """
    kmax = x2_ref.shape[0]
    n_rbf = wf_ref.shape[0]

    # Small block; load once and slice the value (R*K lanes).  For very large
    # R*Kmax this should switch to per-column ref loads to bound vreg pressure.
    rad = rad_ref[...]                                        # (TA, R*K)

    acc_ref[...] = jnp.zeros_like(acc_ref)
    for r in range(n_rbf):                                    # static unroll, R is small
        # K-contraction on the VPU: xr[a, p] = sum_k rad[a, r*K+k] * x2[k, a, p]
        xr = rad[:, r * kmax:r * kmax + 1] * x2_ref[0]
        for k in range(1, kmax):
            xr = xr + rad[:, r * kmax + k:r * kmax + k + 1] * x2_ref[k]
        # fused (bilinear * scale) -> up-projection weight: one (TA,P)x(P,A) MXU push
        acc_ref[...] += jnp.dot(xr, wf_ref[r], preferred_element_type=jnp.float32)

    o_ref[...] = _scaled_silu(acc_ref[...]).astype(o_ref.dtype)


def _pick_block_atoms(n_atoms, kmax, *, itemsize=4, vmem_budget_bytes=4 << 20):
    """Choose an atom-block size from a VMEM budget (lane padding to 128 included)."""
    # per-atom, per pipeline buffer: rad row + Kmax x2 rows + out row, double-buffered
    per_atom = (1 + kmax + 1) * 128 * itemsize * 2
    cap = (vmem_budget_bytes // per_atom) // 8 * 8
    # 256 cap keeps vreg pressure sane and comfortably fits v7x's smaller scoped VMEM
    cap = int(max(8, min(cap, 256)))
    # prefer >= 2 grid blocks so the "parallel" grid axis can use both v7x TensorCores
    half = ((n_atoms + 1) // 2 + 7) // 8 * 8
    return max(8, min(cap, half))


def pair_core(rad_flat, x2, wf3, *, block_atoms, out_dtype):
    n_pad, rk = rad_flat.shape
    kmax, _, p = x2.shape
    r, _, a = wf3.shape
    assert n_pad % block_atoms == 0
    grid = (n_pad // block_atoms,)
    return pl.pallas_call(
        _pair_core_kernel,
        out_shape=jax.ShapeDtypeStruct((n_pad, a), out_dtype),
        grid_spec=pltpu.PrefetchScalarGridSpec(
            num_scalar_prefetch=0,
            grid=grid,
            in_specs=[
                pl.BlockSpec((block_atoms, rk), lambda i: (i, 0)),
                pl.BlockSpec((kmax, block_atoms, p), lambda i: (0, i, 0)),
                pl.BlockSpec((r, p, a), lambda i: (0, 0, 0)),   # constant: loaded once
            ],
            out_specs=pl.BlockSpec((block_atoms, a), lambda i: (i, 0)),
            scratch_shapes=[pltpu.VMEM((block_atoms, a), jnp.float32)],
        ),
        compiler_params=pltpu.CompilerParams(
            dimension_semantics=("parallel",),       # megacore sharding on v7x
            vmem_limit_bytes=32 * 1024 * 1024,
        ),
    )(rad_flat, x2, wf3)


# ----------------------------- full forward pass ------------------------------
def pair_interaction_forward(h, rad_basis, edge_index, target_neighbor_idx,
                             params, scale_rbf_sum, *, kmax, block_atoms=None):
    n = h.shape[0]
    r = rad_basis.shape[1]
    assert rad_basis.shape[2] == kmax, "rad_basis last dim must equal Kmax"
    p_in = params["w_down"].shape[1]
    a_out = params["w_up"].shape[1]

    # Trace-time weight fusion: (flat @ W_bil) * s @ W_up == flat @ ((W_bil @ W_up) * s)
    wf3 = ((params["w_bil"] @ params["w_up"]) * scale_rbf_sum).reshape(r, p_in, a_out)

    # Down projection: (N, A) x (A, P) is trivially memory bound -> plain XLA
    # (dropout is an inference no-op).
    x_b = _scaled_silu(h @ params["w_down"])

    # Gather / scatter glue (data-dependent indexing; plain JAX).
    # TODO(synk): Kmax = max(target_neighbor_idx)+1 is data-dependent in torch; here it
    # must be supplied statically, and duplicate (dst, tni) pairs are last-writer-wins.
    x_ba = x_b[edge_index[0]]

    if block_atoms is None:
        block_atoms = _pick_block_atoms(n, kmax)
    n_pad = ((n + block_atoms - 1) // block_atoms) * block_atoms

    # Scatter directly into the (Kmax, N, P) layout the kernel wants.
    # TODO(synk): for large graphs, gather x_b rows inside the kernel from a neighbor
    # table (scalar prefetch + manual DMA) to avoid the x2 HBM write/read round trip.
    x2 = jnp.zeros((kmax, n_pad, p_in), x_ba.dtype)
    x2 = x2.at[target_neighbor_idx, edge_index[1]].set(x_ba)

    rad_flat = rad_basis.reshape(n, r * kmax)        # row-major -> column index r*K + k
    if n_pad != n:
        rad_flat = jnp.pad(rad_flat, ((0, n_pad - n), (0, 0)))

    out = pair_core(rad_flat, x2, wf3, block_atoms=block_atoms, out_dtype=h.dtype)
    return out[:n]


# ----------------------------- pure-JAX reference -----------------------------
def reference(h, rad_basis, edge_index, target_neighbor_idx, params,
              scale_rbf_sum, kmax):
    x_b = _scaled_silu(h @ params["w_down"])
    x_ba = x_b[edge_index[0]]
    x2 = jnp.zeros((h.shape[0], kmax, x_ba.shape[-1]), x_ba.dtype)
    x2 = x2.at[edge_index[1], target_neighbor_idx].set(x_ba)
    xba2 = jnp.einsum('ark,akp->arp', rad_basis, x2)
    h_mid = xba2.reshape(h.shape[0], -1) @ params["w_bil"] * scale_rbf_sum
    return _scaled_silu(h_mid @ params["w_up"])


if __name__ == "__main__":
    # small, module-consistent shapes (N not a multiple of the block size on purpose,
    # so the padding path and the >1-block grid are both exercised)
    num_atoms = 200
    emb_size_atom = 64
    emb_size_pair_in = 16
    emb_size_pair_out = 32
    emb_size_rbf = 8
    neighbors_per_atom = 4                      # -> Kmax = 4
    kmax = neighbors_per_atom
    num_edges = num_atoms * neighbors_per_atom

    key = jax.random.PRNGKey(0)
    keys = jax.random.split(key, 6)
    h = jax.random.normal(keys[0], (num_atoms, emb_size_atom), jnp.float32)
    rad_basis = jax.random.normal(keys[1], (num_atoms, emb_size_rbf, kmax), jnp.float32)
    edge_src = jax.random.randint(keys[2], (num_edges,), 0, num_atoms)
    edge_dst = jnp.repeat(jnp.arange(num_atoms), neighbors_per_atom)
    edge_index = jnp.stack([edge_src, edge_dst], axis=0)
    target_neighbor_idx = jnp.tile(jnp.arange(neighbors_per_atom), num_atoms)

    # deterministic parameter init (no checkpoint): scaled Gaussian weights
    params = {
        "w_down": jax.random.normal(keys[3], (emb_size_atom, emb_size_pair_in),
                                    jnp.float32) / math.sqrt(emb_size_atom),
        "w_bil": jax.random.normal(keys[4],
                                   (emb_size_rbf * emb_size_pair_in, emb_size_pair_out),
                                   jnp.float32) / math.sqrt(emb_size_rbf * emb_size_pair_in),
        "w_up": jax.random.normal(keys[5], (emb_size_pair_out, emb_size_atom),
                                  jnp.float32) / math.sqrt(emb_size_pair_out),
    }
    # deterministic stand-in for the fitted ScaleFactor buffer
    scale_rbf_sum = 1.0 / math.sqrt(kmax)

    out = pair_interaction_forward(h, rad_basis, edge_index, target_neighbor_idx,
                                   params, scale_rbf_sum, kmax=kmax)
    out = jax.block_until_ready(out)

    ref = reference(h, rad_basis, edge_index, target_neighbor_idx, params,
                    scale_rbf_sum, kmax)
    assert out.shape == (num_atoms, emb_size_atom)
    max_err = jnp.max(jnp.abs(out - ref))
    assert jnp.allclose(out, ref, atol=2e-4, rtol=2e-4), f"max abs err {max_err}"
    print("KERNEL_OK")
</pallas_src>

<mosaic_0001>
module attributes {stable_mosaic.version = 11 : i64} {
  func.func @_pair_core_kernel(%arg0: i32, %arg1: memref<104x32xf32, #tpu.memory_space<vmem>>, %arg2: memref<4x104x16xf32, #tpu.memory_space<vmem>>, %arg3: memref<8x16x64xf32, #tpu.memory_space<vmem>>, %arg4: memref<104x64xf32, #tpu.memory_space<vmem>>, %arg5: memref<104x64xf32, #tpu.memory_space<vmem>>) attributes {dimension_semantics = [#tpu.dimension_semantics<parallel>], iteration_bounds = array<i64: 2>, scalar_prefetch = 0 : i64, scratch_operands = 1 : i64, tpu.core_type = #tpu.core_type<tc>, window_params = [{transform_indices = @transform_0, window_bounds = array<i64: 104, 32>}, {transform_indices = @transform_1, window_bounds = array<i64: 4, 104, 16>}, {pipeline_mode = #tpu.pipeline_mode<synchronous>, transform_indices = @transform_2, window_bounds = array<i64: 8, 16, 64>}, {transform_indices = @transform_3, window_bounds = array<i64: 104, 64>}]} {
    %c0 = arith.constant 0 : index
    %c0_0 = arith.constant 0 : index
    %0 = vector.load %arg1[%c0, %c0_0] : memref<104x32xf32, #tpu.memory_space<vmem>>, vector<104x32xf32>
    %cst = arith.constant 0.000000e+00 : f32
    %1 = vector.broadcast %cst : f32 to vector<104x64xf32>
    %c0_1 = arith.constant 0 : index
    %c0_2 = arith.constant 0 : index
    %2 = vector.load %arg5[%c0_1, %c0_2] : memref<104x64xf32, #tpu.memory_space<vmem>>, vector<104x64xf32>
    tpu.vector_store %arg5[%c0_1, %c0_2], %1 {strides = array<i32>} : memref<104x64xf32, #tpu.memory_space<vmem>>, vector<104x64xf32>,
    %3 = vector.extract_strided_slice %0 {offsets = [0, 0], sizes = [104, 1], strides = [1, 1]} : vector<104x32xf32> to vector<104x1xf32>
    %c0_3 = arith.constant 0 : index
    %c0_4 = arith.constant 0 : index
    %c0_5 = arith.constant 0 : index
    %4 = vector.load %arg2[%c0_3, %c0_4, %c0_5] : memref<4x104x16xf32, #tpu.memory_space<vmem>>, vector<1x104x16xf32>
    %5 = vector.shape_cast %4 : vector<1x104x16xf32> to vector<104x16xf32>
    %6 = vector.broadcast %3 : vector<104x1xf32> to vector<104x16xf32>
    %7 = arith.mulf %6, %5 : vector<104x16xf32>
    %8 = vector.extract_strided_slice %0 {offsets = [0, 1], sizes = [104, 1], strides = [1, 1]} : vector<104x32xf32> to vector<104x1xf32>
    %c1 = arith.constant 1 : index
    %c0_6 = arith.constant 0 : index
    %c0_7 = arith.constant 0 : index
    %9 = vector.load %arg2[%c1, %c0_6, %c0_7] : memref<4x104x16xf32, #tpu.memory_space<vmem>>, vector<1x104x16xf32>
    %10 = vector.shape_cast %9 : vector<1x104x16xf32> to vector<104x16xf32>
    %11 = vector.broadcast %8 : vector<104x1xf32> to vector<104x16xf32>
    %12 = arith.mulf %11, %10 : vector<104x16xf32>
    %13 = arith.addf %7, %12 : vector<104x16xf32>
    %14 = vector.extract_strided_slice %0 {offsets = [0, 2], sizes = [104, 1], strides = [1, 1]} : vector<104x32xf32> to vector<104x1xf32>
    %c2 = arith.constant 2 : index
    %c0_8 = arith.constant 0 : index
    %c0_9 = arith.constant 0 : index
    %15 = vector.load %arg2[%c2, %c0_8, %c0_9] : memref<4x104x16xf32, #tpu.memory_space<vmem>>, vector<1x104x16xf32>
    %16 = vector.shape_cast %15 : vector<1x104x16xf32> to vector<104x16xf32>
    %17 = vector.broadcast %14 : vector<104x1xf32> to vector<104x16xf32>
    %18 = arith.mulf %17, %16 : vector<104x16xf32>
    %19 = arith.addf %13, %18 : vector<104x16xf32>
    %20 = vector.extract_strided_slice %0 {offsets = [0, 3], sizes = [104, 1], strides = [1, 1]} : vector<104x32xf32> to vector<104x1xf32>
    %c3 = arith.constant 3 : index
    %c0_10 = arith.constant 0 : index
    %c0_11 = arith.constant 0 : index
    %21 = vector.load %arg2[%c3, %c0_10, %c0_11] : memref<4x104x16xf32, #tpu.memory_space<vmem>>, vector<1x104x16xf32>
    %22 = vector.shape_cast %21 : vector<1x104x16xf32> to vector<104x16xf32>
    %23 = vector.broadcast %20 : vector<104x1xf32> to vector<104x16xf32>
    %24 = arith.mulf %23, %22 : vector<104x16xf32>
    %25 = arith.addf %19, %24 : vector<104x16xf32>
    %c0_12 = arith.constant 0 : index
    %c0_13 = arith.constant 0 : index
    %26 = vector.load %arg5[%c0_12, %c0_13] : memref<104x64xf32, #tpu.memory_space<vmem>>, vector<104x64xf32>
    %c0_14 = arith.constant 0 : index
    %c0_15 = arith.constant 0 : index
    %c0_16 = arith.constant 0 : index
    %27 = vector.load %arg3[%c0_14, %c0_15, %c0_16] : memref<8x16x64xf32, #tpu.memory_space<vmem>>, vector<1x16x64xf32>
    %28 = vector.shape_cast %27 : vector<1x16x64xf32> to vector<16x64xf32>
    %cst_17 = arith.constant dense<0.000000e+00> : vector<104x64xf32>
    %29 = tpu.matmul %25, %28, %cst_17 {dimension_numbers = #tpu.dot_dimension_numbers<[1], [0], [0], [1], [0, 0, 1, 1], [], []>} : vector<104x16xf32>, vector<16x64xf32>, vector<104x64xf32> -> vector<104x64xf32>
    %30 = arith.addf %26, %29 : vector<104x64xf32>
    %c0_18 = arith.constant 0 : index
    %c0_19 = arith.constant 0 : index
    %31 = vector.load %arg5[%c0_18, %c0_19] : memref<104x64xf32, #tpu.memory_space<vmem>>, vector<104x64xf32>
    tpu.vector_store %arg5[%c0_18, %c0_19], %30 {strides = array<i32>} : memref<104x64xf32, #tpu.memory_space<vmem>>, vector<104x64xf32>,
    %32 = vector.extract_strided_slice %0 {offsets = [0, 4], sizes = [104, 1], strides = [1, 1]} : vector<104x32xf32> to vector<104x1xf32>
    %c0_20 = arith.constant 0 : index
    %c0_21 = arith.constant 0 : index
    %c0_22 = arith.constant 0 : index
    %33 = vector.load %arg2[%c0_20, %c0_21, %c0_22] : memref<4x104x16xf32, #tpu.memory_space<vmem>>, vector<1x104x16xf32>
    %34 = vector.shape_cast %33 : vector<1x104x16xf32> to vector<104x16xf32>
    %35 = vector.broadcast %32 : vector<104x1xf32> to vector<104x16xf32>
    %36 = arith.mulf %35, %34 : vector<104x16xf32>
    %37 = vector.extract_strided_slice %0 {offsets = [0, 5], sizes = [104, 1], strides = [1, 1]} : vector<104x32xf32> to vector<104x1xf32>
    %c1_23 = arith.constant 1 : index
    %c0_24 = arith.constant 0 : index
    %c0_25 = arith.constant 0 : index
    %38 = vector.load %arg2[%c1_23, %c0_24, %c0_25] : memref<4x104x16xf32, #tpu.memory_space<vmem>>, vector<1x104x16xf32>
    %39 = vector.shape_cast %38 : vector<1x104x16xf32> to vector<104x16xf32>
    %40 = vector.broadcast %37 : vector<104x1xf32> to vector<104x16xf32>
    %41 = arith.mulf %40, %39 : vector<104x16xf32>
    %42 = arith.addf %36, %41 : vector<104x16xf32>
    %43 = vector.extract_strided_slice %0 {offsets = [0, 6], sizes = [104, 1], strides = [1, 1]} : vector<104x32xf32> to vector<104x1xf32>
    %c2_26 = arith.constant 2 : index
    %c0_27 = arith.constant 0 : index
    %c0_28 = arith.constant 0 : index
    %44 = vector.load %arg2[%c2_26, %c0_27, %c0_28] : memref<4x104x16xf32, #tpu.memory_space<vmem>>, vector<1x104x16xf32>
    %45 = vector.shape_cast %44 : vector<1x104x16xf32> to vector<104x16xf32>
    %46 = vector.broadcast %43 : vector<104x1xf32> to vector<104x16xf32>
    %47 = arith.mulf %46, %45 : vector<104x16xf32>
    %48 = arith.addf %42, %47 : vector<104x16xf32>
    %49 = vector.extract_strided_slice %0 {offsets = [0, 7], sizes = [104, 1], strides = [1, 1]} : vector<104x32xf32> to vector<104x1xf32>
    %c3_29 = arith.constant 3 : index
    %c0_30 = arith.constant 0 : index
    %c0_31 = arith.constant 0 : index
    %50 = vector.load %arg2[%c3_29, %c0_30, %c0_31] : memref<4x104x16xf32, #tpu.memory_space<vmem>>, vector<1x104x16xf32>
    %51 = vector.shape_cast %50 : vector<1x104x16xf32> to vector<104x16xf32>
    %52 = vector.broadcast %49 : vector<104x1xf32> to vector<104x16xf32>
    %53 = arith.mulf %52, %51 : vector<104x16xf32>
    %54 = arith.addf %48, %53 : vector<104x16xf32>
    %c0_32 = arith.constant 0 : index
    %c0_33 = arith.constant 0 : index
    %55 = vector.load %arg5[%c0_32, %c0_33] : memref<104x64xf32, #tpu.memory_space<vmem>>, vector<104x64xf32>
    %c1_34 = arith.constant 1 : index
    %c0_35 = arith.constant 0 : index
    %c0_36 = arith.constant 0 : index
    %56 = vector.load %arg3[%c1_34, %c0_35, %c0_36] : memref<8x16x64xf32, #tpu.memory_space<vmem>>, vector<1x16x64xf32>
    %57 = vector.shape_cast %56 : vector<1x16x64xf32> to vector<16x64xf32>
    %cst_37 = arith.constant dense<0.000000e+00> : vector<104x64xf32>
    %58 = tpu.matmul %54, %57, %cst_37 {dimension_numbers = #tpu.dot_dimension_numbers<[1], [0], [0], [1], [0, 0, 1, 1], [], []>} : vector<104x16xf32>, vector<16x64xf32>, vector<104x64xf32> -> vector<104x64xf32>
    %59 = arith.addf %55, %58 : vector<104x64xf32>
    %c0_38 = arith.constant 0 : index
    %c0_39 = arith.constant 0 : index
    %60 = vector.load %arg5[%c0_38, %c0_39] : memref<104x64xf32, #tpu.memory_space<vmem>>, vector<104x64xf32>
    tpu.vector_store %arg5[%c0_38, %c0_39], %59 {strides = array<i32>} : memref<104x64xf32, #tpu.memory_space<vmem>>, vector<104x64xf32>,
    %61 = vector.extract_strided_slice %0 {offsets = [0, 8], sizes = [104, 1], strides = [1, 1]} : vector<104x32xf32> to vector<104x1xf32>
    %c0_40 = arith.constant 0 : index
    %c0_41 = arith.constant 0 : index
    %c0_42 = arith.constant 0 : index
    %62 = vector.load %arg2[%c0_40, %c0_41, %c0_42] : memref<4x104x16xf32, #tpu.memory_space<vmem>>, vector<1x104x16xf32>
    %63 = vector.shape_cast %62 : vector<1x104x16xf32> to vector<104x16xf32>
    %64 = vector.broadcast %61 : vector<104x1xf32> to vector<104x16xf32>
    %65 = arith.mulf %64, %63 : vector<104x16xf32>
    %66 = vector.extract_strided_slice %0 {offsets = [0, 9], sizes = [104, 1], strides = [1, 1]} : vector<104x32xf32> to vector<104x1xf32>
    %c1_43 = arith.constant 1 : index
    %c0_44 = arith.constant 0 : index
    %c0_45 = arith.constant 0 : index
    %67 = vector.load %arg2[%c1_43, %c0_44, %c0_45] : memref<4x104x16xf32, #tpu.memory_space<vmem>>, vector<1x104x16xf32>
    %68 = vector.shape_cast %67 : vector<1x104x16xf32> to vector<104x16xf32>
    %69 = vector.broadcast %66 : vector<104x1xf32> to vector<104x16xf32>
    %70 = arith.mulf %69, %68 : vector<104x16xf32>
    %71 = arith.addf %65, %70 : vector<104x16xf32>
    %72 = vector.extract_strided_slice %0 {offsets = [0, 10], sizes = [104, 1], strides = [1, 1]} : vector<104x32xf32> to vector<104x1xf32>
    %c2_46 = arith.constant 2 : index
    %c0_47 = arith.constant 0 : index
    %c0_48 = arith.constant 0 : index
    %73 = vector.load %arg2[%c2_46, %c0_47, %c0_48] : memref<4x104x16xf32, #tpu.memory_space<vmem>>, vector<1x104x16xf32>
    %74 = vector.shape_cast %73 : vector<1x104x16xf32> to vector<104x16xf32>
    %75 = vector.broadcast %72 : vector<104x1xf32> to vector<104x16xf32>
    %76 = arith.mulf %75, %74 : vector<104x16xf32>
    %77 = arith.addf %71, %76 : vector<104x16xf32>
    %78 = vector.extract_strided_slice %0 {offsets = [0, 11], sizes = [104, 1], strides = [1, 1]} : vector<104x32xf32> to vector<104x1xf32>
    %c3_49 = arith.constant 3 : index
    %c0_50 = arith.constant 0 : index
    %c0_51 = arith.constant 0 : index
    %79 = vector.load %arg2[%c3_49, %c0_50, %c0_51] : memref<4x104x16xf32, #tpu.memory_space<vmem>>, vector<1x104x16xf32>
    %80 = vector.shape_cast %79 : vector<1x104x16xf32> to vector<104x16xf32>
    %81 = vector.broadcast %78 : vector<104x1xf32> to vector<104x16xf32>
    %82 = arith.mulf %81, %80 : vector<104x16xf32>
    %83 = arith.addf %77, %82 : vector<104x16xf32>
    %c0_52 = arith.constant 0 : index
    %c0_53 = arith.constant 0 : index
    %84 = vector.load %arg5[%c0_52, %c0_53] : memref<104x64xf32, #tpu.memory_space<vmem>>, vector<104x64xf32>
    %c2_54 = arith.constant 2 : index
    %c0_55 = arith.constant 0 : index
    %c0_56 = arith.constant 0 : index
    %85 = vector.load %arg3[%c2_54, %c0_55, %c0_56] : memref<8x16x64xf32, #tpu.memory_space<vmem>>, vector<1x16x64xf32>
    %86 = vector.shape_cast %85 : vector<1x16x64xf32> to vector<16x64xf32>
    %cst_57 = arith.constant dense<0.000000e+00> : vector<104x64xf32>
    %87 = tpu.matmul %83, %86, %cst_57 {dimension_numbers = #tpu.dot_dimension_numbers<[1], [0], [0], [1], [0, 0, 1, 1], [], []>} : vector<104x16xf32>, vector<16x64xf32>, vector<104x64xf32> -> vector<104x64xf32>
    %88 = arith.addf %84, %87 : vector<104x64xf32>
    %c0_58 = arith.constant 0 : index
    %c0_59 = arith.constant 0 : index
    %89 = vector.load %arg5[%c0_58, %c0_59] : memref<104x64xf32, #tpu.memory_space<vmem>>, vector<104x64xf32>
    tpu.vector_store %arg5[%c0_58, %c0_59], %88 {strides = array<i32>} : memref<104x64xf32, #tpu.memory_space<vmem>>, vector<104x64xf32>,
    %90 = vector.extract_strided_slice %0 {offsets = [0, 12], sizes = [104, 1], strides = [1, 1]} : vector<104x32xf32> to vector<104x1xf32>
    %c0_60 = arith.constant 0 : index
    %c0_61 = arith.constant 0 : index
    %c0_62 = arith.constant 0 : index
    %91 = vector.load %arg2[%c0_60, %c0_61, %c0_62] : memref<4x104x16xf32, #tpu.memory_space<vmem>>, vector<1x104x16xf32>
    %92 = vector.shape_cast %91 : vector<1x104x16xf32> to vector<104x16xf32>
    %93 = vector.broadcast %90 : vector<104x1xf32> to vector<104x16xf32>
    %94 = arith.mulf %93, %92 : vector<104x16xf32>
    %95 = vector.extract_strided_slice %0 {offsets = [0, 13], sizes = [104, 1], strides = [1, 1]} : vector<104x32xf32> to vector<104x1xf32>
    %c1_63 = arith.constant 1 : index
    %c0_64 = arith.constant 0 : index
    %c0_65 = arith.constant 0 : index
    %96 = vector.load %arg2[%c1_63, %c0_64, %c0_65] : memref<4x104x16xf32, #tpu.memory_space<vmem>>, vector<1x104x16xf32>
    %97 = vector.shape_cast %96 : vector<1x104x16xf32> to vector<104x16xf32>
    %98 = vector.broadcast %95 : vector<104x1xf32> to vector<104x16xf32>
    %99 = arith.mulf %98, %97 : vector<104x16xf32>
    %100 = arith.addf %94, %99 : vector<104x16xf32>
    %101 = vector.extract_strided_slice %0 {offsets = [0, 14], sizes = [104, 1], strides = [1, 1]} : vector<104x32xf32> to vector<104x1xf32>
    %c2_66 = arith.constant 2 : index
    %c0_67 = arith.constant 0 : index
    %c0_68 = arith.constant 0 : index
    %102 = vector.load %arg2[%c2_66, %c0_67, %c0_68] : memref<4x104x16xf32, #tpu.memory_space<vmem>>, vector<1x104x16xf32>
    %103 = vector.shape_cast %102 : vector<1x104x16xf32> to vector<104x16xf32>
    %104 = vector.broadcast %101 : vector<104x1xf32> to vector<104x16xf32>
    %105 = arith.mulf %104, %103 : vector<104x16xf32>
    %106 = arith.addf %100, %105 : vector<104x16xf32>
    %107 = vector.extract_strided_slice %0 {offsets = [0, 15], sizes = [104, 1], strides = [1, 1]} : vector<104x32xf32> to vector<104x1xf32>
    %c3_69 = arith.constant 3 : index
    %c0_70 = arith.constant 0 : index
    %c0_71 = arith.constant 0 : index
    %108 = vector.load %arg2[%c3_69, %c0_70, %c0_71] : memref<4x104x16xf32, #tpu.memory_space<vmem>>, vector<1x104x16xf32>
    %109 = vector.shape_cast %108 : vector<1x104x16xf32> to vector<104x16xf32>
    %110 = vector.broadcast %107 : vector<104x1xf32> to vector<104x16xf32>
    %111 = arith.mulf %110, %109 : vector<104x16xf32>
    %112 = arith.addf %106, %111 : vector<104x16xf32>
    %c0_72 = arith.constant 0 : index
    %c0_73 = arith.constant 0 : index
    %113 = vector.load %arg5[%c0_72, %c0_73] : memref<104x64xf32, #tpu.memory_space<vmem>>, vector<104x64xf32>
    %c3_74 = arith.constant 3 : index
    %c0_75 = arith.constant 0 : index
    %c0_76 = arith.constant 0 : index
    %114 = vector.load %arg3[%c3_74, %c0_75, %c0_76] : memref<8x16x64xf32, #tpu.memory_space<vmem>>, vector<1x16x64xf32>
    %115 = vector.shape_cast %114 : vector<1x16x64xf32> to vector<16x64xf32>
    %cst_77 = arith.constant dense<0.000000e+00> : vector<104x64xf32>
    %116 = tpu.matmul %112, %115, %cst_77 {dimension_numbers = #tpu.dot_dimension_numbers<[1], [0], [0], [1], [0, 0, 1, 1], [], []>} : vector<104x16xf32>, vector<16x64xf32>, vector<104x64xf32> -> vector<104x64xf32>
    %117 = arith.addf %113, %116 : vector<104x64xf32>
    %c0_78 = arith.constant 0 : index
    %c0_79 = arith.constant 0 : index
    %118 = vector.load %arg5[%c0_78, %c0_79] : memref<104x64xf32, #tpu.memory_space<vmem>>, vector<104x64xf32>
    tpu.vector_store %arg5[%c0_78, %c0_79], %117 {strides = array<i32>} : memref<104x64xf32, #tpu.memory_space<vmem>>, vector<104x64xf32>,
    %119 = vector.extract_strided_slice %0 {offsets = [0, 16], sizes = [104, 1], strides = [1, 1]} : vector<104x32xf32> to vector<104x1xf32>
    %c0_80 = arith.constant 0 : index
    %c0_81 = arith.constant 0 : index
    %c0_82 = arith.constant 0 : index
    %120 = vector.load %arg2[%c0_80, %c0_81, %c0_82] : memref<4x104x16xf32, #tpu.memory_space<vmem>>, vector<1x104x16xf32>
    %121 = vector.shape_cast %120 : vector<1x104x16xf32> to vector<104x16xf32>
    %122 = vector.broadcast %119 : vector<104x1xf32> to vector<104x16xf32>
    %123 = arith.mulf %122, %121 : vector<104x16xf32>
    %124 = vector.extract_strided_slice %0 {offsets = [0, 17], sizes = [104, 1], strides = [1, 1]} : vector<104x32xf32> to vector<104x1xf32>
    %c1_83 = arith.constant 1 : index
    %c0_84 = arith.constant 0 : index
    %c0_85 = arith.constant 0 : index
    %125 = vector.load %arg2[%c1_83, %c0_84, %c0_85] : memref<4x104x16xf32, #tpu.memory_space<vmem>>, vector<1x104x16xf32>
    %126 = vector.shape_cast %125 : vector<1x104x16xf32> to vector<104x16xf32>
    %127 = vector.broadcast %124 : vector<104x1xf32> to vector<104x16xf32>
    %128 = arith.mulf %127, %126 : vector<104x16xf32>
    %129 = arith.addf %123, %128 : vector<104x16xf32>
    %130 = vector.extract_strided_slice %0 {offsets = [0, 18], sizes = [104, 1], strides = [1, 1]} : vector<104x32xf32> to vector<104x1xf32>
    %c2_86 = arith.constant 2 : index
    %c0_87 = arith.constant 0 : index
    %c0_88 = arith.constant 0 : index
    %131 = vector.load %arg2[%c2_86, %c0_87, %c0_88] : memref<4x104x16xf32, #tpu.memory_space<vmem>>, vector<1x104x16xf32>
    %132 = vector.shape_cast %131 : vector<1x104x16xf32> to vector<104x16xf32>
    %133 = vector.broadcast %130 : vector<104x1xf32> to vector<104x16xf32>
    %134 = arith.mulf %133, %132 : vector<104x16xf32>
    %135 = arith.addf %129, %134 : vector<104x16xf32>
    %136 = vector.extract_strided_slice %0 {offsets = [0, 19], sizes = [104, 1], strides = [1, 1]} : vector<104x32xf32> to vector<104x1xf32>
    %c3_89 = arith.constant 3 : index
    %c0_90 = arith.constant 0 : index
    %c0_91 = arith.constant 0 : index
    %137 = vector.load %arg2[%c3_89, %c0_90, %c0_91] : memref<4x104x16xf32, #tpu.memory_space<vmem>>, vector<1x104x16xf32>
    %138 = vector.shape_cast %137 : vector<1x104x16xf32> to vector<104x16xf32>
    %139 = vector.broadcast %136 : vector<104x1xf32> to vector<104x16xf32>
    %140 = arith.mulf %139, %138 : vector<104x16xf32>
    %141 = arith.addf %135, %140 : vector<104x16xf32>
    %c0_92 = arith.constant 0 : index
    %c0_93 = arith.constant 0 : index
    %142 = vector.load %arg5[%c0_92, %c0_93] : memref<104x64xf32, #tpu.memory_space<vmem>>, vector<104x64xf32>
    %c4 = arith.constant 4 : index
    %c0_94 = arith.constant 0 : index
    %c0_95 = arith.constant 0 : index
    %143 = vector.load %arg3[%c4, %c0_94, %c0_95] : memref<8x16x64xf32, #tpu.memory_space<vmem>>, vector<1x16x64xf32>
    %144 = vector.shape_cast %143 : vector<1x16x64xf32> to vector<16x64xf32>
    %cst_96 = arith.constant dense<0.000000e+00> : vector<104x64xf32>
    %145 = tpu.matmul %141, %144, %cst_96 {dimension_numbers = #tpu.dot_dimension_numbers<[1], [0], [0], [1], [0, 0, 1, 1], [], []>} : vector<104x16xf32>, vector<16x64xf32>, vector<104x64xf32> -> vector<104x64xf32>
    %146 = arith.addf %142, %145 : vector<104x64xf32>
    %c0_97 = arith.constant 0 : index
    %c0_98 = arith.constant 0 : index
    %147 = vector.load %arg5[%c0_97, %c0_98] : memref<104x64xf32, #tpu.memory_space<vmem>>, vector<104x64xf32>
    tpu.vector_store %arg5[%c0_97, %c0_98], %146 {strides = array<i32>} : memref<104x64xf32, #tpu.memory_space<vmem>>, vector<104x64xf32>,
    %148 = vector.extract_strided_slice %0 {offsets = [0, 20], sizes = [104, 1], strides = [1, 1]} : vector<104x32xf32> to vector<104x1xf32>
    %c0_99 = arith.constant 0 : index
    %c0_100 = arith.constant 0 : index
    %c0_101 = arith.constant 0 : index
    %149 = vector.load %arg2[%c0_99, %c0_100, %c0_101] : memref<4x104x16xf32, #tpu.memory_space<vmem>>, vector<1x104x16xf32>
    %150 = vector.shape_cast %149 : vector<1x104x16xf32> to vector<104x16xf32>
    %151 = vector.broadcast %148 : vector<104x1xf32> to vector<104x16xf32>
    %152 = arith.mulf %151, %150 : vector<104x16xf32>
    %153 = vector.extract_strided_slice %0 {offsets = [0, 21], sizes = [104, 1], strides = [1, 1]} : vector<104x32xf32> to vector<104x1xf32>
    %c1_102 = arith.constant 1 : index
    %c0_103 = arith.constant 0 : index
    %c0_104 = arith.constant 0 : index
    %154 = vector.load %arg2[%c1_102, %c0_103, %c0_104] : memref<4x104x16xf32, #tpu.memory_space<vmem>>, vector<1x104x16xf32>
    %155 = vector.shape_cast %154 : vector<1x104x16xf32> to vector<104x16xf32>
    %156 = vector.broadcast %153 : vector<104x1xf32> to vector<104x16xf32>
    %157 = arith.mulf %156, %155 : vector<104x16xf32>
    %158 = arith.addf %152, %157 : vector<104x16xf32>
    %159 = vector.extract_strided_slice %0 {offsets = [0, 22], sizes = [104, 1], strides = [1, 1]} : vector<104x32xf32> to vector<104x1xf32>
    %c2_105 = arith.constant 2 : index
    %c0_106 = arith.constant 0 : index
    %c0_107 = arith.constant 0 : index
    %160 = vector.load %arg2[%c2_105, %c0_106, %c0_107] : memref<4x104x16xf32, #tpu.memory_space<vmem>>, vector<1x104x16xf32>
    %161 = vector.shape_cast %160 : vector<1x104x16xf32> to vector<104x16xf32>
    %162 = vector.broadcast %159 : vector<104x1xf32> to vector<104x16xf32>
    %163 = arith.mulf %162, %161 : vector<104x16xf32>
    %164 = arith.addf %158, %163 : vector<104x16xf32>
    %165 = vector.extract_strided_slice %0 {offsets = [0, 23], sizes = [104, 1], strides = [1, 1]} : vector<104x32xf32> to vector<104x1xf32>
    %c3_108 = arith.constant 3 : index
    %c0_109 = arith.constant 0 : index
    %c0_110 = arith.constant 0 : index
    %166 = vector.load %arg2[%c3_108, %c0_109, %c0_110] : memref<4x104x16xf32, #tpu.memory_space<vmem>>, vector<1x104x16xf32>
    %167 = vector.shape_cast %166 : vector<1x104x16xf32> to vector<104x16xf32>
    %168 = vector.broadcast %165 : vector<104x1xf32> to vector<104x16xf32>
    %169 = arith.mulf %168, %167 : vector<104x16xf32>
    %170 = arith.addf %164, %169 : vector<104x16xf32>
    %c0_111 = arith.constant 0 : index
    %c0_112 = arith.constant 0 : index
    %171 = vector.load %arg5[%c0_111, %c0_112] : memref<104x64xf32, #tpu.memory_space<vmem>>, vector<104x64xf32>
    %c5 = arith.constant 5 : index
    %c0_113 = arith.constant 0 : index
    %c0_114 = arith.constant 0 : index
    %172 = vector.load %arg3[%c5, %c0_113, %c0_114] : memref<8x16x64xf32, #tpu.memory_space<vmem>>, vector<1x16x64xf32>
    %173 = vector.shape_cast %172 : vector<1x16x64xf32> to vector<16x64xf32>
    %cst_115 = arith.constant dense<0.000000e+00> : vector<104x64xf32>
    %174 = tpu.matmul %170, %173, %cst_115 {dimension_numbers = #tpu.dot_dimension_numbers<[1], [0], [0], [1], [0, 0, 1, 1], [], []>} : vector<104x16xf32>, vector<16x64xf32>, vector<104x64xf32> -> vector<104x64xf32>
    %175 = arith.addf %171, %174 : vector<104x64xf32>
    %c0_116 = arith.constant 0 : index
    %c0_117 = arith.constant 0 : index
    %176 = vector.load %arg5[%c0_116, %c0_117] : memref<104x64xf32, #tpu.memory_space<vmem>>, vector<104x64xf32>
    tpu.vector_store %arg5[%c0_116, %c0_117], %175 {strides = array<i32>} : memref<104x64xf32, #tpu.memory_space<vmem>>, vector<104x64xf32>,
    %177 = vector.extract_strided_slice %0 {offsets = [0, 24], sizes = [104, 1], strides = [1, 1]} : vector<104x32xf32> to vector<104x1xf32>
    %c0_118 = arith.constant 0 : index
    %c0_119 = arith.constant 0 : index
    %c0_120 = arith.constant 0 : index
    %178 = vector.load %arg2[%c0_118, %c0_119, %c0_120] : memref<4x104x16xf32, #tpu.memory_space<vmem>>, vector<1x104x16xf32>
    %179 = vector.shape_cast %178 : vector<1x104x16xf32> to vector<104x16xf32>
    %180 = vector.broadcast %177 : vector<104x1xf32> to vector<104x16xf32>
    %181 = arith.mulf %180, %179 : vector<104x16xf32>
    %182 = vector.extract_strided_slice %0 {offsets = [0, 25], sizes = [104, 1], strides = [1, 1]} : vector<104x32xf32> to vector<104x1xf32>
    %c1_121 = arith.constant 1 : index
    %c0_122 = arith.constant 0 : index
    %c0_123 = arith.constant 0 : index
    %183 = vector.load %arg2[%c1_121, %c0_122, %c0_123] : memref<4x104x16xf32, #tpu.memory_space<vmem>>, vector<1x104x16xf32>
    %184 = vector.shape_cast %183 : vector<1x104x16xf32> to vector<104x16xf32>
    %185 = vector.broadcast %182 : vector<104x1xf32> to vector<104x16xf32>
    %186 = arith.mulf %185, %184 : vector<104x16xf32>
    %187 = arith.addf %181, %186 : vector<104x16xf32>
    %188 = vector.extract_strided_slice %0 {offsets = [0, 26], sizes = [104, 1], strides = [1, 1]} : vector<104x32xf32> to vector<104x1xf32>
    %c2_124 = arith.constant 2 : index
    %c0_125 = arith.constant 0 : index
    %c0_126 = arith.constant 0 : index
    %189 = vector.load %arg2[%c2_124, %c0_125, %c0_126] : memref<4x104x16xf32, #tpu.memory_space<vmem>>, vector<1x104x16xf32>
    %190 = vector.shape_cast %189 : vector<1x104x16xf32> to vector<104x16xf32>
    %191 = vector.broadcast %188 : vector<104x1xf32> to vector<104x16xf32>
    %192 = arith.mulf %191, %190 : vector<104x16xf32>
    %193 = arith.addf %187, %192 : vector<104x16xf32>
    %194 = vector.extract_strided_slice %0 {offsets = [0, 27], sizes = [104, 1], strides = [1, 1]} : vector<104x32xf32> to vector<104x1xf32>
    %c3_127 = arith.constant 3 : index
    %c0_128 = arith.constant 0 : index
    %c0_129 = arith.constant 0 : index
    %195 = vector.load %arg2[%c3_127, %c0_128, %c0_129] : memref<4x104x16xf32, #tpu.memory_space<vmem>>, vector<1x104x16xf32>
    %196 = vector.shape_cast %195 : vector<1x104x16xf32> to vector<104x16xf32>
    %197 = vector.broadcast %194 : vector<104x1xf32> to vector<104x16xf32>
    %198 = arith.mulf %197, %196 : vector<104x16xf32>
    %199 = arith.addf %193, %198 : vector<104x16xf32>
    %c0_130 = arith.constant 0 : index
    %c0_131 = arith.constant 0 : index
    %200 = vector.load %arg5[%c0_130, %c0_131] : memref<104x64xf32, #tpu.memory_space<vmem>>, vector<104x64xf32>
    %c6 = arith.constant 6 : index
    %c0_132 = arith.constant 0 : index
    %c0_133 = arith.constant 0 : index
    %201 = vector.load %arg3[%c6, %c0_132, %c0_133] : memref<8x16x64xf32, #tpu.memory_space<vmem>>, vector<1x16x64xf32>
    %202 = vector.shape_cast %201 : vector<1x16x64xf32> to vector<16x64xf32>
    %cst_134 = arith.constant dense<0.000000e+00> : vector<104x64xf32>
    %203 = tpu.matmul %199, %202, %cst_134 {dimension_numbers = #tpu.dot_dimension_numbers<[1], [0], [0], [1], [0, 0, 1, 1], [], []>} : vector<104x16xf32>, vector<16x64xf32>, vector<104x64xf32> -> vector<104x64xf32>
    %204 = arith.addf %200, %203 : vector<104x64xf32>
    %c0_135 = arith.constant 0 : index
    %c0_136 = arith.constant 0 : index
    %205 = vector.load %arg5[%c0_135, %c0_136] : memref<104x64xf32, #tpu.memory_space<vmem>>, vector<104x64xf32>
    tpu.vector_store %arg5[%c0_135, %c0_136], %204 {strides = array<i32>} : memref<104x64xf32, #tpu.memory_space<vmem>>, vector<104x64xf32>,
    %206 = vector.extract_strided_slice %0 {offsets = [0, 28], sizes = [104, 1], strides = [1, 1]} : vector<104x32xf32> to vector<104x1xf32>
    %c0_137 = arith.constant 0 : index
    %c0_138 = arith.constant 0 : index
    %c0_139 = arith.constant 0 : index
    %207 = vector.load %arg2[%c0_137, %c0_138, %c0_139] : memref<4x104x16xf32, #tpu.memory_space<vmem>>, vector<1x104x16xf32>
    %208 = vector.shape_cast %207 : vector<1x104x16xf32> to vector<104x16xf32>
    %209 = vector.broadcast %206 : vector<104x1xf32> to vector<104x16xf32>
    %210 = arith.mulf %209, %208 : vector<104x16xf32>
    %211 = vector.extract_strided_slice %0 {offsets = [0, 29], sizes = [104, 1], strides = [1, 1]} : vector<104x32xf32> to vector<104x1xf32>
    %c1_140 = arith.constant 1 : index
    %c0_141 = arith.constant 0 : index
    %c0_142 = arith.constant 0 : index
    %212 = vector.load %arg2[%c1_140, %c0_141, %c0_142] : memref<4x104x16xf32, #tpu.memory_space<vmem>>, vector<1x104x16xf32>
    %213 = vector.shape_cast %212 : vector<1x104x16xf32> to vector<104x16xf32>
    %214 = vector.broadcast %211 : vector<104x1xf32> to vector<104x16xf32>
    %215 = arith.mulf %214, %213 : vector<104x16xf32>
    %216 = arith.addf %210, %215 : vector<104x16xf32>
    %217 = vector.extract_strided_slice %0 {offsets = [0, 30], sizes = [104, 1], strides = [1, 1]} : vector<104x32xf32> to vector<104x1xf32>
    %c2_143 = arith.constant 2 : index
    %c0_144 = arith.constant 0 : index
    %c0_145 = arith.constant 0 : index
    %218 = vector.load %arg2[%c2_143, %c0_144, %c0_145] : memref<4x104x16xf32, #tpu.memory_space<vmem>>, vector<1x104x16xf32>
    %219 = vector.shape_cast %218 : vector<1x104x16xf32> to vector<104x16xf32>
    %220 = vector.broadcast %217 : vector<104x1xf32> to vector<104x16xf32>
    %221 = arith.mulf %220, %219 : vector<104x16xf32>
    %222 = arith.addf %216, %221 : vector<104x16xf32>
    %223 = vector.extract_strided_slice %0 {offsets = [0, 31], sizes = [104, 1], strides = [1, 1]} : vector<104x32xf32> to vector<104x1xf32>
    %c3_146 = arith.constant 3 : index
    %c0_147 = arith.constant 0 : index
    %c0_148 = arith.constant 0 : index
    %224 = vector.load %arg2[%c3_146, %c0_147, %c0_148] : memref<4x104x16xf32, #tpu.memory_space<vmem>>, vector<1x104x16xf32>
    %225 = vector.shape_cast %224 : vector<1x104x16xf32> to vector<104x16xf32>
    %226 = vector.broadcast %223 : vector<104x1xf32> to vector<104x16xf32>
    %227 = arith.mulf %226, %225 : vector<104x16xf32>
    %228 = arith.addf %222, %227 : vector<104x16xf32>
    %c0_149 = arith.constant 0 : index
    %c0_150 = arith.constant 0 : index
    %229 = vector.load %arg5[%c0_149, %c0_150] : memref<104x64xf32, #tpu.memory_space<vmem>>, vector<104x64xf32>
    %c7 = arith.constant 7 : index
    %c0_151 = arith.constant 0 : index
    %c0_152 = arith.constant 0 : index
    %230 = vector.load %arg3[%c7, %c0_151, %c0_152] : memref<8x16x64xf32, #tpu.memory_space<vmem>>, vector<1x16x64xf32>
    %231 = vector.shape_cast %230 : vector<1x16x64xf32> to vector<16x64xf32>
    %cst_153 = arith.constant dense<0.000000e+00> : vector<104x64xf32>
    %232 = tpu.matmul %228, %231, %cst_153 {dimension_numbers = #tpu.dot_dimension_numbers<[1], [0], [0], [1], [0, 0, 1, 1], [], []>} : vector<104x16xf32>, vector<16x64xf32>, vector<104x64xf32> -> vector<104x64xf32>
    %233 = arith.addf %229, %232 : vector<104x64xf32>
    %c0_154 = arith.constant 0 : index
    %c0_155 = arith.constant 0 : index
    %234 = vector.load %arg5[%c0_154, %c0_155] : memref<104x64xf32, #tpu.memory_space<vmem>>, vector<104x64xf32>
    tpu.vector_store %arg5[%c0_154, %c0_155], %233 {strides = array<i32>} : memref<104x64xf32, #tpu.memory_space<vmem>>, vector<104x64xf32>,
    %c0_156 = arith.constant 0 : index
    %c0_157 = arith.constant 0 : index
    %235 = vector.load %arg5[%c0_156, %c0_157] : memref<104x64xf32, #tpu.memory_space<vmem>>, vector<104x64xf32>
    %cst_158 = arith.constant 0.000000e+00 : f32
    %236 = vector.broadcast %cst_158 : f32 to vector<104x64xf32>
    %237 = arith.subf %236, %235 : vector<104x64xf32>
    %238 = math.exp %237 : vector<104x64xf32>
    %cst_159 = arith.constant 1.000000e+00 : f32
    %239 = vector.broadcast %cst_159 : f32 to vector<104x64xf32>
    %240 = arith.addf %239, %238 : vector<104x64xf32>
    %cst_160 = arith.constant 1.000000e+00 : f32
    %241 = vector.broadcast %cst_160 : f32 to vector<104x64xf32>
    %242 = arith.divf %241, %240 : vector<104x64xf32>
    %243 = arith.mulf %235, %242 : vector<104x64xf32>
    %cst_161 = arith.constant 1.66666663 : f32
    %244 = vector.broadcast %cst_161 : f32 to vector<104x64xf32>
    %245 = arith.mulf %243, %244 : vector<104x64xf32>
    %c0_162 = arith.constant 0 : index
    %c0_163 = arith.constant 0 : index
    %246 = vector.load %arg4[%c0_162, %c0_163] : memref<104x64xf32, #tpu.memory_space<vmem>>, vector<104x64xf32>
    tpu.vector_store %arg4[%c0_162, %c0_163], %245 {strides = array<i32>} : memref<104x64xf32, #tpu.memory_space<vmem>>, vector<104x64xf32>,
    return
  }
  func.func @transform_0(%arg0: i32) -> (i32, i32) {
    %c0_i32 = arith.constant 0 : i32
    %c0_i32_0 = arith.constant 0 : i32
    return %arg0, %c0_i32 : i32, i32
  }
  func.func @transform_1(%arg0: i32) -> (i32, i32, i32) {
    %c0_i32 = arith.constant 0 : i32
    %c0_i32_0 = arith.constant 0 : i32
    %c0_i32_1 = arith.constant 0 : i32
    return %c0_i32, %arg0, %c0_i32_0 : i32, i32, i32
  }
  func.func @transform_2(%arg0: i32) -> (i32, i32, i32) {
    %c0_i32 = arith.constant 0 : i32
    %c0_i32_0 = arith.constant 0 : i32
    %c0_i32_1 = arith.constant 0 : i32
    %c0_i32_2 = arith.constant 0 : i32
    return %c0_i32, %c0_i32_0, %c0_i32_1 : i32, i32, i32
  }
  func.func @transform_3(%arg0: i32) -> (i32, i32) {
    %c0_i32 = arith.constant 0 : i32
    %c0_i32_0 = arith.constant 0 : i32
    return %arg0, %c0_i32 : i32, i32
  }
}

</mosaic_0001>

<bundles_post_ra>
// kernel: tpu_custom_call.1
= control target key start
LH: loop header
LB: loop body
LE: loop exit
PB: predicated region body
PF: predicated region fallthrough
CT: control target
= control target key end

     0   :  { %s5562_s12 = smov 0   ;;  %s5564_s13 = smov 0   ;;  %s8685_s0 = inlined_call_operand.vmem [shape: f32[208,32], index: 0, kind: input, shape index: {}]   ;;  %s8686_s1 = inlined_call_operand.vmem [shape: f32[4,208,16], index: 1, kind: input, shape index: {}]   ;;  %s8687_s2 = inlined_call_operand.vmem [shape: f32[8,16,64], index: 2, kind: input, shape index: {}]   ;;  %s8688_s3 = inlined_call_operand.vmem [shape: f32[208,64], index: 3, kind: output, shape index: {}]  }
   0x1   :  { %s5566_s14 = smov 0  }
   0x2 LB: > { %s4755_s15 = sadd.s32 4294967295, %s5507_s14   ;;  %s5579_s16 = sadd.s32 1, %s5507_s14   ;;  %s5507_s14 = sphi %s5566_s14, %s9154_s14   ;;  %s5503_s13 = sphi %s5564_s13, %s9153_s13   ;;  %s5499_s12 = sphi %s5562_s12, %s9152_s12  }
   0x3   : > { %s43_s17 = ssub.s32 %s5507_s14, %s5579_s16  ;;  %s46_s18 = sadd.s32 1, %s5503_s13 }
   0x4   : > { %p44_p0 = scmp.eq.s32.totalorder %s43_s17, 0  ;;  %p53_p1 = scmp.ne.s32.totalorder %s5503_s13, %s5499_s12 }
   0x5   : > { %p54_p2 = scmp.eq.s32.totalorder %s5507_s14, 0  ;;  %p4758_p4 = scmp.ge.s32.totalorder %s5507_s14, 2 }
   0x6   : > { %s5588_s19 = scalar_select %p44_p0, %s5503_s13, %s46_s18  }
   0x7   : > { %p55_p3 = por %p54_p2, %p53_p1  ;;  %129 = sbr.rel (%p4758_p4) target bundleno = 69 (0x45), region = 20 }
   0xc   : > { %141 = sbr.rel (!%p55_p3) target bundleno = 69 (0x45), region = 28  ;;  %s143_s20 = sand.u32 (%p55_p3), 1, %s5503_s13  }
   0xd   : > { %s5195_s21 = smul.u32 (%p55_p3), 104, %s5507_s14 }
   0xe   : > { %s5196_s22 = smul.u32 (%p55_p3), 416, %s143_s20 }
   0xf   : > { %s5596_s25 = scalar_lea.vmem (%p55_p3), %s8686_s1, %s5195_s21 }
  0x10   : > { %v279_v0 = vld [vmem:[%s5596_s25] sm:$0xff] (%p55_p3)  ;;  %v281_v1 = vld [vmem:[%s5596_s25 + $0x8] sm:$0xff] (%p55_p3)  ;;  %v283_v2 = vld [vmem:[%s5596_s25 + $0x10] sm:$0xff] (%p55_p3)  ;;  %s5601_s26 = scalar_lea.vmem (%p55_p3), [#allocation3], %s5196_s22 }
  0x11   : > { %280 = vst [vmem:[%s5601_s26] sm:$0xff] %v279_v0  ;;  %v285_v3 = vld [vmem:[%s5596_s25 + $0x18] sm:$0xff]  ;;  %v287_v4 = vld [vmem:[%s5596_s25 + $0x20] sm:$0xff]  ;;  %v289_v5 = vld [vmem:[%s5596_s25 + $0x28] sm:$0xff] }
  0x12   : > { %282 = vst [vmem:[%s5601_s26 + $0x8] sm:$0xff] %v281_v1  ;;  %v291_v6 = vld [vmem:[%s5596_s25 + $0x30] sm:$0xff]  ;;  %v293_v7 = vld [vmem:[%s5596_s25 + $0x38] sm:$0xff]  ;;  %v295_v8 = vld [vmem:[%s5596_s25 + $0x40] sm:$0xff] }
  0x13   : > { %284 = vst [vmem:[%s5601_s26 + $0x10] sm:$0xff] %v283_v2  ;;  %v297_v9 = vld [vmem:[%s5596_s25 + $0x48] sm:$0xff]  ;;  %v299_v10 = vld [vmem:[%s5596_s25 + $0x50] sm:$0xff]  ;;  %v301_v11 = vld [vmem:[%s5596_s25 + $0x58] sm:$0xff] }
  0x14   : > { %286 = vst [vmem:[%s5601_s26 + $0x18] sm:$0xff] %v285_v3  ;;  %v303_v12 = vld [vmem:[%s5596_s25 + $0x60] sm:$0xff]  ;;  %v305_v13 = vld [vmem:[%s5596_s25 + $0xd0] sm:$0xff]  ;;  %v307_v14 = vld [vmem:[%s5596_s25 + $0xd8] sm:$0xff] }
  0x15   : > { %288 = vst [vmem:[%s5601_s26 + $0x20] sm:$0xff] %v287_v4  ;;  %v309_v15 = vld [vmem:[%s5596_s25 + $0xe0] sm:$0xff]  ;;  %v311_v16 = vld [vmem:[%s5596_s25 + $0xe8] sm:$0xff]  ;;  %v313_v17 = vld [vmem:[%s5596_s25 + $0xf0] sm:$0xff] }
  0x16   : > { %290 = vst [vmem:[%s5601_s26 + $0x28] sm:$0xff] %v289_v5  ;;  %v315_v18 = vld [vmem:[%s5596_s25 + $0xf8] sm:$0xff]  ;;  %v317_v19 = vld [vmem:[%s5596_s25 + $0x100] sm:$0xff]  ;;  %v319_v20 = vld [vmem:[%s5596_s25 + $0x108] sm:$0xff] }
  0x17   : > { %292 = vst [vmem:[%s5601_s26 + $0x30] sm:$0xff] %v291_v6  ;;  %v321_v21 = vld [vmem:[%s5596_s25 + $0x110] sm:$0xff]  ;;  %v323_v22 = vld [vmem:[%s5596_s25 + $0x118] sm:$0xff]  ;;  %v325_v23 = vld [vmem:[%s5596_s25 + $0x120] sm:$0xff] }
  0x18   : > { %294 = vst [vmem:[%s5601_s26 + $0x38] sm:$0xff] %v293_v7  ;;  %v327_v24 = vld [vmem:[%s5596_s25 + $0x128] sm:$0xff]  ;;  %v329_v25 = vld [vmem:[%s5596_s25 + $0x130] sm:$0xff]  ;;  %v331_v26 = vld [vmem:[%s5596_s25 + $0x1a0] sm:$0xff] }
  0x19   : > { %296 = vst [vmem:[%s5601_s26 + $0x40] sm:$0xff] %v295_v8  ;;  %v333_v27 = vld [vmem:[%s5596_s25 + $0x1a8] sm:$0xff]  ;;  %v335_v28 = vld [vmem:[%s5596_s25 + $0x1b0] sm:$0xff]  ;;  %v337_v29 = vld [vmem:[%s5596_s25 + $0x1b8] sm:$0xff] }
  0x1a   : > { %298 = vst [vmem:[%s5601_s26 + $0x48] sm:$0xff] %v297_v9  ;;  %v339_v30 = vld [vmem:[%s5596_s25 + $0x1c0] sm:$0xff]  ;;  %v341_v31 = vld [vmem:[%s5596_s25 + $0x1c8] sm:$0xff]  ;;  %v343_v32 = vld [vmem:[%s5596_s25 + $0x1d0] sm:$0xff] }
  0x1b   : > { %300 = vst [vmem:[%s5601_s26 + $0x50] sm:$0xff] %v299_v10  ;;  %v345_v33 = vld [vmem:[%s5596_s25 + $0x1d8] sm:$0xff]  ;;  %v347_v34 = vld [vmem:[%s5596_s25 + $0x1e0] sm:$0xff]  ;;  %v349_v35 = vld [vmem:[%s5596_s25 + $0x1e8] sm:$0xff] }
  0x1c   : > { %302 = vst [vmem:[%s5601_s26 + $0x58] sm:$0xff] %v301_v11  ;;  %v351_v36 = vld [vmem:[%s5596_s25 + $0x1f0] sm:$0xff]  ;;  %v353_v37 = vld [vmem:[%s5596_s25 + $0x1f8] sm:$0xff]  ;;  %v355_v38 = vld [vmem:[%s5596_s25 + $0x200] sm:$0xff] }
  0x1d   : > { %304 = vst [vmem:[%s5601_s26 + $0x60] sm:$0xff] %v303_v12  ;;  %v357_v39 = vld [vmem:[%s5596_s25 + $0x270] sm:$0xff]  ;;  %v359_v40 = vld [vmem:[%s5596_s25 + $0x278] sm:$0xff]  ;;  %v361_v41 = vld [vmem:[%s5596_s25 + $0x280] sm:$0xff] }
  0x1e   : > { %306 = vst [vmem:[%s5601_s26 + $0x68] sm:$0xff] %v305_v13  ;;  %v363_v42 = vld [vmem:[%s5596_s25 + $0x288] sm:$0xff]  ;;  %v365_v43 = vld [vmem:[%s5596_s25 + $0x290] sm:$0xff]  ;;  %v367_v44 = vld [vmem:[%s5596_s25 + $0x298] sm:$0xff] }
  0x1f   : > { %308 = vst [vmem:[%s5601_s26 + $0x70] sm:$0xff] %v307_v14  ;;  %v369_v45 = vld [vmem:[%s5596_s25 + $0x2a0] sm:$0xff]  ;;  %v371_v46 = vld [vmem:[%s5596_s25 + $0x2a8] sm:$0xff]  ;;  %v373_v47 = vld [vmem:[%s5596_s25 + $0x2b0] sm:$0xff] }
  0x20   : > { %310 = vst [vmem:[%s5601_s26 + $0x78] sm:$0xff] %v309_v15  ;;  %v375_v48 = vld [vmem:[%s5596_s25 + $0x2b8] sm:$0xff]  ;;  %v377_v49 = vld [vmem:[%s5596_s25 + $0x2c0] sm:$0xff]  ;;  %v379_v50 = vld [vmem:[%s5596_s25 + $0x2c8] sm:$0xff] }
  0x21   : > { %312 = vst [vmem:[%s5601_s26 + $0x80] sm:$0xff] %v311_v16  ;;  %v381_v51 = vld [vmem:[%s5596_s25 + $0x2d0] sm:$0xff] }
  0x22   : > { %314 = vst [vmem:[%s5601_s26 + $0x88] sm:$0xff] %v313_v17 }
  0x23   : > { %316 = vst [vmem:[%s5601_s26 + $0x90] sm:$0xff] %v315_v18 }
  0x24   : > { %318 = vst [vmem:[%s5601_s26 + $0x98] sm:$0xff] %v317_v19 }
  0x25   : > { %320 = vst [vmem:[%s5601_s26 + $0xa0] sm:$0xff] %v319_v20 }
  0x26   : > { %322 = vst [vmem:[%s5601_s26 + $0xa8] sm:$0xff] %v321_v21 }
  0x27   : > { %324 = vst [vmem:[%s5601_s26 + $0xb0] sm:$0xff] %v323_v22 }
  0x28   : > { %326 = vst [vmem:[%s5601_s26 + $0xb8] sm:$0xff] %v325_v23 }
  0x29   : > { %328 = vst [vmem:[%s5601_s26 + $0xc0] sm:$0xff] %v327_v24 }
  0x2a   : > { %330 = vst [vmem:[%s5601_s26 + $0xc8] sm:$0xff] %v329_v25 }
  0x2b   : > { %332 = vst [vmem:[%s5601_s26 + $0xd0] sm:$0xff] %v331_v26 }
  0x2c   : > { %334 = vst [vmem:[%s5601_s26 + $0xd8] sm:$0xff] %v333_v27 }
  0x2d   : > { %336 = vst [vmem:[%s5601_s26 + $0xe0] sm:$0xff] %v335_v28 }
  0x2e   : > { %338 = vst [vmem:[%s5601_s26 + $0xe8] sm:$0xff] %v337_v29 }
  0x2f   : > { %340 = vst [vmem:[%s5601_s26 + $0xf0] sm:$0xff] %v339_v30 }
  0x30   : > { %342 = vst [vmem:[%s5601_s26 + $0xf8] sm:$0xff] %v341_v31 }
  0x31   : > { %344 = vst [vmem:[%s5601_s26 + $0x100] sm:$0xff] %v343_v32 }
  0x32   : > { %346 = vst [vmem:[%s5601_s26 + $0x108] sm:$0xff] %v345_v33 }
  0x33   : > { %348 = vst [vmem:[%s5601_s26 + $0x110] sm:$0xff] %v347_v34 }
  0x34   : > { %350 = vst [vmem:[%s5601_s26 + $0x118] sm:$0xff] %v349_v35 }
  0x35   : > { %352 = vst [vmem:[%s5601_s26 + $0x120] sm:$0xff] %v351_v36 }
  0x36   : > { %354 = vst [vmem:[%s5601_s26 + $0x128] sm:$0xff] %v353_v37 }
  0x37   : > { %356 = vst [vmem:[%s5601_s26 + $0x130] sm:$0xff] %v355_v38 }
  0x38   : > { %358 = vst [vmem:[%s5601_s26 + $0x138] sm:$0xff] %v357_v39 }
  0x39   : > { %360 = vst [vmem:[%s5601_s26 + $0x140] sm:$0xff] %v359_v40 }
  0x3a   : > { %362 = vst [vmem:[%s5601_s26 + $0x148] sm:$0xff] %v361_v41 }
  0x3b   : > { %364 = vst [vmem:[%s5601_s26 + $0x150] sm:$0xff] %v363_v42 }
  0x3c   : > { %366 = vst [vmem:[%s5601_s26 + $0x158] sm:$0xff] %v365_v43 }
  0x3d   : > { %368 = vst [vmem:[%s5601_s26 + $0x160] sm:$0xff] %v367_v44 }
  0x3e   : > { %370 = vst [vmem:[%s5601_s26 + $0x168] sm:$0xff] %v369_v45 }
  0x3f   : > { %372 = vst [vmem:[%s5601_s26 + $0x170] sm:$0xff] %v371_v46 }
  0x40   : > { %374 = vst [vmem:[%s5601_s26 + $0x178] sm:$0xff] %v373_v47 }
  0x41   : > { %376 = vst [vmem:[%s5601_s26 + $0x180] sm:$0xff] %v375_v48 }
  0x42   : > { %378 = vst [vmem:[%s5601_s26 + $0x188] sm:$0xff] %v377_v49 }
  0x43   : > { %380 = vst [vmem:[%s5601_s26 + $0x190] sm:$0xff] %v379_v50 }
  0x44   : > { %382 = vst [vmem:[%s5601_s26 + $0x198] sm:$0xff] %v381_v51 }
  0x45 PF: > { %p4760_p5 = scmp.ge.s32.totalorder %s5507_s14, 1  ;;  %p387_p6 = scmp.lt.s32.totalorder %s5507_s14, 3 }
  0x47   : > { %p388_p7 = pnand %p4760_p5, %p387_p6 }
  0x49   : > { %391 = sbr.rel (%p388_p7) target bundleno = 1633 (0x661), region = 66 }
  0x4e   : > { %s422_s27 = smul.u32 13, %s4755_s15  ;;  %v5509_v52 = vmov 0   ;;  %v5510_v2 = vmov 1   ;;  %v5511_v3 = vmov 2   ;;  %v5512_v6 = vmov 3   ;;  %v843_v31 = vld [vmem:[%s8687_s2 + $0x8] sm:$0xff] }
  0x4f   : > { %5257 = vset.pattern.permute.xlu2 %v5509_v52  ;;  %5256 = vset.pattern.permute.xlu1 %v5509_v52  ;;  %v5513_v17 = vmov 4   ;;  %v5514_v27 = vmov 5   ;;  %v842_v32 = vld [vmem:[%s8687_s2] sm:$0xff]  ;;  %s394_s9 = sand.u32 1, %s5499_s12   ;;  %v5515_v44 = vmov 6   ;;  %vm844_vm0 = vcmask 130048  }
  0x50   : > { %5255 = vset.pattern.permute.xlu0 %v5509_v52  ;;  %p423_p8 = scmp.lt.s32.totalorder %s422_s27, 25  ;;  %898 = vmatpush.msra.mxu0 %v843_v31  ;;  %s5197_s10 = smul.u32 416, %s394_s9  ;;  %vm448_vm1 = vcmask 523264  }
  0x52   : > { %s9156_s27 = smov (!%p423_p8, %s422_s27), 25  ;;  %899 = vmatpush.msra.mxu0 %v842_v32  ;;  %s5889_s11 = scalar_lea.vmem [#allocation3], %s5197_s10 }
  0x53   : > { %s4761_s28 = sshll.u32 %s9156_s27, 3  ;;  %v5892_v39 = vld [vmem:[%s5889_s11] sm:$0xff]  ;;  %v5895_v40 = vld [vmem:[%s5889_s11 + $0x68] sm:$0xff]  ;;  %v5904_v45 = vld [vmem:[%s5889_s11 + $0xd0] sm:$0xff] }
  0x54   : > { %s5716_s4 = scalar_lea.vmem %s8685_s0, %s4761_s28  ;;  %8838 = vst [vmem:[#allocation4_spill] sm:$0xff] %v5904_v45  ;;  %v5912_v49 = vld [vmem:[%s5889_s11 + $0x138] sm:$0xff]  ;;  %v5930_v31 = vld [vmem:[%s5889_s11 + $0x8] sm:$0xff]  ;;  %s8629_s23 = scalar_lea.vmem %s8688_s3, %s4761_s28 }
  0x55   : > { %v5719_v53 = vld [vmem:[%s5716_s4 + $0x20] sm:$0xff]  ;;  %v5722_v54 = vld [vmem:[%s5716_s4 + $0x10] sm:$0xff]  ;;  %v5731_v56 = vld [vmem:[%s5716_s4 + $0x28] sm:$0xff]  ;;  %8839 = vst [vmem:[#allocation5_spill] sm:$0xff] %v5912_v49 }
  0x56   : > { %v5725_v55 = vld [vmem:[%s5716_s4] sm:$0xff]  ;;  %497 = vperm.xlu2 %5257, %v5719_v53   ;;  %487 = vperm.xlu1 %5256, %v5722_v54   ;;  %v5734_v57 = vld [vmem:[%s5716_s4 + $0x18] sm:$0xff]  ;;  %v5737_v58 = vld [vmem:[%s5716_s4 + $0x8] sm:$0xff]  ;;  %8841 = vst [vmem:[#allocation7_spill] sm:$0xff] %v5930_v31 }
  0x57   : > { %477 = vperm.xlu0 %5255, %v5725_v55   ;;  %v5743_v59 = vld [vmem:[%s5716_s4 + $0x40] sm:$0xff]  ;;  %v5746_v60 = vld [vmem:[%s5716_s4 + $0x38] sm:$0xff]  ;;  %v5749_v61 = vld [vmem:[%s5716_s4 + $0x30] sm:$0xff] }
  0x58   : > { %v5755_v62 = vld [vmem:[%s5716_s4 + $0x58] sm:$0xff]  ;;  %v5758_v63 = vld [vmem:[%s5716_s4 + $0x50] sm:$0xff]  ;;  %v5761_v0 = vld [vmem:[%s5716_s4 + $0x48] sm:$0xff] }
  0x59   : > { %v5767_v1 = vld [vmem:[%s5716_s4 + $0x60] sm:$0xff] }
  0x5e   : > { %502 = vperm.xlu2 %5257, %v5731_v56   ;;  %492 = vperm.xlu1 %5256, %v5734_v57  }
  0x5f   : > { %482 = vperm.xlu0 %5255, %v5737_v58  }
  0x66   : > { %517 = vperm.xlu2 %5257, %v5743_v59   ;;  %512 = vperm.xlu1 %5256, %v5746_v60  }
  0x67   : > { %507 = vperm.xlu0 %5255, %v5749_v61  }
  0x6e   : > { %532 = vperm.xlu2 %5257, %v5755_v62   ;;  %527 = vperm.xlu1 %5256, %v5758_v63  }
  0x6f   : > { %522 = vperm.xlu0 %5255, %v5761_v0  }
  0x76   : > { %5259 = vset.pattern.permute.xlu2 %v5510_v2  ;;  %5258 = vset.pattern.permute.xlu1 %v5510_v2 }
  0x77   : > { %537 = vperm.xlu0 %5255, %v5767_v1   ;;  %572 = vperm.xlu2 %5259, %v5737_v58  }
  0x78   : > { %568 = vperm.xlu1 %5258, %v5725_v55  }
  0x7f   : > { %5260 = vset.pattern.permute.xlu0 %v5510_v2  ;;  %584 = vperm.xlu2 %5259, %v5719_v53  }
  0x80   : > { %580 = vperm.xlu1 %5258, %v5734_v57   ;;  %576 = vperm.xlu0 %5260, %v5722_v54  }
  0x87   : > { %592 = vperm.xlu2 %5259, %v5749_v61  }
  0x88   : > { %588 = vperm.xlu1 %5258, %v5731_v56   ;;  %596 = vperm.xlu0 %5260, %v5746_v60  }
  0x8f   : > { %604 = vperm.xlu2 %5259, %v5761_v0  }
  0x90   : > { %600 = vperm.xlu1 %5258, %v5743_v59   ;;  %608 = vperm.xlu0 %5260, %v5758_v63  }
  0x97   : > { %616 = vperm.xlu2 %5259, %v5767_v1  }
  0x98   : > { %612 = vperm.xlu1 %5258, %v5755_v62   ;;  %5261 = vset.pattern.permute.xlu0 %v5511_v3 }
  0x99   : > { %660 = vperm.xlu0 %5261, %v5725_v55  }
  0x9f   : > { %5263 = vset.pattern.permute.xlu2 %v5511_v3 }
  0xa0   : > { %5262 = vset.pattern.permute.xlu1 %v5511_v3  ;;  %668 = vperm.xlu2 %5263, %v5722_v54  }
  0xa1   : > { %664 = vperm.xlu1 %5262, %v5737_v58   ;;  %680 = vperm.xlu0 %5261, %v5731_v56  }
  0xa8   : > { %676 = vperm.xlu2 %5263, %v5719_v53  }
  0xa9   : > { %672 = vperm.xlu1 %5262, %v5734_v57   ;;  %692 = vperm.xlu0 %5261, %v5743_v59  }
  0xb0   : > { %688 = vperm.xlu2 %5263, %v5746_v60   ;;  %v5791_v4 = vpop.permute.xlu2 %497 }
  0xb1   : > { %684 = vperm.xlu1 %5262, %v5749_v61   ;;  %704 = vperm.xlu0 %5261, %v5755_v62  }
  0xb8   : > { %700 = vperm.xlu2 %5263, %v5758_v63   ;;  %v5796_v5 = vpop.permute.xlu2 %502 }
  0xb9   : > { %696 = vperm.xlu1 %5262, %v5761_v0   ;;  %5265 = vset.pattern.permute.xlu0 %v5512_v6 }
  0xba   : > { %756 = vperm.xlu0 %5265, %v5737_v58  }
  0xc0   : > { %5264 = vset.pattern.permute.xlu2 %v5512_v6  ;;  %v5800_v7 = vpop.permute.xlu2 %517 }
  0xc1   : > { %708 = vperm.xlu1 %5262, %v5767_v1   ;;  %752 = vperm.xlu2 %5264, %v5725_v55  }
  0xc2   : > { %776 = vperm.xlu0 %5265, %v5749_v61  }
  0xc8   : > { %v5805_v8 = vpop.permute.xlu1 %487  ;;  %v5807_v9 = vpop.permute.xlu2 %532 }
  0xc9   : > { %5266 = vset.pattern.permute.xlu1 %v5512_v6  ;;  %764 = vperm.xlu2 %5264, %v5734_v57   ;;  %v5810_v10 = vpop.permute.xlu0 %477 }
  0xca   : > { %760 = vperm.xlu1 %5266, %v5722_v54   ;;  %788 = vperm.xlu0 %5265, %v5761_v0   ;;  %v540_v46 = vmul.f32 %v5810_v10, %v5892_v39 }
  0xd0   : > { %v5814_v11 = vpop.permute.xlu1 %492 }
  0xd1   : > { %v5816_v12 = vpop.permute.xlu2 %572  ;;  %772 = vperm.xlu2 %5264, %v5731_v56   ;;  %v5819_v13 = vpop.permute.xlu0 %482 }
  0xd2   : > { %768 = vperm.xlu1 %5266, %v5719_v53   ;;  %800 = vperm.xlu0 %5265, %v5767_v1  }
  0xd8   : > { %v5823_v14 = vpop.permute.xlu1 %512 }
  0xd9   : > { %v5825_v15 = vpop.permute.xlu2 %584  ;;  %784 = vperm.xlu2 %5264, %v5743_v59   ;;  %v5828_v16 = vpop.permute.xlu0 %507 }
  0xda   : > { %780 = vperm.xlu1 %5266, %v5746_v60   ;;  %5269 = vset.pattern.permute.xlu0 %v5513_v17 }
  0xdb   : > { %988 = vperm.xlu0 %5269, %v5722_v54  }
  0xe0   : > { %v5832_v18 = vpop.permute.xlu1 %527 }
  0xe1   : > { %v5834_v19 = vpop.permute.xlu2 %592  ;;  %796 = vperm.xlu2 %5264, %v5755_v62   ;;  %v5837_v20 = vpop.permute.xlu0 %522 }
  0xe2   : > { %792 = vperm.xlu1 %5266, %v5758_v63  }
  0xe3   : > { %1008 = vperm.xlu0 %5269, %v5746_v60  }
  0xe9   : > { %v5841_v21 = vpop.permute.xlu2 %604  ;;  %5268 = vset.pattern.permute.xlu2 %v5513_v17  ;;  %v5843_v22 = vpop.permute.xlu0 %537 }
  0xea   : > { %5267 = vset.pattern.permute.xlu1 %v5513_v17  ;;  %v569_v23 = vpop.permute.xlu1 %568  ;;  %984 = vperm.xlu2 %5268, %v5737_v58  }
  0xeb   : > { %980 = vperm.xlu1 %5267, %v5725_v55   ;;  %1020 = vperm.xlu0 %5269, %v5758_v63   ;;  %v619_v47 = vmul.f32 %v5895_v40, %v569_v23 }
  0xed   : > { %v632_v50 = vadd.f32 %v619_v47, %v540_v46  ;;  %v541_v47 = vmul.f32 %v5819_v13, %v5930_v31 }
  0xf1   : > { %v5848_v24 = vpop.permute.xlu2 %616 }
  0xf2   : > { %v5850_v25 = vpop.permute.xlu1 %580  ;;  %v5852_v26 = vpop.permute.xlu0 %576  ;;  %996 = vperm.xlu2 %5268, %v5719_v53  }
  0xf3   : > { %992 = vperm.xlu1 %5267, %v5734_v57   ;;  %5270 = vset.pattern.permute.xlu0 %v5514_v27 }
  0xf4   : > { %1058 = vperm.xlu0 %5270, %v5725_v55  }
  0xfa   : > { %v5857_v28 = vpop.permute.xlu1 %588  ;;  %v5859_v29 = vpop.permute.xlu0 %596  ;;  %1004 = vperm.xlu2 %5268, %v5749_v61  }
  0xfb   : > { %v5862_v30 = vpop.permute.xlu2 %668  ;;  %1000 = vperm.xlu1 %5267, %v5731_v56  }
  0xfc   : > { %1078 = vperm.xlu0 %5270, %v5731_v56  }
 0x102   : > { %v5872_v33 = vpop.permute.xlu1 %600  ;;  %v5874_v34 = vpop.permute.xlu0 %608  ;;  %1016 = vperm.xlu2 %5268, %v5761_v0  }
 0x103   : > { %v5877_v35 = vpop.permute.xlu2 %676  ;;  %1012 = vperm.xlu1 %5267, %v5743_v59  }
 0x104   : > { %1090 = vperm.xlu0 %5270, %v5743_v59  }
 0x10a   : > { %v5881_v36 = vpop.permute.xlu1 %612  ;;  %1028 = vperm.xlu2 %5268, %v5767_v1  }
 0x10b   : > { %v5885_v37 = vpop.permute.xlu2 %688  ;;  %1024 = vperm.xlu1 %5267, %v5755_v62   ;;  %v661_v38 = vpop.permute.xlu0 %660 }
 0x10c   : > { %1102 = vperm.xlu0 %5270, %v5755_v62   ;;  %v711_v48 = vmul.f32 %v5904_v45, %v661_v38  ;;  %v5937_v38 = vld [vmem:[%s5889_s11 + $0xd8] sm:$0xff] }
 0x10d   : > { %8842 = vst [vmem:[#allocation8_spill] sm:$0xff] %v5937_v38 }
 0x10e   : > { %v724_v2 = vadd.f32 %v711_v48, %v632_v50  ;;  %v5945_v50 = vld [vmem:[%s5889_s11 + $0x140] sm:$0xff] }
 0x10f   : > { %8843 = vst [vmem:[#allocation9_spill] sm:$0xff] %v5945_v50 }
 0x112   : > { %5272 = vset.pattern.permute.xlu2 %v5514_v27 }
 0x113   : > { %v5897_v41 = vpop.permute.xlu2 %700  ;;  %5271 = vset.pattern.permute.xlu1 %v5514_v27  ;;  %v665_v42 = vpop.permute.xlu1 %664  ;;  %1066 = vperm.xlu2 %5272, %v5722_v54   ;;  %v5927_v27 = vld [vmem:[%s5889_s11 + $0x70] sm:$0xff] }
 0x114   : > { %v5900_v43 = vpop.permute.xlu0 %680  ;;  %1062 = vperm.xlu1 %5271, %v5737_v58   ;;  %5274 = vset.pattern.permute.xlu0 %v5515_v44  ;;  %8840 = vst [vmem:[#allocation6_spill] sm:$0xff] %v5927_v27  ;;  %v620_v46 = vmul.f32 %v5927_v27, %v5816_v12  ;;  %v712_v48 = vmul.f32 %v5937_v38, %v665_v42  ;;  %v5961_v38 = vld [vmem:[%s5889_s11 + $0x78] sm:$0xff]  ;;  %v5987_v27 = vld [vmem:[%s5889_s11 + $0x80] sm:$0xff] }
 0x115   : > { %1153 = vperm.xlu0 %5274, %v5737_v58   ;;  %8844 = vst [vmem:[#allocation10_spill] sm:$0xff] %v5961_v38 }
 0x11b   : > { %v5914_v51 = vpop.permute.xlu1 %672  ;;  %1074 = vperm.xlu2 %5272, %v5719_v53   ;;  %v753_v52 = vpop.permute.xlu2 %752 }
 0x11c   : > { %v5917_v3 = vpop.permute.xlu0 %692  ;;  %v803_v6 = vmul.f32 %v5912_v49, %v753_v52  ;;  %1070 = vperm.xlu1 %5271, %v5734_v57   ;;  %v633_v52 = vadd.f32 %v620_v46, %v541_v47 }
 0x11d   : > { %1173 = vperm.xlu0 %5274, %v5749_v61  }
 0x11e   : > { %v816_v10 = vadd.f32 %v803_v6, %v724_v2 }
 0x120   : > { %4802 = vmatmul.msk.f32.vlgmr.msra.gmra.mxu0 %vm844_vm0, %v816_v10  ;;  %v725_v10 = vadd.f32 %v712_v48, %v633_v52  ;;  %v8691_v48 = vmov 7   ;;  %v5967_v52 = vld [vmem:[%s5889_s11 + $0x10] sm:$0xff] }
 0x121   : > { %8845 = vst [vmem:[#allocation11_spill] sm:$0xff] %v5967_v52 }
 0x123   : > { %v5923_v17 = vpop.permute.xlu1 %684  ;;  %1086 = vperm.xlu2 %5272, %v5746_v60   ;;  %v765_v23 = vpop.permute.xlu2 %764 }
 0x124   : > { %v5932_v32 = vpop.permute.xlu0 %704  ;;  %1082 = vperm.xlu1 %5271, %v5749_v61  }
 0x125   : > { %1185 = vperm.xlu0 %5274, %v5761_v0  }
 0x12b   : > { %v5947_v2 = vpop.permute.xlu1 %696  ;;  %1098 = vperm.xlu2 %5272, %v5758_v63   ;;  %v5950_v6 = vpop.permute.xlu2 %772 }
 0x12c   : > { %1094 = vperm.xlu1 %5271, %v5761_v0   ;;  %v757_v12 = vpop.permute.xlu0 %756 }
 0x12d   : > { %v804_v13 = vmul.f32 %v5945_v50, %v757_v12  ;;  %1197 = vperm.xlu0 %5274, %v5767_v1   ;;  %v5970_v12 = vld [vmem:[%s5889_s11 + $0xe0] sm:$0xff] }
 0x12e   : > { %8846 = vst [vmem:[#allocation12_spill] sm:$0xff] %v5970_v12  ;;  %v713_v50 = vmul.f32 %v5970_v12, %v5862_v30  ;;  %v5996_v30 = vld [vmem:[%s5889_s11 + $0xe8] sm:$0xff] }
 0x12f   : > { %v817_v42 = vadd.f32 %v804_v13, %v725_v10  ;;  %v621_v13 = vmul.f32 %v5961_v38, %v5852_v26  ;;  %8849 = vst [vmem:[#allocation15_spill] sm:$0xff] %v5996_v30 }
 0x131   : > { %4803 = vmatmul.msk.f32.gmra.mxu0 %vm844_vm0, %v817_v42  ;;  %v542_v42 = vmul.f32 %v5805_v8, %v5967_v52  ;;  %v5993_v8 = vld [vmem:[%s5889_s11 + $0x18] sm:$0xff]  ;;  %v6013_v52 = vld [vmem:[%s5889_s11 + $0x88] sm:$0xff] }
 0x132   : > { %8848 = vst [vmem:[#allocation14_spill] sm:$0xff] %v5993_v8 }
 0x133   : > { %v5956_v46 = vpop.permute.xlu1 %708  ;;  %5273 = vset.pattern.permute.xlu2 %v5515_v44  ;;  %v5958_v47 = vpop.permute.xlu2 %784  ;;  %v634_v31 = vadd.f32 %v621_v13, %v542_v42  ;;  %v622_v13 = vmul.f32 %v5987_v27, %v5850_v25  ;;  %v6002_v42 = vld [vmem:[%s5889_s11 + $0x150] sm:$0xff] }
 0x134   : > { %1106 = vperm.xlu1 %5271, %v5767_v1   ;;  %1149 = vperm.xlu2 %5273, %v5725_v55   ;;  %v5972_v10 = vpop.permute.xlu0 %776  ;;  %8850 = vst [vmem:[#allocation16_spill] sm:$0xff] %v6002_v42 }
 0x135   : > { %5278 = vset.pattern.permute.xlu0 %v8691_v48  ;;  %v5982_v48 = vld [vmem:[%s5889_s11 + $0x148] sm:$0xff]  ;;  %v726_v26 = vadd.f32 %v713_v50, %v634_v31  ;;  %v714_v31 = vmul.f32 %v5996_v30, %v5914_v51  ;;  %v623_v51 = vmul.f32 %v6013_v52, %v5825_v15  ;;  %v6040_v30 = vld [vmem:[%s5889_s11 + $0x90] sm:$0xff] }
 0x136   : > { %1248 = vperm.xlu0 %5278, %v5722_v54   ;;  %8847 = vst [vmem:[#allocation13_spill] sm:$0xff] %v5982_v48 }
 0x137   : > { %8852 = vst [vmem:[#allocation18_spill] sm:$0xff] %v6040_v30 }
 0x13b   : > { %v5984_v49 = vpop.permute.xlu2 %796 }
 0x13c   : > { %5275 = vset.pattern.permute.xlu1 %v5515_v44  ;;  %v761_v45 = vpop.permute.xlu1 %760  ;;  %1161 = vperm.xlu2 %5273, %v5734_v57   ;;  %v6004_v12 = vpop.permute.xlu0 %788 }
 0x13d   : > { %v805_v38 = vmul.f32 %v5982_v48, %v761_v45  ;;  %1157 = vperm.xlu1 %5275, %v5722_v54   ;;  %v543_v45 = vmul.f32 %v5814_v11, %v5993_v8  ;;  %v806_v48 = vmul.f32 %v6002_v42, %v765_v23  ;;  %v6020_v11 = vld [vmem:[%s5889_s11 + $0x20] sm:$0xff]  ;;  %v6023_v8 = vld [vmem:[%s5889_s11 + $0xf0] sm:$0xff] }
 0x13e   : > { %1268 = vperm.xlu0 %5278, %v5746_v60  }
 0x13f   : > { %v818_v44 = vadd.f32 %v805_v38, %v726_v26  ;;  %v635_v50 = vadd.f32 %v622_v13, %v543_v45  ;;  %v6029_v13 = vld [vmem:[%s5889_s11 + $0x158] sm:$0xff]  ;;  %v715_v45 = vmul.f32 %v6023_v8, %v5877_v35 }
 0x140   : > { %8851 = vst [vmem:[#allocation17_spill] sm:$0xff] %v6029_v13  ;;  %v6050_v35 = vld [vmem:[%s5889_s11 + $0xf8] sm:$0xff] }
 0x141   : > { %4804 = vmatmul.msk.f32.gmra.mxu0 %vm844_vm0, %v818_v44  ;;  %v727_v38 = vadd.f32 %v714_v31, %v635_v50  ;;  %v544_v44 = vmul.f32 %v5791_v4, %v6020_v11  ;;  %v6047_v4 = vld [vmem:[%s5889_s11 + $0x28] sm:$0xff] }
 0x143   : > { %v819_v23 = vadd.f32 %v806_v48, %v727_v38  ;;  %v636_v50 = vadd.f32 %v623_v51, %v544_v44  ;;  %v6057_v44 = vld [vmem:[%s5889_s11 + $0x160] sm:$0xff] }
 0x144   : > { %v769_v25 = vpop.permute.xlu1 %768  ;;  %1169 = vperm.xlu2 %5273, %v5731_v56   ;;  %v6016_v26 = vpop.permute.xlu2 %984  ;;  %8853 = vst [vmem:[#allocation19_spill] sm:$0xff] %v6057_v44 }
 0x145   : > { %1165 = vperm.xlu1 %5275, %v5719_v53   ;;  %v6036_v31 = vpop.permute.xlu0 %800  ;;  %v807_v42 = vmul.f32 %v6029_v13, %v769_v25  ;;  %v728_v48 = vadd.f32 %v715_v45, %v636_v50  ;;  %v624_v25 = vmul.f32 %v6040_v30, %v5857_v28  ;;  %v545_v45 = vmul.f32 %v5796_v5, %v6047_v4 }
 0x146   : > { %1280 = vperm.xlu0 %5278, %v5758_v63   ;;  %v716_v50 = vmul.f32 %v6050_v35, %v5900_v43  ;;  %v808_v28 = vmul.f32 %v6057_v44, %v5950_v6  ;;  %v6089_v44 = vld [vmem:[%s5889_s11 + $0x168] sm:$0xff] }
 0x147   : > { %v820_v51 = vadd.f32 %v807_v42, %v728_v48  ;;  %v6069_v42 = vld [vmem:[%s5889_s11 + $0x30] sm:$0xff]  ;;  %v6072_v48 = vld [vmem:[%s5889_s11 + $0x98] sm:$0xff]  ;;  %8856 = vst [vmem:[#allocation22_spill] sm:$0xff] %v6089_v44 }
 0x148   : > { %8854 = vst [vmem:[#allocation20_spill] sm:$0xff] %v6069_v42  ;;  %v625_v6 = vmul.f32 %v6072_v48, %v5834_v19 }
 0x149   : > { %4805 = vmatmul.msk.f32.gmra.mxu0 %vm844_vm0, %v819_v23  ;;  %v8705_v23 = vmov 8  }
 0x14c   : > { %v781_v15 = vpop.permute.xlu1 %780  ;;  %1181 = vperm.xlu2 %5273, %v5743_v59   ;;  %v6043_v38 = vpop.permute.xlu2 %996 }
 0x14d   : > { %1177 = vperm.xlu1 %5275, %v5746_v60   ;;  %v6064_v13 = vpop.permute.xlu0 %988 }
 0x14e   : > { %5279 = vset.pattern.permute.xlu0 %v8705_v23  ;;  %v637_v23 = vadd.f32 %v624_v25, %v545_v45  ;;  %v546_v25 = vmul.f32 %v5828_v16, %v6069_v42  ;;  %v809_v16 = vmul.f32 %v6089_v44, %v5972_v10  ;;  %v6128_v44 = vld [vmem:[%s5889_s11 + $0xa8] sm:$0xff] }
 0x14f   : > { %1468 = vperm.xlu0 %5279, %v5725_v55   ;;  %8860 = vst [vmem:[#allocation25_spill] sm:$0xff] %v6128_v44 }
 0x150   : > { %v729_v5 = vadd.f32 %v716_v50, %v637_v23  ;;  %v638_v50 = vadd.f32 %v625_v6, %v546_v25  ;;  %v6109_v25 = vld [vmem:[%s5889_s11 + $0x38] sm:$0xff]  ;;  %v6112_v6 = vld [vmem:[%s5889_s11 + $0x108] sm:$0xff] }
 0x151   : > { %4806 = vmatmul.msk.f32.gmra.mxu0 %vm844_vm0, %v820_v51  ;;  %v6081_v51 = vld [vmem:[%s5889_s11 + $0x100] sm:$0xff] }
 0x152   : > { %v821_v45 = vadd.f32 %v808_v28, %v729_v5  ;;  %v717_v23 = vmul.f32 %v6081_v51, %v5923_v17  ;;  %v8858_v28 = vmov 7  }
 0x154   : > { %v6074_v30 = vpop.permute.xlu1 %792  ;;  %1193 = vperm.xlu2 %5273, %v5755_v62   ;;  %v6077_v43 = vpop.permute.xlu2 %1004  ;;  %v730_v5 = vadd.f32 %v717_v23, %v638_v50  ;;  %v6119_v23 = vld [vmem:[%s5889_s11 + $0x170] sm:$0xff]  ;;  %v547_v50 = vmul.f32 %v5823_v14, %v6109_v25  ;;  %v6136_v14 = vld [vmem:[%s5889_s11 + $0x40] sm:$0xff] }
 0x155   : > { %8855 = vst [vmem:[#allocation21_spill] sm:$0xff] %v6077_v43  ;;  %1189 = vperm.xlu1 %5275, %v5758_v63   ;;  %v6097_v43 = vld [vmem:[%s5889_s11 + $0xa0] sm:$0xff]  ;;  %v6099_v19 = vpop.permute.xlu0 %1008 }
 0x156   : > { %8857 = vst [vmem:[#allocation23_spill] sm:$0xff] %v6099_v19  ;;  %v626_v10 = vmul.f32 %v6097_v43, %v5859_v29  ;;  %v810_v19 = vmul.f32 %v6119_v23, %v781_v15  ;;  %v627_v15 = vmul.f32 %v6128_v44, %v5872_v33 }
 0x157   : > { %1488 = vperm.xlu0 %5279, %v5731_v56  }
 0x159   : > { %4807 = vmatmul.msk.f32.gmra.mxu0 %vm844_vm0, %v821_v45  ;;  %v822_v45 = vadd.f32 %v809_v16, %v730_v5 }
 0x15c   : > { %5277 = vset.pattern.permute.xlu2 %v8858_v28  ;;  %v6102_v42 = vpop.permute.xlu2 %1016 }
 0x15d   : > { %8859 = vst [vmem:[#allocation24_spill] sm:$0xff] %v6102_v42  ;;  %5276 = vset.pattern.permute.xlu1 %v8858_v28  ;;  %v6105_v17 = vpop.permute.xlu1 %980  ;;  %1244 = vperm.xlu2 %5277, %v5737_v58   ;;  %v718_v28 = vmul.f32 %v6112_v6, %v5885_v37  ;;  %v639_v42 = vadd.f32 %v626_v10, %v547_v50  ;;  %v6139_v37 = vld [vmem:[%s5889_s11 + $0x110] sm:$0xff] }
 0x15e   : > { %1240 = vperm.xlu1 %5276, %v5725_v55   ;;  %v548_v50 = vmul.f32 %v5800_v7, %v6136_v14 }
 0x15f   : > { %1500 = vperm.xlu0 %5279, %v5743_v59   ;;  %v731_v29 = vadd.f32 %v718_v28, %v639_v42  ;;  %v6144_v42 = vpop.permute.xlu0 %1020  ;;  %v719_v28 = vmul.f32 %v6139_v37, %v5917_v3  ;;  %v6169_v3 = vld [vmem:[%s5889_s11 + $0x118] sm:$0xff] }
 0x160   : > { %8862 = vst [vmem:[#allocation27_spill] sm:$0xff] %v6144_v42 }
 0x161   : > { %4808 = vmatmul.msk.f32.gmra.mxu0 %vm844_vm0, %v822_v45  ;;  %v823_v10 = vadd.f32 %v810_v19, %v731_v29  ;;  %v6148_v45 = vld [vmem:[%s5889_s11 + $0x178] sm:$0xff]  ;;  %v6158_v19 = vld [vmem:[%s5889_s11 + $0x48] sm:$0xff]  ;;  %v6161_v29 = vld [vmem:[%s5889_s11 + $0xb0] sm:$0xff] }
 0x162   : > { %8863 = vst [vmem:[#allocation28_spill] sm:$0xff] %v6148_v45  ;;  %v811_v33 = vmul.f32 %v6148_v45, %v5958_v47  ;;  %v628_v47 = vmul.f32 %v6161_v29, %v5841_v21 }
 0x163   : > { %8864 = vst [vmem:[#allocation29_spill] sm:$0xff] %v6158_v19 }
 0x164   : > { %v6130_v16 = vpop.permute.xlu2 %1028  ;;  %8865 = vst [vmem:[#allocation30_spill] sm:$0xff] %v6161_v29  ;;  %v6197_v29 = vld [vmem:[%s5889_s11 + $0x50] sm:$0xff] }
 0x165   : > { %8861 = vst [vmem:[#allocation26_spill] sm:$0xff] %v6130_v16  ;;  %v6132_v5 = vpop.permute.xlu1 %992  ;;  %1256 = vperm.xlu2 %5277, %v5719_v53   ;;  %v640_v16 = vadd.f32 %v627_v15, %v548_v50  ;;  %v549_v15 = vmul.f32 %v5837_v20, %v6158_v19  ;;  %v6178_v50 = vld [vmem:[%s5889_s11 + $0x180] sm:$0xff] }
 0x166   : > { %1252 = vperm.xlu1 %5276, %v5734_v57   ;;  %v812_v21 = vmul.f32 %v6178_v50, %v6004_v12  ;;  %8867 = vst [vmem:[#allocation32_spill] sm:$0xff] %v6197_v29 }
 0x167   : > { %1512 = vperm.xlu0 %5279, %v5755_v62   ;;  %v732_v42 = vadd.f32 %v719_v28, %v640_v16  ;;  %v8713_v16 = vmov 9   ;;  %v720_v28 = vmul.f32 %v6169_v3, %v5947_v2  ;;  %v6183_v45 = vpop.permute.xlu0 %1058  ;;  %v641_v20 = vadd.f32 %v628_v47, %v549_v15  ;;  %v6200_v2 = vld [vmem:[%s5889_s11 + $0x120] sm:$0xff]  ;;  %v6206_v47 = vld [vmem:[%s5889_s11 + $0x188] sm:$0xff] }
 0x168   : > { %8868 = vst [vmem:[#allocation33_spill] sm:$0xff] %v6200_v2 }
 0x169   : > { %4809 = vmatmul.msk.f32.gmra.mxu0 %vm844_vm0, %v823_v10  ;;  %v824_v10 = vadd.f32 %v811_v33, %v732_v42  ;;  %v6189_v42 = vld [vmem:[%s5889_s11 + $0xb8] sm:$0xff]  ;;  %v733_v33 = vadd.f32 %v720_v28, %v641_v20  ;;  %8869 = vst [vmem:[#allocation34_spill] sm:$0xff] %v6206_v47  ;;  %v550_v28 = vmul.f32 %v5832_v18, %v6197_v29  ;;  %v6223_v18 = vld [vmem:[%s5889_s11 + $0xc0] sm:$0xff] }
 0x16a   : > { %8866 = vst [vmem:[#allocation31_spill] sm:$0xff] %v6189_v42  ;;  %v629_v15 = vmul.f32 %v6189_v42, %v5874_v34  ;;  %v721_v20 = vmul.f32 %v6200_v2, %v5897_v41 }
 0x16b   : > { %v825_v12 = vadd.f32 %v812_v21, %v733_v33  ;;  %v813_v21 = vmul.f32 %v6206_v47, %v6074_v30  ;;  %8870 = vst [vmem:[#allocation35_spill] sm:$0xff] %v6223_v18  ;;  %v6236_v30 = vld [vmem:[%s5889_s11 + $0x128] sm:$0xff] }
 0x16c   : > { %v642_v34 = vadd.f32 %v629_v15, %v550_v28  ;;  %v6233_v15 = vld [vmem:[%s5889_s11 + $0x58] sm:$0xff]  ;;  %8873 = vst [vmem:[#allocation38_spill] sm:$0xff] %v6236_v30  ;;  %v630_v28 = vmul.f32 %v6223_v18, %v5881_v36  ;;  %v722_v47 = vmul.f32 %v6236_v30, %v5932_v32  ;;  %v6262_v18 = vld [vmem:[%s5889_s11 + $0xc8] sm:$0xff] }
 0x16d   : > { %v6163_v44 = vpop.permute.xlu1 %1000  ;;  %1264 = vperm.xlu2 %5277, %v5749_v61   ;;  %v6166_v7 = vpop.permute.xlu2 %1066  ;;  %8872 = vst [vmem:[#allocation37_spill] sm:$0xff] %v6233_v15 }
 0x16e   : > { %1260 = vperm.xlu1 %5276, %v5731_v56   ;;  %v734_v41 = vadd.f32 %v721_v20, %v642_v34  ;;  %v6244_v34 = vld [vmem:[%s5889_s11 + $0x190] sm:$0xff]  ;;  %8876 = vst [vmem:[#allocation41_spill] sm:$0xff] %v6262_v18 }
 0x16f   : > { %5283 = vset.pattern.permute.xlu0 %v8713_v16  ;;  %v6219_v33 = vpop.permute.xlu0 %1078  ;;  %8874 = vst [vmem:[#allocation39_spill] sm:$0xff] %v6244_v34 }
 0x170   : > { %1550 = vperm.xlu0 %5283, %v5737_v58   ;;  %v826_v20 = vadd.f32 %v813_v21, %v734_v41  ;;  %v814_v21 = vmul.f32 %v6244_v34, %v5984_v49  ;;  %v6259_v41 = vld [vmem:[%s5889_s11 + $0x60] sm:$0xff] }
 0x171   : > { %4810 = vmatmul.msk.f32.gmra.mxu0 %vm844_vm0, %v824_v10  ;;  %v5519_v10 = vmov 0.0   ;;  %8875 = vst [vmem:[#allocation40_spill] sm:$0xff] %v6259_v41 }
 0x172   : > { %449 = vst.msk [vmem:[#allocation2] sm:$0xff] %vm448_vm1, %v5519_v10 }
 0x173   : > { %450 = vst.msk [vmem:[#allocation2 + $0x8] sm:$0xff] %vm448_vm1, %v5519_v10 }
 0x174   : > { %451 = vst.msk [vmem:[#allocation2 + $0x10] sm:$0xff] %vm448_vm1, %v5519_v10 }
 0x175   : > { %v6191_v16 = vpop.permute.xlu1 %1012  ;;  %1276 = vperm.xlu2 %5277, %v5761_v0   ;;  %v6194_v19 = vpop.permute.xlu2 %1074  ;;  %452 = vst.msk [vmem:[#allocation2 + $0x18] sm:$0xff] %vm448_vm1, %v5519_v10 }
 0x176   : > { %1272 = vperm.xlu1 %5276, %v5743_v59   ;;  %453 = vst.msk [vmem:[#allocation2 + $0x20] sm:$0xff] %vm448_vm1, %v5519_v10 }
 0x177   : > { %454 = vst.msk [vmem:[#allocation2 + $0x28] sm:$0xff] %vm448_vm1, %v5519_v10  ;;  %v6265_v32 = vpop.permute.xlu0 %1090 }
 0x178   : > { %1570 = vperm.xlu0 %5283, %v5749_v61   ;;  %455 = vst.msk [vmem:[#allocation2 + $0x30] sm:$0xff] %vm448_vm1, %v5519_v10 }
 0x179   : > { %4811 = vmatmul.msk.f32.gmra.mxu0 %vm844_vm0, %v825_v12  ;;  %456 = vst.msk [vmem:[#allocation2 + $0x38] sm:$0xff] %vm448_vm1, %v5519_v10 }
 0x17a   : > { %457 = vst.msk [vmem:[#allocation2 + $0x40] sm:$0xff] %vm448_vm1, %v5519_v10 }
 0x17b   : > { %458 = vst.msk [vmem:[#allocation2 + $0x48] sm:$0xff] %vm448_vm1, %v5519_v10 }
 0x17c   : > { %459 = vst.msk [vmem:[#allocation2 + $0x50] sm:$0xff] %vm448_vm1, %v5519_v10 }
 0x17d   : > { %v6226_v2 = vpop.permute.xlu1 %1024  ;;  %1288 = vperm.xlu2 %5277, %v5767_v1   ;;  %v6229_v12 = vpop.permute.xlu2 %1086  ;;  %460 = vst.msk [vmem:[#allocation2 + $0x58] sm:$0xff] %vm448_vm1, %v5519_v10 }
 0x17e   : > { %8871 = vst [vmem:[#allocation36_spill] sm:$0xff] %v6226_v2  ;;  %1284 = vperm.xlu1 %5276, %v5755_v62   ;;  %v551_v2 = vmul.f32 %v5807_v9, %v6233_v15 }
 0x17f   : > { %461 = vst.msk [vmem:[#allocation2 + $0x60] sm:$0xff] %vm448_vm1, %v5519_v10 }
 0x180   : > { %1582 = vperm.xlu0 %5283, %v5761_v0   ;;  %v643_v36 = vadd.f32 %v630_v28, %v551_v2  ;;  %v6271_v2 = vld [vmem:[%s5889_s11 + $0x130] sm:$0xff]  ;;  %v552_v28 = vmul.f32 %v5843_v22, %v6259_v41 }
 0x181   : > { %4812 = vmatmul.msk.f32.gmra.mxu0 %vm844_vm0, %v826_v20  ;;  %v8877_v20 = vmov 8   ;;  %8879 = vst [vmem:[#allocation43_spill] sm:$0xff] %v6271_v2 }
 0x182   : > { %v735_v9 = vadd.f32 %v722_v47, %v643_v36  ;;  %v631_v47 = vmul.f32 %v6262_v18, %v5848_v24  ;;  %v6283_v36 = vld [vmem:[%s5889_s11 + $0x198] sm:$0xff] }
 0x183   : > { %8880 = vst [vmem:[#allocation44_spill] sm:$0xff] %v6283_v36  ;;  %v815_v15 = vmul.f32 %v6283_v36, %v6036_v31 }
 0x184   : > { %v827_v10 = vadd.f32 %v814_v21, %v735_v9  ;;  %v644_v34 = vadd.f32 %v631_v47, %v552_v28  ;;  %v6296_v9 = vpop.permute.xlu0 %1102 }
 0x185   : > { %5281 = vset.pattern.permute.xlu2 %v8877_v20  ;;  %v6268_v30 = vpop.permute.xlu2 %1098  ;;  %8881 = vst [vmem:[#allocation45_spill] sm:$0xff] %v6296_v9  ;;  %v8729_v9 = vmov 11  }
 0x186   : > { %8878 = vst [vmem:[#allocation42_spill] sm:$0xff] %v6268_v30  ;;  %5280 = vset.pattern.permute.xlu1 %v8877_v20  ;;  %v6274_v49 = vpop.permute.xlu1 %1062  ;;  %1476 = vperm.xlu2 %5281, %v5722_v54   ;;  %v723_v20 = vmul.f32 %v6271_v2, %v5956_v46  ;;  %v8724_v46 = vmov 10  }
 0x187   : > { %1472 = vperm.xlu1 %5280, %v5737_v58  }
 0x188   : > { %1594 = vperm.xlu0 %5283, %v5767_v1   ;;  %v736_v22 = vadd.f32 %v723_v20, %v644_v34 }
 0x189   : > { %4813 = vmatmul.msk.f32.gmra.mxu0 %vm844_vm0, %v827_v10 }
 0x18a   : > { %v828_v21 = vadd.f32 %v815_v15, %v736_v22  ;;  %v829_v15 = vld [vmem:[#allocation2] sm:$0xff] }
 0x18c   : > { %v6307_v28 = vpop.permute.xlu0 %1153 }
 0x18e   : > { %v6291_v41 = vpop.permute.xlu1 %1070  ;;  %1484 = vperm.xlu2 %5281, %v5719_v53   ;;  %v6294_v24 = vpop.permute.xlu2 %1149 }
 0x18f   : > { %1480 = vperm.xlu1 %5280, %v5734_v57  }
 0x190   : > { %5287 = vset.pattern.permute.xlu0 %v8724_v46  ;;  %v8883_v46 = vmov 9  }
 0x191   : > { %4814 = vmatmul.msk.f32.gmra.mxu0 %vm844_vm0, %v828_v21  ;;  %1645 = vperm.xlu0 %5287, %v5722_v54  }
 0x194   : > { %v6316_v21 = vpop.permute.xlu0 %1173 }
 0x196   : > { %v6302_v31 = vpop.permute.xlu1 %1082  ;;  %1496 = vperm.xlu2 %5281, %v5746_v60   ;;  %v6305_v34 = vpop.permute.xlu2 %1161 }
 0x197   : > { %1492 = vperm.xlu1 %5280, %v5749_v61  }
 0x199   : > { %1665 = vperm.xlu0 %5287, %v5746_v60  }
 0x19d   : > { %v901_v47 = vpop.f32.mrf.mxu0 }
 0x19e   : > { %v6311_v10 = vpop.permute.xlu1 %1094  ;;  %v940_v20 = vadd.f32 %v901_v47, %v829_v15  ;;  %1508 = vperm.xlu2 %5281, %v5758_v63   ;;  %v6314_v22 = vpop.permute.xlu2 %1169  ;;  %v830_v47 = vld [vmem:[#allocation2 + $0x8] sm:$0xff] }
 0x19f   : > { %1504 = vperm.xlu1 %5280, %v5761_v0   ;;  %v6328_v15 = vpop.permute.xlu0 %1185 }
 0x1a0   : > { %953 = vst.msk [vmem:[#allocation2] sm:$0xff] %vm448_vm1, %v940_v20 }
 0x1a1   : > { %1677 = vperm.xlu0 %5287, %v5758_v63  }
 0x1a6   : > { %v6321_v61 = vpop.permute.xlu1 %1106  ;;  %5282 = vset.pattern.permute.xlu2 %v8883_v46  ;;  %v6324_v36 = vpop.permute.xlu2 %1181 }
 0x1a7   : > { %8882 = vst [vmem:[#allocation46_spill] sm:$0xff] %v6321_v61  ;;  %1516 = vperm.xlu1 %5280, %v5767_v1   ;;  %1546 = vperm.xlu2 %5282, %v5725_v55   ;;  %v4855_v1 = vld [vmem:[%s8687_s2 + $0x18] sm:$0xff]  ;;  %v6341_v61 = vpop.permute.xlu0 %1197 }
 0x1a8   : > { %8885 = vst [vmem:[#allocation48_spill] sm:$0xff] %v6341_v61  ;;  %1386 = vmatpush.msra.mxu1 %v4855_v1 }
 0x1a9   : > { %5288 = vset.pattern.permute.xlu0 %v8729_v9 }
 0x1aa   : > { %1728 = vperm.xlu0 %5288, %v5725_v55  }
 0x1ae   : > { %v904_v2 = vpop.f32.mrf.mxu0  ;;  %v6330_v18 = vpop.permute.xlu2 %1193 }
 0x1af   : > { %8884 = vst [vmem:[#allocation47_spill] sm:$0xff] %v6330_v18  ;;  %v941_v0 = vadd.f32 %v904_v2, %v830_v47  ;;  %5284 = vset.pattern.permute.xlu1 %v8883_v46  ;;  %v6333_v20 = vpop.permute.xlu1 %1157  ;;  %1558 = vperm.xlu2 %5282, %v5734_v57   ;;  %v4854_v2 = vld [vmem:[%s8687_s2 + $0x10] sm:$0xff]  ;;  %v6353_v47 = vpop.permute.xlu0 %1248 }
 0x1b0   : > { %1554 = vperm.xlu1 %5284, %v5722_v54   ;;  %1387 = vmatpush.msra.mxu1 %v4854_v2  ;;  %v831_v46 = vld [vmem:[#allocation2 + $0x10] sm:$0xff]  ;;  %v832_v2 = vld [vmem:[#allocation2 + $0x18] sm:$0xff] }
 0x1b1   : > { %954 = vst.msk [vmem:[#allocation2 + $0x8] sm:$0xff] %vm448_vm1, %v941_v0 }
 0x1b2   : > { %1748 = vperm.xlu0 %5288, %v5731_v56  }
 0x1b7   : > { %v6348_v54 = vpop.permute.xlu1 %1165  ;;  %1566 = vperm.xlu2 %5282, %v5731_v56   ;;  %v1245_v57 = vpop.permute.xlu2 %1244 }
 0x1b8   : > { %1562 = vperm.xlu1 %5284, %v5719_v53   ;;  %v6363_v53 = vpop.permute.xlu0 %1268 }
 0x1ba   : > { %1760 = vperm.xlu0 %5288, %v5743_v59  }
 0x1be   : > { %v907_v0 = vpop.f32.mrf.mxu0 }
 0x1bf   : > { %v942_v1 = vadd.f32 %v907_v0, %v831_v46  ;;  %v6355_v9 = vpop.permute.xlu1 %1177  ;;  %1578 = vperm.xlu2 %5282, %v5743_v59   ;;  %v6358_v61 = vpop.permute.xlu2 %1256  ;;  %v833_v0 = vld [vmem:[#allocation2 + $0x20] sm:$0xff]  ;;  %v1031_v59 = vmul.f32 %v6105_v17, %v5892_v39 }
 0x1c0   : > { %1574 = vperm.xlu1 %5284, %v5746_v60   ;;  %v1109_v60 = vmul.f32 %v5895_v40, %v6183_v45  ;;  %v6379_v30 = vpop.permute.xlu0 %1280  ;;  %v8890_v45 = vld [vmem:[#allocation5_spill] sm:$0xff] }
 0x1c1   : > { %955 = vst.msk [vmem:[#allocation2 + $0x10] sm:$0xff] %vm448_vm1, %v942_v1  ;;  %v8887_v1 = vld [vmem:[#allocation4_spill] sm:$0xff] }
 0x1c2   : > { %1772 = vperm.xlu0 %5288, %v5755_v62  }
 0x1c6   : > { %v910_v56 = vpop.f32.mrf.mxu0 }
 0x1c7   : > { %v943_v18 = vadd.f32 %v910_v56, %v832_v2  ;;  %v6365_v42 = vpop.permute.xlu1 %1189  ;;  %1590 = vperm.xlu2 %5282, %v5755_v62   ;;  %v6368_v46 = vpop.permute.xlu2 %1264  ;;  %v1200_v2 = vmul.f32 %v8887_v1, %v6294_v24  ;;  %v8889_v62 = vld [vmem:[#allocation6_spill] sm:$0xff]  ;;  %v834_v1 = vld [vmem:[#allocation2 + $0x28] sm:$0xff] }
 0x1c8   : > { %8886 = vst [vmem:[#allocation49_spill] sm:$0xff] %v6365_v42  ;;  %1586 = vperm.xlu1 %5284, %v5758_v63   ;;  %v1122_v42 = vadd.f32 %v1109_v60, %v1031_v59  ;;  %v8888_v63 = vmov 10   ;;  %v1110_v39 = vmul.f32 %v8889_v62, %v6274_v49  ;;  %v8891_v60 = vld [vmem:[#allocation7_spill] sm:$0xff]  ;;  %v8893_v49 = vld [vmem:[#allocation9_spill] sm:$0xff]  ;;  %v6397_v62 = vpop.permute.xlu0 %1468 }
 0x1c9   : > { %956 = vst.msk [vmem:[#allocation2 + $0x18] sm:$0xff] %vm448_vm1, %v943_v18 }
 0x1ca   : > { %v1213_v17 = vadd.f32 %v1200_v2, %v1122_v42  ;;  %v1292_v2 = vmul.f32 %v8893_v49, %v1245_v57  ;;  %v6411_v57 = vld [vmem:[%s5716_s4 + $0x18] sm:$0xff] }
 0x1ce   : > { %v913_v56 = vpop.f32.mrf.mxu0 }
 0x1cf   : > { %v944_v29 = vadd.f32 %v913_v56, %v833_v0  ;;  %5286 = vset.pattern.permute.xlu2 %v8888_v63  ;;  %v6382_v18 = vpop.permute.xlu2 %1276  ;;  %v1032_v0 = vmul.f32 %v6016_v26, %v8891_v60  ;;  %v8894_v26 = vld [vmem:[#allocation11_spill] sm:$0xff]  ;;  %v8896_v60 = vld [vmem:[#allocation12_spill] sm:$0xff] }
 0x1d0   : > { %5285 = vset.pattern.permute.xlu1 %v8888_v63  ;;  %v1241_v40 = vpop.permute.xlu1 %1240  ;;  %1641 = vperm.xlu2 %5286, %v5737_v58   ;;  %v8892_v58 = vld [vmem:[#allocation8_spill] sm:$0xff] }
 0x1d1   : > { %957 = vst.msk [vmem:[#allocation2 + $0x20] sm:$0xff] %vm448_vm1, %v944_v29  ;;  %v1291_v24 = vmul.f32 %v8890_v45, %v1241_v40  ;;  %1637 = vperm.xlu1 %5285, %v5725_v55   ;;  %v1123_v56 = vadd.f32 %v1110_v39, %v1032_v0  ;;  %v1201_v63 = vmul.f32 %v8892_v58, %v6307_v28  ;;  %v6402_v45 = vld [vmem:[%s5716_s4 + $0x20] sm:$0xff]  ;;  %v8895_v28 = vld [vmem:[#allocation10_spill] sm:$0xff] }
 0x1d2   : > { %v1033_v39 = vmul.f32 %v6064_v13, %v8894_v26  ;;  %v1202_v0 = vmul.f32 %v8896_v60, %v6333_v20  ;;  %v6427_v20 = vld [vmem:[%s5716_s4 + $0x28] sm:$0xff]  ;;  %v8898_v60 = vld [vmem:[#allocation14_spill] sm:$0xff] }
 0x1d3   : > { %v1304_v59 = vadd.f32 %v1291_v24, %v1213_v17  ;;  %v1111_v17 = vmul.f32 %v8895_v28, %v6166_v7  ;;  %v1214_v24 = vadd.f32 %v1201_v63, %v1123_v56  ;;  %v8897_v7 = vld [vmem:[#allocation13_spill] sm:$0xff] }
 0x1d4   : > { %v1293_v56 = vmul.f32 %v8897_v7, %v6353_v47  ;;  %v1112_v47 = vmul.f32 %v5987_v27, %v6291_v41  ;;  %v8900_v7 = vld [vmem:[#allocation16_spill] sm:$0xff] }
 0x1d5   : > { %4856 = vmatmul.msk.f32.vlgmr.msra.gmra.mxu1 %vm844_vm0, %v1304_v59  ;;  %v1305_v59 = vadd.f32 %v1292_v2, %v1214_v24  ;;  %v1124_v58 = vadd.f32 %v1111_v17, %v1033_v39  ;;  %v6430_v2 = vpop.permute.xlu0 %1488  ;;  %v8733_v39 = vmov 12   ;;  %v6436_v17 = vld [vmem:[%s5716_s4 + $0x8] sm:$0xff]  ;;  %v836_v24 = vld [vmem:[#allocation2 + $0x38] sm:$0xff] }
 0x1d6   : > { %v916_v42 = vpop.f32.mrf.mxu0  ;;  %5292 = vset.pattern.permute.xlu0 %v8733_v39 }
 0x1d7   : > { %v945_v29 = vadd.f32 %v916_v42, %v834_v1  ;;  %v6399_v40 = vpop.permute.xlu2 %1288  ;;  %v835_v1 = vld [vmem:[#allocation2 + $0x30] sm:$0xff]  ;;  %v1215_v42 = vadd.f32 %v1202_v0, %v1124_v58  ;;  %1960 = vperm.xlu0 %5292, %v6436_v17   ;;  %v1034_v0 = vmul.f32 %v6132_v5, %v8898_v60  ;;  %v6455_v5 = vld [vmem:[%s5716_s4 + $0x40] sm:$0xff]  ;;  %v1204_v60 = vmul.f32 %v6023_v8, %v6348_v54  ;;  %v6480_v8 = vld [vmem:[%s5716_s4 + $0x58] sm:$0xff] }
 0x1d8   : > { %v1253_v55 = vpop.permute.xlu1 %1252  ;;  %1653 = vperm.xlu2 %5286, %v6402_v45  }
 0x1d9   : > { %958 = vst.msk [vmem:[#allocation2 + $0x28] sm:$0xff] %vm448_vm1, %v945_v29  ;;  %1649 = vperm.xlu1 %5285, %v6411_v57   ;;  %v6420_v29 = vld [vmem:[%s5716_s4 + $0x30] sm:$0xff]  ;;  %v1306_v28 = vadd.f32 %v1293_v56, %v1215_v42  ;;  %v6448_v42 = vld [vmem:[%s5716_s4 + $0x48] sm:$0xff] }
 0x1dd   : > { %4857 = vmatmul.msk.f32.gmra.mxu1 %vm844_vm0, %v1305_v59  ;;  %v8899_v59 = vld [vmem:[#allocation15_spill] sm:$0xff] }
 0x1de   : > { %v919_v13 = vpop.f32.mrf.mxu0 }
 0x1df   : > { %v946_v63 = vadd.f32 %v919_v13, %v835_v1  ;;  %v1203_v1 = vmul.f32 %v8899_v59, %v6305_v34  ;;  %v1125_v13 = vadd.f32 %v1112_v47, %v1034_v0  ;;  %v1113_v34 = vmul.f32 %v6013_v52, %v6194_v19  ;;  %1980 = vperm.xlu0 %5292, %v6420_v29   ;;  %v6461_v47 = vpop.permute.xlu0 %1500 }
 0x1e0   : > { %v1261_v49 = vpop.permute.xlu1 %1260  ;;  %1661 = vperm.xlu2 %5286, %v6420_v29   ;;  %v6423_v26 = vpop.permute.xlu2 %1476 }
 0x1e1   : > { %959 = vst.msk [vmem:[#allocation2 + $0x30] sm:$0xff] %vm448_vm1, %v946_v63  ;;  %1657 = vperm.xlu1 %5285, %v6427_v20   ;;  %v1294_v63 = vmul.f32 %v8900_v7, %v1253_v55  ;;  %v1216_v39 = vadd.f32 %v1203_v1, %v1125_v13  ;;  %v8901_v1 = vld [vmem:[#allocation17_spill] sm:$0xff] }
 0x1e2   : > { %v1295_v52 = vmul.f32 %v8901_v1, %v6358_v61  ;;  %v8902_v61 = vld [vmem:[#allocation18_spill] sm:$0xff]  ;;  %v8906_v1 = vld [vmem:[#allocation21_spill] sm:$0xff] }
 0x1e3   : > { %v1307_v55 = vadd.f32 %v1294_v63, %v1216_v39  ;;  %v1114_v54 = vmul.f32 %v8902_v61, %v6219_v33  ;;  %v838_v63 = vld [vmem:[#allocation2 + $0x48] sm:$0xff]  ;;  %v8907_v61 = vld [vmem:[#allocation22_spill] sm:$0xff] }
 0x1e5   : > { %4858 = vmatmul.msk.f32.gmra.mxu1 %vm844_vm0, %v1306_v28  ;;  %v837_v28 = vld [vmem:[#allocation2 + $0x40] sm:$0xff] }
 0x1e6   : > { %v922_v58 = vpop.f32.mrf.mxu0 }
 0x1e7   : > { %v947_v27 = vadd.f32 %v922_v58, %v836_v24  ;;  %v1035_v24 = vmul.f32 %v6043_v38, %v6020_v11  ;;  %v6473_v58 = vld [vmem:[%s5716_s4 + $0x60] sm:$0xff]  ;;  %v1036_v38 = vmul.f32 %v6163_v44, %v6047_v4  ;;  %1992 = vperm.xlu0 %5292, %v6448_v42   ;;  %v8904_v44 = vmov 11  }
 0x1e8   : > { %v6445_v41 = vpop.permute.xlu1 %1272  ;;  %1673 = vperm.xlu2 %5286, %v6448_v42   ;;  %v6451_v56 = vpop.permute.xlu2 %1484 }
 0x1e9   : > { %960 = vst.msk [vmem:[#allocation2 + $0x38] sm:$0xff] %vm448_vm1, %v947_v27  ;;  %1669 = vperm.xlu1 %5285, %v6455_v5   ;;  %v1126_v59 = vadd.f32 %v1113_v34, %v1035_v24  ;;  %v1205_v27 = vmul.f32 %v6050_v35, %v6314_v22  ;;  %v6491_v34 = vpop.permute.xlu0 %1512  ;;  %v8903_v24 = vld [vmem:[#allocation19_spill] sm:$0xff]  ;;  %v6504_v22 = vld [vmem:[%s5716_s4 + $0x10] sm:$0xff] }
 0x1eb   : > { %v1217_v11 = vadd.f32 %v1204_v60, %v1126_v59  ;;  %v1296_v60 = vmul.f32 %v8903_v24, %v1261_v49  ;;  %v8905_v49 = vld [vmem:[#allocation20_spill] sm:$0xff] }
 0x1ed   : > { %4859 = vmatmul.msk.f32.gmra.mxu1 %vm844_vm0, %v1307_v55  ;;  %v1308_v7 = vadd.f32 %v1295_v52, %v1217_v11  ;;  %v1037_v52 = vmul.f32 %v8906_v1, %v8905_v49  ;;  %v1206_v11 = vmul.f32 %v6081_v51, %v6316_v21  ;;  %v1207_v21 = vmul.f32 %v6112_v6, %v6355_v9  ;;  %v6542_v9 = vld [vmem:[%s5716_s4 + $0x38] sm:$0xff] }
 0x1ee   : > { %v925_v0 = vpop.f32.mrf.mxu0 }
 0x1ef   : > { %v948_v19 = vadd.f32 %v925_v0, %v837_v28  ;;  %v1127_v28 = vadd.f32 %v1114_v54, %v1036_v38  ;;  %v1115_v0 = vmul.f32 %v6072_v48, %v6302_v31  ;;  %2004 = vperm.xlu0 %5292, %v6473_v58   ;;  %v839_v48 = vld [vmem:[#allocation2 + $0x50] sm:$0xff]  ;;  %v1297_v54 = vmul.f32 %v8907_v61, %v6368_v46  ;;  %v8910_v61 = vld [vmem:[#allocation28_spill] sm:$0xff] }
 0x1f0   : > { %v6470_v39 = vpop.permute.xlu1 %1284  ;;  %1685 = vperm.xlu2 %5286, %v6473_v58   ;;  %v6476_v13 = vpop.permute.xlu2 %1496 }
 0x1f1   : > { %961 = vst.msk [vmem:[#allocation2 + $0x40] sm:$0xff] %vm448_vm1, %v948_v19  ;;  %1681 = vperm.xlu1 %5285, %v6480_v8   ;;  %v1218_v59 = vadd.f32 %v1205_v27, %v1127_v28  ;;  %v1128_v31 = vadd.f32 %v1115_v0, %v1037_v52  ;;  %v8908_v27 = vld [vmem:[#allocation23_spill] sm:$0xff]  ;;  %v1116_v28 = vmul.f32 %v6097_v43, %v6229_v12  ;;  %v840_v43 = vld [vmem:[#allocation2 + $0x58] sm:$0xff] }
 0x1f2   : > { %v1298_v0 = vmul.f32 %v6119_v23, %v6363_v53  ;;  %v1039_v52 = vmul.f32 %v6191_v16, %v6136_v14  ;;  %v8909_v23 = vld [vmem:[#allocation25_spill] sm:$0xff]  ;;  %v8911_v14 = vld [vmem:[#allocation30_spill] sm:$0xff] }
 0x1f3   : > { %v1309_v19 = vadd.f32 %v1296_v60, %v1218_v59  ;;  %v1219_v24 = vadd.f32 %v1206_v11, %v1128_v31  ;;  %v1117_v53 = vmul.f32 %v8909_v23, %v6265_v32  ;;  %v1208_v31 = vmul.f32 %v6139_v37, %v6324_v36  ;;  %v8912_v36 = vld [vmem:[#allocation29_spill] sm:$0xff] }
 0x1f4   : > { %v1118_v16 = vmul.f32 %v8911_v14, %v6311_v10 }
 0x1f5   : > { %4860 = vmatmul.msk.f32.gmra.mxu1 %vm844_vm0, %v1308_v7  ;;  %v1310_v46 = vadd.f32 %v1297_v54, %v1219_v24  ;;  %v1299_v54 = vmul.f32 %v8910_v61, %v6445_v41 }
 0x1f6   : > { %v928_v55 = vpop.f32.mrf.mxu0 }
 0x1f7   : > { %v949_v4 = vadd.f32 %v928_v55, %v838_v63  ;;  %v6516_v63 = vpop.permute.xlu0 %1550  ;;  %v1038_v55 = vmul.f32 %v8908_v27, %v6109_v25  ;;  %v5523_v25 = vmov 13  }
 0x1f8   : > { %5290 = vset.pattern.permute.xlu2 %v8904_v44  ;;  %v6495_v33 = vpop.permute.xlu2 %1508  ;;  %5296 = vset.pattern.permute.xlu0 %v5523_v25 }
 0x1f9   : > { %962 = vst.msk [vmem:[#allocation2 + $0x48] sm:$0xff] %vm448_vm1, %v949_v4  ;;  %5289 = vset.pattern.permute.xlu1 %v8904_v44  ;;  %v6501_v35 = vpop.permute.xlu1 %1472  ;;  %1736 = vperm.xlu2 %5290, %v6504_v22   ;;  %v1129_v12 = vadd.f32 %v1116_v28, %v1038_v55  ;;  %v6564_v55 = vld [vmem:[%s5716_s4 + $0x50] sm:$0xff]  ;;  %v8913_v28 = vld [vmem:[#allocation24_spill] sm:$0xff] }
 0x1fa   : > { %1732 = vperm.xlu1 %5289, %v6436_v17   ;;  %2042 = vperm.xlu0 %5296, %v6504_v22   ;;  %v1040_v41 = vmul.f32 %v8913_v28, %v8912_v36  ;;  %v8924_v36 = vld [vmem:[#allocation36_spill] sm:$0xff] }
 0x1fb   : > { %v1220_v44 = vadd.f32 %v1207_v21, %v1129_v12  ;;  %v8914_v12 = vld [vmem:[#allocation32_spill] sm:$0xff] }
 0x1fc   : > { %v1131_v10 = vadd.f32 %v1118_v16, %v1040_v41  ;;  %v8925_v41 = vld [vmem:[#allocation45_spill] sm:$0xff] }
 0x1fd   : > { %4861 = vmatmul.msk.f32.gmra.mxu1 %vm844_vm0, %v1309_v19  ;;  %v1311_v19 = vadd.f32 %v1298_v0, %v1220_v44  ;;  %v8916_v0 = vld [vmem:[#allocation42_spill] sm:$0xff] }
 0x1fe   : > { %v931_v38 = vpop.f32.mrf.mxu0 }
 0x1ff   : > { %v950_v7 = vadd.f32 %v931_v38, %v839_v48  ;;  %v6536_v49 = vpop.permute.xlu0 %1570  ;;  %v841_v48 = vld [vmem:[#allocation2 + $0x60] sm:$0xff]  ;;  %v1130_v38 = vadd.f32 %v1117_v53, %v1039_v52 }
 0x201   : > { %963 = vst.msk [vmem:[#allocation2 + $0x50] sm:$0xff] %vm448_vm1, %v950_v7  ;;  %v6523_v60 = vpop.permute.xlu1 %1480  ;;  %1744 = vperm.xlu2 %5290, %v6402_v45   ;;  %v6526_v51 = vpop.permute.xlu2 %1546  ;;  %v1221_v27 = vadd.f32 %v1208_v31, %v1130_v38 }
 0x202   : > { %1740 = vperm.xlu1 %5289, %v6411_v57   ;;  %2062 = vperm.xlu0 %5296, %v6542_v9  }
 0x203   : > { %v1312_v24 = vadd.f32 %v1299_v54, %v1221_v27  ;;  %v8922_v54 = vld [vmem:[#allocation34_spill] sm:$0xff]  ;;  %v8923_v27 = vld [vmem:[#allocation37_spill] sm:$0xff] }
 0x204   : > { %v1042_v28 = vmul.f32 %v8924_v36, %v8923_v27 }
 0x205   : > { %4862 = vmatmul.msk.f32.gmra.mxu1 %vm844_vm0, %v1310_v46  ;;  %v1209_v46 = vmul.f32 %v6169_v3, %v6328_v15  ;;  %v6591_v3 = vld [vmem:[%s5716_s4] sm:$0xff]  ;;  %v8920_v15 = vld [vmem:[#allocation33_spill] sm:$0xff] }
 0x206   : > { %v934_v4 = vpop.f32.mrf.mxu0 }
 0x207   : > { %v951_v59 = vadd.f32 %v934_v4, %v840_v43  ;;  %v6572_v21 = vpop.permute.xlu0 %1582  ;;  %v1300_v43 = vmul.f32 %v6178_v50, %v6382_v18  ;;  %v8915_v4 = vld [vmem:[#allocation27_spill] sm:$0xff]  ;;  %v1222_v23 = vadd.f32 %v1209_v46, %v1131_v10  ;;  %v8919_v50 = vld [vmem:[#allocation49_spill] sm:$0xff] }
 0x208   : > { %v1041_v44 = vmul.f32 %v8915_v4, %v8914_v12  ;;  %v1210_v18 = vmul.f32 %v8920_v15, %v8919_v50  ;;  %v8928_v12 = vld [vmem:[#allocation38_spill] sm:$0xff]  ;;  %v8931_v15 = vld [vmem:[#allocation41_spill] sm:$0xff] }
 0x209   : > { %964 = vst.msk [vmem:[#allocation2 + $0x58] sm:$0xff] %vm448_vm1, %v951_v59  ;;  %v6539_v6 = vpop.permute.xlu1 %1492  ;;  %1756 = vperm.xlu2 %5290, %v6542_v9   ;;  %v6545_v1 = vpop.permute.xlu2 %1558  ;;  %v8917_v59 = vld [vmem:[#allocation31_spill] sm:$0xff]  ;;  %v1313_v31 = vadd.f32 %v1300_v43, %v1222_v23  ;;  %v4909_v23 = vld [vmem:[%s8687_s2 + $0x28] sm:$0xff]  ;;  %v8930_v50 = vld [vmem:[#allocation46_spill] sm:$0xff] }
 0x20a   : > { %1752 = vperm.xlu1 %5289, %v6420_v29   ;;  %2074 = vperm.xlu0 %5296, %v6564_v55   ;;  %v1119_v52 = vmul.f32 %v8917_v59, %v8916_v0  ;;  %v8927_v43 = vld [vmem:[#allocation47_spill] sm:$0xff] }
 0x20b   : > { %v8929_v59 = vld [vmem:[#allocation39_spill] sm:$0xff]  ;;  %1874 = vmatpush.msra.mxu2 %v4909_v23 }
 0x20d   : > { %4863 = vmatmul.msk.f32.gmra.mxu1 %vm844_vm0, %v1311_v19  ;;  %v8918_v19 = vmov 12  }
 0x20e   : > { %v937_v11 = vpop.f32.mrf.mxu0 }
 0x20f   : > { %v952_v7 = vadd.f32 %v937_v11, %v841_v48  ;;  %v1132_v11 = vadd.f32 %v1119_v52, %v1041_v44  ;;  %v6596_v38 = vpop.permute.xlu0 %1594  ;;  %v8737_v44 = vmov 14   ;;  %v1302_v52 = vmul.f32 %v8929_v59, %v6470_v39 }
 0x210   : > { %8921 = vst [vmem:[#allocation4_spill] sm:$0xff] %v6596_v38 }
 0x211   : > { %965 = vst.msk [vmem:[#allocation2 + $0x60] sm:$0xff] %vm448_vm1, %v952_v7  ;;  %v6561_v32 = vpop.permute.xlu1 %1504  ;;  %1768 = vperm.xlu2 %5290, %v6564_v55   ;;  %v6567_v37 = vpop.permute.xlu2 %1566  ;;  %v1223_v61 = vadd.f32 %v1210_v18, %v1132_v11  ;;  %v1301_v7 = vmul.f32 %v8922_v54, %v6379_v30  ;;  %v1211_v30 = vmul.f32 %v8928_v12, %v8927_v43  ;;  %v8933_v54 = vld [vmem:[#allocation26_spill] sm:$0xff] }
 0x212   : > { %1764 = vperm.xlu1 %5289, %v6448_v42   ;;  %5297 = vset.pattern.permute.xlu0 %v8737_v44  ;;  %v1121_v18 = vmul.f32 %v8931_v15, %v8930_v50  ;;  %v6665_v50 = vld [vmem:[%s5889_s11 + $0x68] sm:$0xff] }
 0x213   : > { %v1314_v46 = vadd.f32 %v1301_v7, %v1223_v61  ;;  %2125 = vperm.xlu0 %5297, %v6591_v3   ;;  %v8932_v61 = vld [vmem:[#allocation40_spill] sm:$0xff]  ;;  %8938 = vst [vmem:[#allocation5_spill] sm:$0xff] %v6665_v50 }
 0x214   : > { %v1043_v7 = vmul.f32 %v8933_v54, %v8932_v61  ;;  %v6676_v54 = vld [vmem:[%s5889_s11 + $0x138] sm:$0xff] }
 0x215   : > { %4864 = vmatmul.msk.f32.gmra.mxu1 %vm844_vm0, %v1312_v24  ;;  %v8926_v24 = vld [vmem:[#allocation35_spill] sm:$0xff]  ;;  %8940 = vst [vmem:[#allocation8_spill] sm:$0xff] %v6676_v54 }
 0x216   : > { %v1120_v10 = vmul.f32 %v8926_v24, %v8925_v41  ;;  %v1134_v36 = vadd.f32 %v1121_v18, %v1043_v7  ;;  %v8935_v41 = vld [vmem:[#allocation43_spill] sm:$0xff]  ;;  %v1597_v18 = vmul.f32 %v6665_v50, %v6526_v51 }
 0x217   : > { %v6614_v4 = vpop.permute.xlu0 %1645 }
 0x218   : > { %v1133_v0 = vadd.f32 %v1120_v10, %v1042_v28  ;;  %v8934_v28 = vld [vmem:[#allocation48_spill] sm:$0xff] }
 0x219   : > { %v6584_v53 = vpop.permute.xlu1 %1516  ;;  %5291 = vset.pattern.permute.xlu2 %v8918_v19  ;;  %v6587_v48 = vpop.permute.xlu2 %1578  ;;  %v1212_v24 = vmul.f32 %v8935_v41, %v8934_v28 }
 0x21a   : > { %1776 = vperm.xlu1 %5289, %v6473_v58   ;;  %1956 = vperm.xlu2 %5291, %v6591_v3  }
 0x21b   : > { %2145 = vperm.xlu0 %5297, %v6427_v20   ;;  %v1225_v12 = vadd.f32 %v1212_v24, %v1134_v36 }
 0x21d   : > { %4865 = vmatmul.msk.f32.gmra.mxu1 %vm844_vm0, %v1313_v31  ;;  %v1224_v31 = vadd.f32 %v1211_v30, %v1133_v0 }
 0x21f   : > { %v1315_v27 = vadd.f32 %v1302_v52, %v1224_v31  ;;  %v6640_v10 = vpop.permute.xlu0 %1665  ;;  %v6673_v31 = vld [vmem:[%s5889_s11 + $0xd0] sm:$0xff] }
 0x220   : > { %8939 = vst [vmem:[#allocation7_spill] sm:$0xff] %v6673_v31 }
 0x221   : > { %v6601_v14 = vpop.permute.xlu2 %1590 }
 0x222   : > { %5293 = vset.pattern.permute.xlu1 %v8918_v19  ;;  %v6604_v16 = vpop.permute.xlu1 %1554  ;;  %1968 = vperm.xlu2 %5291, %v6411_v57   ;;  %v4908_v19 = vld [vmem:[%s8687_s2 + $0x20] sm:$0xff] }
 0x223   : > { %1964 = vperm.xlu1 %5293, %v6504_v22   ;;  %1875 = vmatpush.msra.mxu2 %v4908_v19  ;;  %v6662_v19 = vld [vmem:[%s5889_s11] sm:$0xff] }
 0x224   : > { %2157 = vperm.xlu0 %5297, %v6455_v5   ;;  %8937 = vst [vmem:[#allocation6_spill] sm:$0xff] %v6662_v19  ;;  %v1519_v15 = vmul.f32 %v6397_v62, %v6662_v19  ;;  %v6738_v19 = vld [vmem:[%s5889_s11 + $0x140] sm:$0xff] }
 0x225   : > { %4866 = vmatmul.msk.f32.gmra.mxu1 %vm844_vm0, %v1314_v46  ;;  %v8936_v46 = vld [vmem:[#allocation44_spill] sm:$0xff] }
 0x226   : > { %v1303_v43 = vmul.f32 %v8936_v46, %v6399_v40  ;;  %v1610_v36 = vadd.f32 %v1597_v18, %v1519_v15 }
 0x227   : > { %v6652_v52 = vpop.permute.xlu0 %1677 }
 0x228   : > { %v1316_v59 = vadd.f32 %v1303_v43, %v1225_v12  ;;  %v1317_v43 = vld [vmem:[#allocation2] sm:$0xff] }
 0x22a   : > { %v6629_v11 = vpop.permute.xlu1 %1562  ;;  %1976 = vperm.xlu2 %5291, %v6427_v20   ;;  %v6632_v39 = vpop.permute.xlu2 %1641 }
 0x22b   : > { %1972 = vperm.xlu1 %5293, %v6402_v45  }
 0x22c   : > { %2169 = vperm.xlu0 %5297, %v6480_v8  }
 0x22d   : > { %4867 = vmatmul.msk.f32.gmra.mxu1 %vm844_vm0, %v1315_v27 }
 0x22f   : > { %v1729_v61 = vpop.permute.xlu0 %1728 }
 0x230   : > { %v1779_v51 = vmul.f32 %v6676_v54, %v1729_v61  ;;  %v1318_v61 = vld [vmem:[#allocation2 + $0x8] sm:$0xff]  ;;  %v6735_v54 = vld [vmem:[%s5889_s11 + $0x78] sm:$0xff] }
 0x231   : > { %8945 = vst [vmem:[#allocation13_spill] sm:$0xff] %v6735_v54 }
 0x232   : > { %v6645_v30 = vpop.permute.xlu1 %1574  ;;  %1988 = vperm.xlu2 %5291, %v6455_v5   ;;  %v6648_v0 = vpop.permute.xlu2 %1653 }
 0x233   : > { %1984 = vperm.xlu1 %5293, %v6542_v9  }
 0x235   : > { %4868 = vmatmul.msk.f32.gmra.mxu1 %vm844_vm0, %v1316_v59 }
 0x23a   : > { %v6655_v40 = vpop.permute.xlu1 %1586  ;;  %2000 = vperm.xlu2 %5291, %v6480_v8   ;;  %v6658_v23 = vpop.permute.xlu2 %1661 }
 0x23b   : > { %1996 = vperm.xlu1 %5293, %v6564_v55  }
 0x242   : > { %5295 = vset.pattern.permute.xlu2 %v5523_v25  ;;  %v6679_v7 = vpop.permute.xlu2 %1673 }
 0x243   : > { %5294 = vset.pattern.permute.xlu1 %v5523_v25  ;;  %v1638_v27 = vpop.permute.xlu1 %1637  ;;  %2038 = vperm.xlu2 %5295, %v6436_v17   ;;  %v8735_v25 = vmov 15  }
 0x244   : > { %v1688_v62 = vmul.f32 %v6673_v31, %v1638_v27  ;;  %2034 = vperm.xlu1 %5294, %v6591_v3   ;;  %5301 = vset.pattern.permute.xlu0 %v8735_v25  ;;  %v6729_v25 = vpop.permute.xlu0 %1748  ;;  %v1320_v31 = vld [vmem:[#allocation2 + $0x18] sm:$0xff] }
 0x245   : > { %2220 = vperm.xlu0 %5301, %v6436_v17  }
 0x246   : > { %v1701_v28 = vadd.f32 %v1688_v62, %v1610_v36 }
 0x248   : > { %v1792_v41 = vadd.f32 %v1779_v51, %v1701_v28  ;;  %v1319_v28 = vld [vmem:[#allocation2 + $0x10] sm:$0xff] }
 0x24a   : > { %4910 = vmatmul.msk.f32.vlgmr.msra.gmra.mxu2 %vm844_vm0, %v1792_v41  ;;  %v6687_v24 = vpop.permute.xlu2 %1685 }
 0x24b   : > { %8941 = vst [vmem:[#allocation9_spill] sm:$0xff] %v6687_v24  ;;  %v6689_v46 = vpop.permute.xlu1 %1649  ;;  %2050 = vperm.xlu2 %5295, %v6402_v45  }
 0x24c   : > { %2046 = vperm.xlu1 %5294, %v6411_v57  }
 0x24d   : > { %2240 = vperm.xlu0 %5301, %v6420_v29  }
 0x252   : > { %v1389_v12 = vpop.f32.mrf.mxu1 }
 0x253   : > { %v1428_v59 = vadd.f32 %v1389_v12, %v1317_v43  ;;  %v6695_v15 = vpop.permute.xlu1 %1657  ;;  %2058 = vperm.xlu2 %5295, %v6420_v29   ;;  %v1737_v18 = vpop.permute.xlu2 %1736 }
 0x254   : > { %2054 = vperm.xlu1 %5294, %v6427_v20  }
 0x255   : > { %1441 = vst.msk [vmem:[#allocation2] sm:$0xff] %vm448_vm1, %v1428_v59  ;;  %2252 = vperm.xlu0 %5301, %v6448_v42  }
 0x25a   : > { %v1392_v27 = vpop.f32.mrf.mxu1 }
 0x25b   : > { %v1429_v36 = vadd.f32 %v1392_v27, %v1318_v61  ;;  %v6701_v62 = vpop.permute.xlu1 %1669  ;;  %2070 = vperm.xlu2 %5295, %v6448_v42   ;;  %v6704_v51 = vpop.permute.xlu2 %1744  ;;  %v6715_v61 = vld [vmem:[%s5889_s11 + $0x8] sm:$0xff]  ;;  %v6718_v27 = vld [vmem:[%s5889_s11 + $0x70] sm:$0xff] }
 0x25c   : > { %2066 = vperm.xlu1 %5294, %v6455_v5   ;;  %8942 = vst [vmem:[#allocation11_spill] sm:$0xff] %v6715_v61 }
 0x25d   : > { %1442 = vst.msk [vmem:[#allocation2 + $0x8] sm:$0xff] %vm448_vm1, %v1429_v36  ;;  %v6723_v36 = vld [vmem:[%s5889_s11 + $0xd8] sm:$0xff]  ;;  %2264 = vperm.xlu0 %5301, %v6473_v58  }
 0x25e   : > { %8943 = vst [vmem:[#allocation10_spill] sm:$0xff] %v6718_v27  ;;  %v1689_v44 = vmul.f32 %v6723_v36, %v6632_v39  ;;  %v1599_v39 = vmul.f32 %v6735_v54, %v6604_v16 }
 0x25f   : > { %8944 = vst [vmem:[#allocation12_spill] sm:$0xff] %v6723_v36 }
 0x262   : > { %v1395_v41 = vpop.f32.mrf.mxu1 }
 0x263   : > { %v1430_v43 = vadd.f32 %v1395_v41, %v1319_v28  ;;  %v6709_v12 = vpop.permute.xlu1 %1681  ;;  %2082 = vperm.xlu2 %5295, %v6473_v58   ;;  %v6712_v59 = vpop.permute.xlu2 %1756  ;;  %v1520_v28 = vmul.f32 %v6501_v35, %v6715_v61  ;;  %v1598_v41 = vmul.f32 %v6718_v27, %v6516_v63  ;;  %v8946_v61 = vmov 14   ;;  %v6744_v27 = vld [vmem:[%s5889_s11 + $0x10] sm:$0xff] }
 0x264   : > { %2078 = vperm.xlu1 %5294, %v6480_v8  }
 0x265   : > { %1443 = vst.msk [vmem:[#allocation2 + $0x10] sm:$0xff] %vm448_vm1, %v1430_v43  ;;  %v1611_v50 = vadd.f32 %v1598_v41, %v1520_v28  ;;  %v6754_v28 = vld [vmem:[%s5889_s11 + $0xe0] sm:$0xff]  ;;  %v1521_v41 = vmul.f32 %v6423_v26, %v6744_v27 }
 0x266   : > { %8947 = vst [vmem:[#allocation14_spill] sm:$0xff] %v6754_v28  ;;  %v1690_v16 = vmul.f32 %v6754_v28, %v6614_v4  ;;  %v6768_v26 = vld [vmem:[%s5889_s11 + $0x80] sm:$0xff]  ;;  %v6776_v4 = vld [vmem:[%s5889_s11 + $0x18] sm:$0xff] }
 0x267   : > { %v1702_v36 = vadd.f32 %v1689_v44, %v1611_v50  ;;  %v1612_v38 = vadd.f32 %v1599_v39, %v1521_v41  ;;  %v6763_v44 = vpop.permute.xlu0 %1760  ;;  %v1321_v50 = vld [vmem:[#allocation2 + $0x20] sm:$0xff]  ;;  %8949 = vst [vmem:[#allocation16_spill] sm:$0xff] %v6768_v26  ;;  %v6779_v41 = vld [vmem:[%s5889_s11 + $0xe8] sm:$0xff] }
 0x268   : > { %8950 = vst [vmem:[#allocation17_spill] sm:$0xff] %v6779_v41 }
 0x26a   : > { %v1398_v43 = vpop.f32.mrf.mxu1 }
 0x26b   : > { %v1431_v35 = vadd.f32 %v1398_v43, %v1320_v31  ;;  %5299 = vset.pattern.permute.xlu2 %v8946_v61  ;;  %v6741_v63 = vpop.permute.xlu2 %1768  ;;  %v6759_v43 = vld [vmem:[%s5889_s11 + $0x148] sm:$0xff] }
 0x26c   : > { %5298 = vset.pattern.permute.xlu1 %v8946_v61  ;;  %v1733_v24 = vpop.permute.xlu1 %1732  ;;  %2133 = vperm.xlu2 %5299, %v6504_v22   ;;  %8948 = vst [vmem:[#allocation15_spill] sm:$0xff] %v6759_v43 }
 0x26d   : > { %1444 = vst.msk [vmem:[#allocation2 + $0x18] sm:$0xff] %vm448_vm1, %v1431_v35  ;;  %v1780_v31 = vmul.f32 %v6738_v19, %v1733_v24  ;;  %2129 = vperm.xlu1 %5298, %v6436_v17   ;;  %v1781_v35 = vmul.f32 %v6759_v43, %v1737_v18  ;;  %v1600_v18 = vmul.f32 %v6768_v26, %v6545_v1 }
 0x26f   : > { %v1793_v61 = vadd.f32 %v1780_v31, %v1702_v36  ;;  %v1703_v31 = vadd.f32 %v1690_v16, %v1612_v38  ;;  %v1691_v38 = vmul.f32 %v6779_v41, %v6689_v46  ;;  %v6791_v28 = vpop.permute.xlu0 %1772 }
 0x271   : > { %4911 = vmatmul.msk.f32.gmra.mxu2 %vm844_vm0, %v1793_v61  ;;  %v1794_v61 = vadd.f32 %v1781_v35, %v1703_v31  ;;  %v6795_v31 = vld [vmem:[%s5889_s11 + $0x88] sm:$0xff] }
 0x272   : > { %v1401_v24 = vpop.f32.mrf.mxu1  ;;  %8952 = vst [vmem:[#allocation19_spill] sm:$0xff] %v6795_v31 }
 0x273   : > { %v1432_v54 = vadd.f32 %v1401_v24, %v1321_v50  ;;  %v6784_v50 = vld [vmem:[%s5889_s11 + $0x150] sm:$0xff]  ;;  %v1522_v24 = vmul.f32 %v6523_v60, %v6776_v4 }
 0x274   : > { %v1741_v36 = vpop.permute.xlu1 %1740  ;;  %2141 = vperm.xlu2 %5299, %v6402_v45   ;;  %v6771_v39 = vpop.permute.xlu2 %1956  ;;  %8951 = vst [vmem:[#allocation18_spill] sm:$0xff] %v6784_v50 }
 0x275   : > { %1445 = vst.msk [vmem:[#allocation2 + $0x20] sm:$0xff] %vm448_vm1, %v1432_v54  ;;  %2137 = vperm.xlu1 %5298, %v6411_v57   ;;  %v1322_v54 = vld [vmem:[#allocation2 + $0x28] sm:$0xff]  ;;  %v1613_v43 = vadd.f32 %v1600_v18, %v1522_v24  ;;  %v1782_v1 = vmul.f32 %v6784_v50, %v1741_v36  ;;  %v6808_v36 = vld [vmem:[%s5889_s11 + $0xf0] sm:$0xff]  ;;  %v1601_v24 = vmul.f32 %v6795_v31, %v6629_v11  ;;  %v1323_v50 = vld [vmem:[#allocation2 + $0x30] sm:$0xff] }
 0x276   : > { %v6805_v18 = vld [vmem:[%s5889_s11 + $0x20] sm:$0xff] }
 0x277   : > { %v1704_v46 = vadd.f32 %v1691_v38, %v1613_v43  ;;  %8953 = vst [vmem:[#allocation20_spill] sm:$0xff] %v6805_v18  ;;  %v1523_v43 = vmul.f32 %v6451_v56, %v6805_v18  ;;  %v1692_v38 = vmul.f32 %v6808_v36, %v6648_v0  ;;  %v6833_v56 = vld [vmem:[%s5889_s11 + $0xf8] sm:$0xff] }
 0x279   : > { %4912 = vmatmul.msk.f32.gmra.mxu2 %vm844_vm0, %v1794_v61  ;;  %v8750_v61 = vmov 16   ;;  %v1614_v11 = vadd.f32 %v1601_v24, %v1523_v43  ;;  %v6850_v43 = vld [vmem:[%s5889_s11 + $0x160] sm:$0xff] }
 0x27a   : > { %v1404_v16 = vpop.f32.mrf.mxu1  ;;  %5305 = vset.pattern.permute.xlu0 %v8750_v61  ;;  %v6826_v61 = vld [vmem:[%s5889_s11 + $0x90] sm:$0xff]  ;;  %8956 = vst [vmem:[#allocation23_spill] sm:$0xff] %v6850_v43 }
 0x27b   : > { %v1433_v35 = vadd.f32 %v1404_v16, %v1322_v54  ;;  %v1795_v54 = vadd.f32 %v1782_v1, %v1704_v46  ;;  %2452 = vperm.xlu0 %5305, %v6504_v22   ;;  %v6815_v16 = vld [vmem:[%s5889_s11 + $0x158] sm:$0xff]  ;;  %v6830_v46 = vpop.permute.xlu0 %1960  ;;  %v1602_v24 = vmul.f32 %v6826_v61, %v6567_v37 }
 0x27c   : > { %v6797_v26 = vpop.permute.xlu1 %1752  ;;  %2153 = vperm.xlu2 %5299, %v6542_v9   ;;  %v6800_v60 = vpop.permute.xlu2 %1968  ;;  %v1783_v1 = vmul.f32 %v6815_v16, %v6704_v51  ;;  %v1705_v51 = vadd.f32 %v1692_v38, %v1614_v11  ;;  %v6856_v11 = vld [vmem:[%s5889_s11 + $0x30] sm:$0xff] }
 0x27d   : > { %1446 = vst.msk [vmem:[#allocation2 + $0x28] sm:$0xff] %vm448_vm1, %v1433_v35  ;;  %2149 = vperm.xlu1 %5298, %v6420_v29   ;;  %v6823_v35 = vld [vmem:[%s5889_s11 + $0x28] sm:$0xff] }
 0x27e   : > { %8954 = vst [vmem:[#allocation21_spill] sm:$0xff] %v6823_v35 }
 0x281   : > { %4913 = vmatmul.msk.f32.gmra.mxu2 %vm844_vm0, %v1795_v54  ;;  %v1524_v54 = vmul.f32 %v6430_v2, %v6823_v35  ;;  %v1324_v2 = vld [vmem:[#allocation2 + $0x38] sm:$0xff] }
 0x282   : > { %v1407_v41 = vpop.f32.mrf.mxu1 }
 0x283   : > { %v1434_v31 = vadd.f32 %v1407_v41, %v1323_v50  ;;  %v1693_v41 = vmul.f32 %v6833_v56, %v6695_v15  ;;  %v1796_v50 = vadd.f32 %v1783_v1, %v1705_v51  ;;  %2472 = vperm.xlu0 %5305, %v6542_v9   ;;  %v6859_v15 = vld [vmem:[%s5889_s11 + $0x98] sm:$0xff]  ;;  %v8957_v51 = vmov 15  }
 0x284   : > { %v6835_v18 = vpop.permute.xlu1 %1764  ;;  %2165 = vperm.xlu2 %5299, %v6564_v55   ;;  %v6838_v0 = vpop.permute.xlu2 %1976 }
 0x285   : > { %8955 = vst [vmem:[#allocation22_spill] sm:$0xff] %v6838_v0  ;;  %2161 = vperm.xlu1 %5298, %v6448_v42   ;;  %v1615_v0 = vadd.f32 %v1602_v24, %v1524_v54  ;;  %v6866_v24 = vpop.permute.xlu0 %1980 }
 0x286   : > { %1447 = vst.msk [vmem:[#allocation2 + $0x30] sm:$0xff] %vm448_vm1, %v1434_v31  ;;  %v1784_v31 = vmul.f32 %v6850_v43, %v6729_v25  ;;  %v6872_v25 = vld [vmem:[%s5889_s11 + $0x100] sm:$0xff] }
 0x287   : > { %v1706_v35 = vadd.f32 %v1693_v41, %v1615_v0  ;;  %8959 = vst [vmem:[#allocation28_spill] sm:$0xff] %v6866_v24  ;;  %v1525_v0 = vmul.f32 %v6539_v6, %v6856_v11  ;;  %v1603_v41 = vmul.f32 %v6859_v15, %v6536_v49 }
 0x288   : > { %8960 = vst [vmem:[#allocation30_spill] sm:$0xff] %v6872_v25 }
 0x289   : > { %4914 = vmatmul.msk.f32.gmra.mxu2 %vm844_vm0, %v1796_v50  ;;  %v1797_v50 = vadd.f32 %v1784_v31, %v1706_v35  ;;  %v1616_v43 = vadd.f32 %v1603_v41, %v1525_v0  ;;  %v6891_v35 = vld [vmem:[%s5889_s11 + $0x38] sm:$0xff] }
 0x28a   : > { %v1410_v37 = vpop.f32.mrf.mxu1 }
 0x28b   : > { %v1435_v38 = vadd.f32 %v1410_v37, %v1324_v2  ;;  %2484 = vperm.xlu0 %5305, %v6564_v55   ;;  %v6880_v2 = vld [vmem:[%s5889_s11 + $0x168] sm:$0xff]  ;;  %v1694_v37 = vmul.f32 %v6872_v25, %v6658_v23 }
 0x28c   : > { %v6861_v1 = vpop.permute.xlu1 %1776  ;;  %5300 = vset.pattern.permute.xlu2 %v8957_v51  ;;  %v6864_v54 = vpop.permute.xlu2 %1988  ;;  %v1785_v6 = vmul.f32 %v6880_v2, %v6797_v26  ;;  %v6903_v26 = vld [vmem:[%s5889_s11 + $0x108] sm:$0xff] }
 0x28d   : > { %8958 = vst [vmem:[#allocation25_spill] sm:$0xff] %v6864_v54  ;;  %2173 = vperm.xlu1 %5298, %v6473_v58   ;;  %2216 = vperm.xlu2 %5300, %v6591_v3   ;;  %v1325_v54 = vld [vmem:[#allocation2 + $0x40] sm:$0xff]  ;;  %v1707_v25 = vadd.f32 %v1694_v37, %v1616_v43  ;;  %v6908_v43 = vpop.permute.xlu0 %1992  ;;  %v6919_v37 = vld [vmem:[%s5889_s11 + $0x40] sm:$0xff] }
 0x28e   : > { %1448 = vst.msk [vmem:[#allocation2 + $0x38] sm:$0xff] %vm448_vm1, %v1435_v38  ;;  %v6886_v38 = vld [vmem:[%s5889_s11 + $0xa0] sm:$0xff] }
 0x28f   : > { %v1604_v23 = vmul.f32 %v6886_v38, %v6645_v30  ;;  %v1798_v30 = vadd.f32 %v1785_v6, %v1707_v25  ;;  %8962 = vst [vmem:[#allocation24_spill] sm:$0xff] %v6908_v43  ;;  %v1326_v25 = vld [vmem:[#allocation2 + $0x48] sm:$0xff] }
 0x290   : > { %8963 = vst [vmem:[#allocation32_spill] sm:$0xff] %v6919_v37 }
 0x291   : > { %4915 = vmatmul.msk.f32.gmra.mxu2 %vm844_vm0, %v1797_v50  ;;  %v1695_v50 = vmul.f32 %v6903_v26, %v6640_v10 }
 0x292   : > { %v1413_v24 = vpop.f32.mrf.mxu1 }
 0x293   : > { %v1436_v49 = vadd.f32 %v1413_v24, %v1325_v54  ;;  %v1526_v54 = vmul.f32 %v6476_v13, %v6891_v35  ;;  %v8759_v24 = vmov 17   ;;  %v6922_v13 = vld [vmem:[%s5889_s11 + $0xa8] sm:$0xff] }
 0x294   : > { %v6893_v31 = vpop.permute.xlu2 %2000  ;;  %5306 = vset.pattern.permute.xlu0 %v8759_v24  ;;  %8964 = vst [vmem:[#allocation27_spill] sm:$0xff] %v6922_v13  ;;  %v1605_v10 = vmul.f32 %v6922_v13, %v6587_v48 }
 0x295   : > { %8961 = vst [vmem:[#allocation29_spill] sm:$0xff] %v6893_v31  ;;  %5302 = vset.pattern.permute.xlu1 %v8957_v51  ;;  %v6899_v0 = vpop.permute.xlu1 %1964  ;;  %2228 = vperm.xlu2 %5300, %v6411_v57   ;;  %v6912_v51 = vld [vmem:[%s5889_s11 + $0x170] sm:$0xff]  ;;  %v1617_v41 = vadd.f32 %v1604_v23, %v1526_v54  ;;  %v1527_v23 = vmul.f32 %v6461_v47, %v6919_v37 }
 0x296   : > { %1449 = vst.msk [vmem:[#allocation2 + $0x40] sm:$0xff] %vm448_vm1, %v1436_v49  ;;  %2224 = vperm.xlu1 %5302, %v6504_v22   ;;  %2522 = vperm.xlu0 %5306, %v6591_v3   ;;  %v1786_v49 = vmul.f32 %v6912_v51, %v6712_v59  ;;  %v6927_v31 = vld [vmem:[%s5889_s11 + $0x110] sm:$0xff] }
 0x297   : > { %v1708_v54 = vadd.f32 %v1695_v50, %v1617_v41  ;;  %v1696_v59 = vmul.f32 %v6927_v31, %v6701_v62  ;;  %v1618_v48 = vadd.f32 %v1605_v10, %v1527_v23  ;;  %v1327_v41 = vld [vmem:[#allocation2 + $0x50] sm:$0xff] }
 0x298   : > { %v6952_v62 = vld [vmem:[%s5889_s11 + $0x48] sm:$0xff] }
 0x299   : > { %4916 = vmatmul.msk.f32.gmra.mxu2 %vm844_vm0, %v1798_v30  ;;  %v1799_v47 = vadd.f32 %v1786_v49, %v1708_v54  ;;  %v6955_v49 = vld [vmem:[%s5889_s11 + $0xb0] sm:$0xff]  ;;  %v6964_v54 = vld [vmem:[%s5889_s11 + $0x118] sm:$0xff] }
 0x29a   : > { %v1416_v6 = vpop.f32.mrf.mxu1  ;;  %8966 = vst [vmem:[#allocation31_spill] sm:$0xff] %v6955_v49 }
 0x29b   : > { %v1437_v24 = vadd.f32 %v1416_v6, %v1326_v25  ;;  %v6943_v25 = vld [vmem:[%s5889_s11 + $0x178] sm:$0xff]  ;;  %v1709_v6 = vadd.f32 %v1696_v59, %v1618_v48  ;;  %8967 = vst [vmem:[#allocation49_spill] sm:$0xff] %v6964_v54  ;;  %v1606_v59 = vmul.f32 %v6955_v49, %v6572_v21  ;;  %v6972_v48 = vld [vmem:[%s5889_s11 + $0x180] sm:$0xff]  ;;  %v6986_v49 = vld [vmem:[%s5889_s11 + $0x50] sm:$0xff] }
 0x29c   : > { %v1787_v37 = vmul.f32 %v6943_v25, %v6763_v44  ;;  %v1528_v44 = vmul.f32 %v6561_v32, %v6952_v62  ;;  %v1788_v21 = vmul.f32 %v6972_v48, %v6835_v18  ;;  %8969 = vst [vmem:[#allocation34_spill] sm:$0xff] %v6986_v49  ;;  %v6997_v18 = vld [vmem:[%s5889_s11 + $0x120] sm:$0xff] }
 0x29d   : > { %1450 = vst.msk [vmem:[#allocation2 + $0x48] sm:$0xff] %vm448_vm1, %v1437_v24  ;;  %v6934_v30 = vpop.permute.xlu1 %1972  ;;  %2236 = vperm.xlu2 %5300, %v6427_v20   ;;  %v6937_v43 = vpop.permute.xlu2 %2038 }
 0x29e   : > { %2232 = vperm.xlu1 %5302, %v6402_v45   ;;  %2542 = vperm.xlu0 %5306, %v6427_v20   ;;  %v6946_v24 = vpop.permute.xlu0 %2004  ;;  %v1619_v32 = vadd.f32 %v1606_v59, %v1528_v44  ;;  %8971 = vst [vmem:[#allocation36_spill] sm:$0xff] %v6997_v18 }
 0x29f   : > { %8965 = vst [vmem:[#allocation42_spill] sm:$0xff] %v6946_v24 }
 0x2a1   : > { %4917 = vmatmul.msk.f32.gmra.mxu2 %vm844_vm0, %v1799_v47  ;;  %v1800_v47 = vadd.f32 %v1787_v37, %v1709_v6 }
 0x2a2   : > { %v1419_v50 = vpop.f32.mrf.mxu1 }
 0x2a3   : > { %v1438_v13 = vadd.f32 %v1419_v50, %v1327_v41  ;;  %v6979_v41 = vld [vmem:[%s5889_s11 + $0xb8] sm:$0xff]  ;;  %v1328_v50 = vld [vmem:[#allocation2 + $0x58] sm:$0xff] }
 0x2a4   : > { %8968 = vst [vmem:[#allocation33_spill] sm:$0xff] %v6979_v41 }
 0x2a5   : > { %1451 = vst.msk [vmem:[#allocation2 + $0x50] sm:$0xff] %vm448_vm1, %v1438_v13  ;;  %v6958_v23 = vpop.permute.xlu1 %1984  ;;  %2248 = vperm.xlu2 %5300, %v6455_v5   ;;  %v6961_v10 = vpop.permute.xlu2 %2050  ;;  %v1697_v13 = vmul.f32 %v6964_v54, %v6679_v7  ;;  %v1607_v7 = vmul.f32 %v6979_v41, %v6655_v40  ;;  %v7003_v40 = vld [vmem:[%s5889_s11 + $0x188] sm:$0xff]  ;;  %v1329_v41 = vld [vmem:[#allocation2 + $0x60] sm:$0xff] }
 0x2a6   : > { %2244 = vperm.xlu1 %5302, %v6542_v9   ;;  %2554 = vperm.xlu0 %5306, %v6455_v5   ;;  %v6983_v37 = vpop.permute.xlu0 %2042  ;;  %8972 = vst [vmem:[#allocation45_spill] sm:$0xff] %v7003_v40 }
 0x2a9   : > { %4918 = vmatmul.msk.f32.gmra.mxu2 %vm844_vm0, %v1800_v47  ;;  %v1710_v47 = vadd.f32 %v1697_v13, %v1619_v32  ;;  %v7010_v32 = vld [vmem:[%s5889_s11 + $0x58] sm:$0xff] }
 0x2aa   : > { %v1422_v24 = vpop.f32.mrf.mxu1  ;;  %8973 = vst [vmem:[#allocation35_spill] sm:$0xff] %v7010_v32 }
 0x2ab   : > { %v1439_v6 = vadd.f32 %v1422_v24, %v1328_v50  ;;  %v1529_v24 = vmul.f32 %v6495_v33, %v6986_v49  ;;  %v1801_v59 = vadd.f32 %v1788_v21, %v1710_v47  ;;  %v1698_v50 = vmul.f32 %v6997_v18, %v6652_v52  ;;  %v7020_v49 = vld [vmem:[%s5889_s11 + $0x128] sm:$0xff] }
 0x2ac   : > { %v1789_v33 = vmul.f32 %v7003_v40, %v6741_v63  ;;  %8975 = vst [vmem:[#allocation38_spill] sm:$0xff] %v7020_v49  ;;  %v1530_v52 = vmul.f32 %v6491_v34, %v7010_v32  ;;  %v1699_v34 = vmul.f32 %v7020_v49, %v6709_v12  ;;  %v7047_v32 = vld [vmem:[%s5889_s11 + $0xc8] sm:$0xff] }
 0x2ad   : > { %1452 = vst.msk [vmem:[#allocation2 + $0x58] sm:$0xff] %vm448_vm1, %v1439_v6  ;;  %v6991_v54 = vpop.permute.xlu1 %1996  ;;  %2260 = vperm.xlu2 %5300, %v6480_v8   ;;  %v6994_v44 = vpop.permute.xlu2 %2058  ;;  %v1620_v13 = vadd.f32 %v1607_v7, %v1529_v24  ;;  %v7013_v6 = vld [vmem:[%s5889_s11 + $0xc0] sm:$0xff] }
 0x2ae   : > { %8970 = vst [vmem:[#allocation37_spill] sm:$0xff] %v6991_v54  ;;  %2256 = vperm.xlu1 %5302, %v6564_v55   ;;  %2566 = vperm.xlu0 %5306, %v6480_v8   ;;  %v7017_v21 = vpop.permute.xlu0 %2062  ;;  %v1608_v7 = vmul.f32 %v7013_v6, %v6601_v14 }
 0x2af   : > { %8974 = vst [vmem:[#allocation47_spill] sm:$0xff] %v7013_v6  ;;  %v1711_v24 = vadd.f32 %v1698_v50, %v1620_v13 }
 0x2b0   : > { %v1621_v13 = vadd.f32 %v1608_v7, %v1530_v52  ;;  %8979 = vst [vmem:[#allocation41_spill] sm:$0xff] %v7047_v32  ;;  %v8982_v7 = vld [vmem:[#allocation4_spill] sm:$0xff] }
 0x2b1   : > { %4919 = vmatmul.msk.f32.gmra.mxu2 %vm844_vm0, %v1801_v59  ;;  %v8976_v59 = vmov 16   ;;  %v1802_v14 = vadd.f32 %v1789_v33, %v1711_v24  ;;  %v7054_v33 = vld [vmem:[%s5889_s11 + $0x130] sm:$0xff] }
 0x2b2   : > { %v1425_v54 = vpop.f32.mrf.mxu1  ;;  %v1712_v50 = vadd.f32 %v1699_v34, %v1621_v13  ;;  %8981 = vst [vmem:[#allocation26_spill] sm:$0xff] %v7054_v33  ;;  %v8984_v13 = vld [vmem:[#allocation9_spill] sm:$0xff] }
 0x2b3   : > { %v1440_v47 = vadd.f32 %v1425_v54, %v1329_v41  ;;  %v7038_v41 = vld [vmem:[%s5889_s11 + $0x190] sm:$0xff] }
 0x2b4   : > { %8977 = vst [vmem:[#allocation39_spill] sm:$0xff] %v7038_v41 }
 0x2b5   : > { %1453 = vst.msk [vmem:[#allocation2 + $0x60] sm:$0xff] %vm448_vm1, %v1440_v47  ;;  %5304 = vset.pattern.permute.xlu2 %v8976_v59  ;;  %v7028_v63 = vpop.permute.xlu2 %2070  ;;  %v1790_v47 = vmul.f32 %v7038_v41, %v6791_v28  ;;  %v1609_v28 = vmul.f32 %v7047_v32, %v8982_v7  ;;  %v8770_v41 = vmov 18  }
 0x2b6   : > { %5303 = vset.pattern.permute.xlu1 %v8976_v59  ;;  %v7031_v54 = vpop.permute.xlu1 %2034  ;;  %2448 = vperm.xlu2 %5304, %v6436_v17   ;;  %v7044_v59 = vld [vmem:[%s5889_s11 + $0x60] sm:$0xff]  ;;  %v7049_v6 = vpop.permute.xlu0 %2074 }
 0x2b7   : > { %2444 = vperm.xlu1 %5303, %v6591_v3   ;;  %8978 = vst [vmem:[#allocation46_spill] sm:$0xff] %v7044_v59  ;;  %v1531_v52 = vmul.f32 %v6584_v53, %v7044_v59  ;;  %v1803_v34 = vadd.f32 %v1790_v47, %v1712_v50  ;;  %5310 = vset.pattern.permute.xlu0 %v8770_v41  ;;  %v8990_v41 = vld [vmem:[#allocation7_spill] sm:$0xff]  ;;  %v8992_v59 = vld [vmem:[#allocation10_spill] sm:$0xff] }
 0x2b8   : > { %2617 = vperm.xlu0 %5310, %v6436_v17   ;;  %v4962_v17 = vld [vmem:[%s8687_s2 + $0x30] sm:$0xff]  ;;  %v2086_v49 = vmul.f32 %v8992_v59, %v6937_v43 }
 0x2b9   : > { %4920 = vmatmul.msk.f32.gmra.mxu2 %vm844_vm0, %v1802_v14  ;;  %v7065_v14 = vld [vmem:[%s5889_s11 + $0x198] sm:$0xff] }
 0x2ba   : > { %8983 = vst [vmem:[#allocation48_spill] sm:$0xff] %v7065_v14  ;;  %v1791_v53 = vmul.f32 %v7065_v14, %v6861_v1 }
 0x2bd   : > { %v7051_v12 = vpop.permute.xlu2 %2082 }
 0x2be   : > { %8980 = vst [vmem:[#allocation40_spill] sm:$0xff] %v7051_v12  ;;  %v7056_v24 = vpop.permute.xlu1 %2046  ;;  %2460 = vperm.xlu2 %5304, %v6402_v45   ;;  %v1700_v12 = vmul.f32 %v7054_v33, %v8984_v13  ;;  %v1622_v45 = vadd.f32 %v1609_v28, %v1531_v52  ;;  %v2126_v50 = vpop.permute.xlu0 %2125  ;;  %v4963_v52 = vld [vmem:[%s8687_s2 + $0x38] sm:$0xff]  ;;  %v7126_v33 = vld [vmem:[%s5716_s4 + $0x20] sm:$0xff] }
 0x2bf   : > { %2456 = vperm.xlu1 %5303, %v6411_v57   ;;  %2362 = vmatpush.msra.mxu3 %v4963_v52  ;;  %v8987_v52 = vld [vmem:[#allocation5_spill] sm:$0xff]  ;;  %v2176_v14 = vmul.f32 %v8990_v41, %v2126_v50  ;;  %v8994_v41 = vld [vmem:[#allocation12_spill] sm:$0xff] }
 0x2c0   : > { %v1713_v7 = vadd.f32 %v1700_v12, %v1622_v45  ;;  %2637 = vperm.xlu0 %5310, %v6420_v29   ;;  %v1805_v12 = vld [vmem:[#allocation2] sm:$0xff] }
 0x2c1   : > { %4921 = vmatmul.msk.f32.gmra.mxu2 %vm844_vm0, %v1803_v34  ;;  %2363 = vmatpush.msra.mxu3 %v4962_v17  ;;  %v2085_v17 = vmul.f32 %v8987_v52, %v7031_v54  ;;  %v8991_v54 = vld [vmem:[#allocation11_spill] sm:$0xff] }
 0x2c2   : > { %v1804_v13 = vadd.f32 %v1791_v53, %v1713_v7  ;;  %v2008_v52 = vmul.f32 %v6830_v46, %v8991_v54 }
 0x2c4   : > { %v2099_v18 = vadd.f32 %v2086_v49, %v2008_v52  ;;  %v8995_v52 = vmov 18  }
 0x2c6   : > { %v7074_v47 = vpop.permute.xlu1 %2054  ;;  %2468 = vperm.xlu2 %5304, %v6420_v29   ;;  %v7077_v57 = vpop.permute.xlu2 %2133 }
 0x2c7   : > { %2464 = vperm.xlu1 %5303, %v6427_v20   ;;  %v7088_v1 = vpop.permute.xlu0 %2145 }
 0x2c8   : > { %2649 = vperm.xlu0 %5310, %v6448_v42  }
 0x2c9   : > { %4922 = vmatmul.msk.f32.gmra.mxu2 %vm844_vm0, %v1804_v13  ;;  %v8986_v13 = vmov 17  }
 0x2cd   : > { %v1877_v28 = vpop.f32.mrf.mxu2 }
 0x2ce   : > { %v1916_v34 = vadd.f32 %v1877_v28, %v1805_v12  ;;  %v7090_v20 = vpop.permute.xlu1 %2066  ;;  %2480 = vperm.xlu2 %5304, %v6448_v42   ;;  %v7093_v45 = vpop.permute.xlu2 %2141  ;;  %v7115_v12 = vld [vmem:[%s5716_s4 + $0x8] sm:$0xff] }
 0x2cf   : > { %2476 = vperm.xlu1 %5303, %v6455_v5   ;;  %v7103_v7 = vpop.permute.xlu0 %2157 }
 0x2d0   : > { %1929 = vst.msk [vmem:[#allocation2] sm:$0xff] %vm448_vm1, %v1916_v34  ;;  %2661 = vperm.xlu0 %5310, %v6473_v58  }
 0x2d6   : > { %v7098_v29 = vpop.permute.xlu1 %2078  ;;  %2492 = vperm.xlu2 %5304, %v6473_v58   ;;  %v7101_v53 = vpop.permute.xlu2 %2153  ;;  %v8989_v58 = vld [vmem:[#allocation6_spill] sm:$0xff] }
 0x2d7   : > { %8985 = vst [vmem:[#allocation43_spill] sm:$0xff] %v7098_v29  ;;  %2488 = vperm.xlu1 %5303, %v6480_v8   ;;  %v7118_v8 = vpop.permute.xlu0 %2169  ;;  %v2007_v28 = vmul.f32 %v6771_v39, %v8989_v58  ;;  %v8993_v29 = vld [vmem:[#allocation8_spill] sm:$0xff]  ;;  %v7135_v39 = vld [vmem:[%s5716_s4 + $0x18] sm:$0xff] }
 0x2d8   : > { %8988 = vst [vmem:[#allocation44_spill] sm:$0xff] %v7118_v8 }
 0x2d9   : > { %v2098_v34 = vadd.f32 %v2085_v17, %v2007_v28  ;;  %v8779_v28 = vmov 19  }
 0x2da   : > { %5314 = vset.pattern.permute.xlu0 %v8779_v28 }
 0x2db   : > { %v2189_v8 = vadd.f32 %v2176_v14, %v2098_v34  ;;  %2712 = vperm.xlu0 %5314, %v6504_v22   ;;  %v7147_v14 = vld [vmem:[%s5716_s4 + $0x30] sm:$0xff] }
 0x2de   : > { %5308 = vset.pattern.permute.xlu2 %v8986_v13  ;;  %v7108_v5 = vpop.permute.xlu2 %2165 }
 0x2df   : > { %5307 = vset.pattern.permute.xlu1 %v8986_v13  ;;  %v2130_v42 = vpop.permute.xlu1 %2129  ;;  %2530 = vperm.xlu2 %5308, %v6504_v22   ;;  %v2221_v58 = vpop.permute.xlu0 %2220 }
 0x2e0   : > { %2526 = vperm.xlu1 %5307, %v7115_v12   ;;  %v2177_v50 = vmul.f32 %v8994_v41, %v2130_v42  ;;  %v2268_v43 = vmul.f32 %v6738_v19, %v2221_v58  ;;  %v7159_v42 = vld [vmem:[%s5716_s4 + $0x48] sm:$0xff] }
 0x2e2   : > { %v2190_v46 = vadd.f32 %v2177_v50, %v2099_v18  ;;  %v7170_v50 = vld [vmem:[%s5716_s4 + $0x60] sm:$0xff] }
 0x2e3   : > { %2732 = vperm.xlu0 %5314, %v6542_v9  }
 0x2e7   : > { %v7123_v13 = vpop.permute.xlu1 %2137  ;;  %2538 = vperm.xlu2 %5308, %v7126_v33   ;;  %v2217_v32 = vpop.permute.xlu2 %2216 }
 0x2e8   : > { %v2267_v40 = vmul.f32 %v8993_v29, %v2217_v32  ;;  %2534 = vperm.xlu1 %5307, %v7135_v39   ;;  %v1806_v29 = vld [vmem:[#allocation2 + $0x8] sm:$0xff] }
 0x2ea   : > { %v2280_v17 = vadd.f32 %v2267_v40, %v2189_v8  ;;  %v2281_v40 = vadd.f32 %v2268_v43, %v2190_v46  ;;  %v1807_v8 = vld [vmem:[#allocation2 + $0x10] sm:$0xff]  ;;  %v1808_v46 = vld [vmem:[#allocation2 + $0x18] sm:$0xff] }
 0x2eb   : > { %2744 = vperm.xlu0 %5314, %v6564_v55  }
 0x2ec   : > { %4964 = vmatmul.msk.f32.vlgmr.msra.gmra.mxu3 %vm844_vm0, %v2280_v17  ;;  %v2009_v17 = vmul.f32 %v6899_v0, %v6744_v27  ;;  %v8998_v0 = vld [vmem:[#allocation15_spill] sm:$0xff] }
 0x2ef   : > { %v7143_v32 = vpop.permute.xlu1 %2149  ;;  %2550 = vperm.xlu2 %5308, %v6542_v9   ;;  %v2229_v59 = vpop.permute.xlu2 %2228 }
 0x2f0   : > { %2546 = vperm.xlu1 %5307, %v7147_v14  }
 0x2f4   : > { %v1880_v49 = vpop.f32.mrf.mxu2  ;;  %4965 = vmatmul.msk.f32.gmra.mxu3 %vm844_vm0, %v2281_v40  ;;  %v8997_v40 = vld [vmem:[#allocation14_spill] sm:$0xff] }
 0x2f5   : > { %v1917_v22 = vadd.f32 %v1880_v49, %v1806_v29  ;;  %v2178_v29 = vmul.f32 %v8997_v40, %v7077_v57  ;;  %v7180_v49 = vpop.permute.xlu0 %2240  ;;  %v8999_v57 = vld [vmem:[#allocation16_spill] sm:$0xff]  ;;  %v9000_v40 = vld [vmem:[#allocation17_spill] sm:$0xff] }
 0x2f7   : > { %1930 = vst.msk [vmem:[#allocation2 + $0x8] sm:$0xff] %vm448_vm1, %v1917_v22  ;;  %v7153_v19 = vpop.permute.xlu1 %2161  ;;  %2562 = vperm.xlu2 %5308, %v6564_v55   ;;  %v7156_v18 = vpop.permute.xlu2 %2236  ;;  %v8996_v55 = vld [vmem:[#allocation13_spill] sm:$0xff] }
 0x2f8   : > { %2558 = vperm.xlu1 %5307, %v7159_v42   ;;  %v2087_v58 = vmul.f32 %v8996_v55, %v6983_v37  ;;  %v7189_v55 = vld [vmem:[%s5716_s4 + $0x10] sm:$0xff] }
 0x2fc   : > { %v1883_v34 = vpop.f32.mrf.mxu2 }
 0x2fd   : > { %v1918_v54 = vadd.f32 %v1883_v34, %v1807_v8  ;;  %v2100_v8 = vadd.f32 %v2087_v58, %v2009_v17  ;;  %v2088_v17 = vmul.f32 %v8999_v57, %v7056_v24  ;;  %v7200_v28 = vpop.permute.xlu0 %2252 }
 0x2ff   : > { %1931 = vst.msk [vmem:[#allocation2 + $0x10] sm:$0xff] %vm448_vm1, %v1918_v54  ;;  %v7164_v9 = vpop.permute.xlu1 %2173  ;;  %5309 = vset.pattern.permute.xlu2 %v8995_v52  ;;  %v7167_v41 = vpop.permute.xlu2 %2248  ;;  %v2191_v27 = vadd.f32 %v2178_v29, %v2100_v8 }
 0x300   : > { %2570 = vperm.xlu1 %5307, %v7170_v50   ;;  %2613 = vperm.xlu2 %5309, %v6591_v3  }
 0x304   : > { %v1886_v43 = vpop.f32.mrf.mxu2 }
 0x305   : > { %v1919_v22 = vadd.f32 %v1886_v43, %v1808_v46  ;;  %v1809_v46 = vld [vmem:[#allocation2 + $0x20] sm:$0xff] }
 0x307   : > { %1932 = vst.msk [vmem:[#allocation2 + $0x18] sm:$0xff] %vm448_vm1, %v1919_v22  ;;  %v7183_v34 = vpop.permute.xlu2 %2260  ;;  %v2179_v22 = vmul.f32 %v9000_v40, %v7123_v13  ;;  %v9002_v13 = vld [vmem:[#allocation19_spill] sm:$0xff] }
 0x308   : > { %5311 = vset.pattern.permute.xlu1 %v8995_v52  ;;  %v2225_v54 = vpop.permute.xlu1 %2224  ;;  %2625 = vperm.xlu2 %5309, %v7135_v39   ;;  %v2010_v52 = vmul.f32 %v6800_v60, %v6776_v4  ;;  %v5530_v60 = vmov 20  }
 0x309   : > { %v2269_v37 = vmul.f32 %v8998_v0, %v2225_v54  ;;  %2621 = vperm.xlu1 %5311, %v7189_v55   ;;  %v9001_v54 = vld [vmem:[#allocation18_spill] sm:$0xff]  ;;  %5315 = vset.pattern.permute.xlu0 %v5530_v60 }
 0x30a   : > { %v2101_v8 = vadd.f32 %v2088_v17, %v2010_v52  ;;  %v2270_v0 = vmul.f32 %v9001_v54, %v2229_v59  ;;  %v2089_v59 = vmul.f32 %v9002_v13, %v6961_v10  ;;  %2932 = vperm.xlu0 %5315, %v6591_v3   ;;  %v1810_v17 = vld [vmem:[#allocation2 + $0x28] sm:$0xff]  ;;  %v2180_v52 = vmul.f32 %v6808_v36, %v7093_v45  ;;  %v7229_v36 = vpop.permute.xlu0 %2264  ;;  %v7232_v45 = vld [vmem:[%s5716_s4 + $0x38] sm:$0xff]  ;;  %v1811_v13 = vld [vmem:[#allocation2 + $0x30] sm:$0xff] }
 0x30b   : > { %v2282_v58 = vadd.f32 %v2269_v37, %v2191_v27  ;;  %v7204_v27 = vld [vmem:[%s5716_s4 + $0x28] sm:$0xff] }
 0x30c   : > { %v1889_v43 = vpop.f32.mrf.mxu2  ;;  %v2192_v4 = vadd.f32 %v2179_v22, %v2101_v8  ;;  %v7222_v8 = vld [vmem:[%s5716_s4 + $0x40] sm:$0xff] }
 0x30d   : > { %v1920_v29 = vadd.f32 %v1889_v43, %v1809_v46  ;;  %4966 = vmatmul.msk.f32.gmra.mxu3 %vm844_vm0, %v2282_v58  ;;  %v9003_v46 = vld [vmem:[#allocation20_spill] sm:$0xff] }
 0x30e   : > { %v2283_v57 = vadd.f32 %v2270_v0, %v2192_v4  ;;  %v2011_v43 = vmul.f32 %v6934_v30, %v9003_v46  ;;  %v2090_v30 = vmul.f32 %v6826_v61, %v7074_v47  ;;  %v9005_v0 = vld [vmem:[#allocation22_spill] sm:$0xff]  ;;  %v2181_v61 = vmul.f32 %v6833_v56, %v7088_v1 }
 0x30f   : > { %1933 = vst.msk [vmem:[#allocation2 + $0x20] sm:$0xff] %vm448_vm1, %v1920_v29  ;;  %v2091_v56 = vmul.f32 %v6859_v15, %v6994_v44  ;;  %v2273_v44 = vmul.f32 %v6880_v2, %v7180_v49  ;;  %v2092_v2 = vmul.f32 %v6886_v38, %v7017_v21  ;;  %v9011_v38 = vld [vmem:[#allocation27_spill] sm:$0xff] }
 0x310   : > { %v2233_v24 = vpop.permute.xlu1 %2232  ;;  %2633 = vperm.xlu2 %5309, %v7204_v27   ;;  %v7207_v37 = vpop.permute.xlu2 %2448  ;;  %v2102_v22 = vadd.f32 %v2089_v59, %v2011_v43  ;;  %v7247_v43 = vld [vmem:[%s5716_s4 + $0x58] sm:$0xff] }
 0x311   : > { %2629 = vperm.xlu1 %5311, %v7126_v33   ;;  %v2271_v29 = vmul.f32 %v6815_v16, %v2233_v24  ;;  %v9004_v16 = vld [vmem:[#allocation21_spill] sm:$0xff] }
 0x312   : > { %v2193_v54 = vadd.f32 %v2180_v52, %v2102_v22  ;;  %v2012_v24 = vmul.f32 %v9005_v0, %v9004_v16  ;;  %2952 = vperm.xlu0 %5315, %v7204_v27   ;;  %v1812_v0 = vld [vmem:[#allocation2 + $0x38] sm:$0xff] }
 0x314   : > { %v1892_v58 = vpop.f32.mrf.mxu2  ;;  %v2284_v4 = vadd.f32 %v2271_v29, %v2193_v54  ;;  %v7256_v29 = vpop.permute.xlu0 %2452 }
 0x315   : > { %v1921_v40 = vadd.f32 %v1892_v58, %v1810_v17  ;;  %4967 = vmatmul.msk.f32.gmra.mxu3 %vm844_vm0, %v2283_v57  ;;  %v2103_v57 = vadd.f32 %v2090_v30, %v2012_v24  ;;  %v9006_v17 = vld [vmem:[#allocation23_spill] sm:$0xff]  ;;  %v9008_v30 = vld [vmem:[#allocation30_spill] sm:$0xff] }
 0x316   : > { %v2272_v58 = vmul.f32 %v9006_v17, %v7156_v18  ;;  %v7259_v18 = vld [vmem:[%s5716_s4 + $0x50] sm:$0xff]  ;;  %v2182_v54 = vmul.f32 %v9008_v30, %v7143_v32  ;;  %v1813_v17 = vld [vmem:[#allocation2 + $0x40] sm:$0xff] }
 0x317   : > { %1934 = vst.msk [vmem:[#allocation2 + $0x28] sm:$0xff] %vm448_vm1, %v1921_v40  ;;  %v9007_v40 = vld [vmem:[#allocation28_spill] sm:$0xff]  ;;  %v2194_v1 = vadd.f32 %v2181_v61, %v2103_v57  ;;  %v7277_v57 = vld [vmem:[%s5716_s4] sm:$0xff]  ;;  %v2014_v61 = vmul.f32 %v6958_v23, %v6891_v35  ;;  %v2093_v23 = vmul.f32 %v9011_v38, %v7090_v20  ;;  %v2184_v20 = vmul.f32 %v6927_v31, %v7103_v7  ;;  %v9016_v7 = vld [vmem:[#allocation49_spill] sm:$0xff] }
 0x318   : > { %v2245_v10 = vpop.permute.xlu1 %2244  ;;  %2645 = vperm.xlu2 %5309, %v7222_v8   ;;  %v7225_v3 = vpop.permute.xlu2 %2460  ;;  %v2013_v22 = vmul.f32 %v9007_v40, %v6856_v11  ;;  %v2183_v40 = vmul.f32 %v6903_v26, %v7101_v53  ;;  %v9012_v26 = vld [vmem:[#allocation32_spill] sm:$0xff]  ;;  %v9013_v53 = vld [vmem:[#allocation25_spill] sm:$0xff] }
 0x319   : > { %2641 = vperm.xlu1 %5311, %v7232_v45   ;;  %v2285_v16 = vadd.f32 %v2272_v58, %v2194_v1  ;;  %v2274_v1 = vmul.f32 %v6912_v51, %v2245_v10  ;;  %v1814_v51 = vld [vmem:[#allocation2 + $0x48] sm:$0xff] }
 0x31a   : > { %2964 = vperm.xlu0 %5315, %v7222_v8   ;;  %v2104_v11 = vadd.f32 %v2091_v56, %v2013_v22  ;;  %v2105_v56 = vadd.f32 %v2092_v2, %v2014_v61  ;;  %v9015_v61 = vld [vmem:[#allocation31_spill] sm:$0xff] }
 0x31b   : > { %v2094_v2 = vmul.f32 %v9015_v61, %v7028_v63 }
 0x31c   : > { %v1895_v59 = vpop.f32.mrf.mxu2  ;;  %v2195_v15 = vadd.f32 %v2182_v54, %v2104_v11  ;;  %v2196_v21 = vadd.f32 %v2183_v40, %v2105_v56  ;;  %v2015_v54 = vmul.f32 %v9013_v53, %v9012_v26  ;;  %v2276_v56 = vmul.f32 %v6972_v48, %v7200_v28  ;;  %v9019_v53 = vld [vmem:[#allocation33_spill] sm:$0xff]  ;;  %v1816_v48 = vld [vmem:[#allocation2 + $0x58] sm:$0xff] }
 0x31d   : > { %v1922_v47 = vadd.f32 %v1895_v59, %v1811_v13  ;;  %4968 = vmatmul.msk.f32.gmra.mxu3 %vm844_vm0, %v2284_v4  ;;  %v9009_v13 = vmov 19  }
 0x31e   : > { %v2286_v49 = vadd.f32 %v2273_v44, %v2195_v15  ;;  %v2275_v15 = vmul.f32 %v6943_v25, %v7167_v41  ;;  %v9014_v44 = vld [vmem:[#allocation24_spill] sm:$0xff]  ;;  %v2185_v25 = vmul.f32 %v9016_v7, %v7153_v19  ;;  %v9025_v7 = vld [vmem:[#allocation35_spill] sm:$0xff] }
 0x31f   : > { %1935 = vst.msk [vmem:[#allocation2 + $0x30] sm:$0xff] %vm448_vm1, %v1922_v47  ;;  %v7284_v47 = vpop.permute.xlu0 %2472 }
 0x320   : > { %v7244_v46 = vpop.permute.xlu1 %2256  ;;  %2657 = vperm.xlu2 %5309, %v7247_v43   ;;  %v7250_v52 = vpop.permute.xlu2 %2468 }
 0x321   : > { %2653 = vperm.xlu1 %5311, %v7259_v18  }
 0x322   : > { %2976 = vperm.xlu0 %5315, %v7247_v43  }
 0x324   : > { %v1898_v24 = vpop.f32.mrf.mxu2 }
 0x325   : > { %v1923_v4 = vadd.f32 %v1898_v24, %v1812_v0  ;;  %4969 = vmatmul.msk.f32.gmra.mxu3 %vm844_vm0, %v2285_v16  ;;  %v2287_v16 = vadd.f32 %v2274_v1, %v2196_v21  ;;  %v5531_v0 = vmov 21   ;;  %v2106_v24 = vadd.f32 %v2093_v23, %v2015_v54  ;;  %v9017_v23 = vld [vmem:[#allocation34_spill] sm:$0xff]  ;;  %v9018_v21 = vld [vmem:[#allocation37_spill] sm:$0xff] }
 0x326   : > { %v2017_v26 = vmul.f32 %v9018_v21, %v9017_v23  ;;  %v2095_v54 = vmul.f32 %v9019_v53, %v7049_v6  ;;  %v9022_v6 = vld [vmem:[#allocation43_spill] sm:$0xff]  ;;  %v9030_v53 = vld [vmem:[#allocation46_spill] sm:$0xff] }
 0x327   : > { %1936 = vst.msk [vmem:[#allocation2 + $0x38] sm:$0xff] %vm448_vm1, %v1923_v4  ;;  %v7306_v11 = vpop.permute.xlu0 %2484  ;;  %v9029_v21 = vld [vmem:[#allocation39_spill] sm:$0xff] }
 0x328   : > { %5313 = vset.pattern.permute.xlu2 %v9009_v13  ;;  %v7270_v59 = vpop.permute.xlu2 %2480 }
 0x329   : > { %5312 = vset.pattern.permute.xlu1 %v9009_v13  ;;  %v7273_v32 = vpop.permute.xlu1 %2444  ;;  %2708 = vperm.xlu2 %5313, %v7115_v12   ;;  %v2016_v13 = vmul.f32 %v9014_v44, %v6952_v62 }
 0x32a   : > { %2704 = vperm.xlu1 %5312, %v7277_v57   ;;  %5319 = vset.pattern.permute.xlu0 %v5531_v0 }
 0x32b   : > { %3014 = vperm.xlu0 %5319, %v7115_v12   ;;  %v2107_v62 = vadd.f32 %v2094_v2, %v2016_v13  ;;  %v9023_v13 = vld [vmem:[#allocation47_spill] sm:$0xff] }
 0x32c   : > { %v1901_v58 = vpop.f32.mrf.mxu2  ;;  %v2096_v61 = vmul.f32 %v9023_v13, %v9022_v6 }
 0x32d   : > { %v1924_v22 = vadd.f32 %v1901_v58, %v1813_v17  ;;  %4970 = vmatmul.msk.f32.gmra.mxu3 %vm844_vm0, %v2286_v49  ;;  %v2197_v49 = vadd.f32 %v2184_v20, %v2106_v24  ;;  %v1815_v58 = vld [vmem:[#allocation2 + $0x50] sm:$0xff]  ;;  %v2198_v63 = vadd.f32 %v2185_v25, %v2107_v62  ;;  %v2108_v20 = vadd.f32 %v2095_v54, %v2017_v26  ;;  %v9031_v54 = vld [vmem:[#allocation42_spill] sm:$0xff] }
 0x32e   : > { %v9026_v25 = vld [vmem:[#allocation29_spill] sm:$0xff]  ;;  %v2278_v26 = vmul.f32 %v9029_v21, %v7183_v34  ;;  %v9034_v34 = vld [vmem:[#allocation26_spill] sm:$0xff] }
 0x32f   : > { %1937 = vst.msk [vmem:[#allocation2 + $0x40] sm:$0xff] %vm448_vm1, %v1924_v22  ;;  %v2288_v41 = vadd.f32 %v2275_v15, %v2197_v49  ;;  %v7328_v1 = vpop.permute.xlu0 %2522 }
 0x330   : > { %v7292_v35 = vpop.permute.xlu2 %2492 }
 0x331   : > { %9010 = vst [vmem:[#allocation4_spill] sm:$0xff] %v7292_v35  ;;  %v7296_v30 = vpop.permute.xlu1 %2456  ;;  %2720 = vperm.xlu2 %5313, %v7126_v33  }
 0x332   : > { %2716 = vperm.xlu1 %5312, %v7135_v39  }
 0x333   : > { %3034 = vperm.xlu0 %5319, %v7147_v14  }
 0x334   : > { %v1904_v10 = vpop.f32.mrf.mxu2 }
 0x335   : > { %v1925_v4 = vadd.f32 %v1904_v10, %v1814_v51  ;;  %4971 = vmatmul.msk.f32.gmra.mxu3 %vm844_vm0, %v2287_v16  ;;  %v2289_v16 = vadd.f32 %v2276_v56, %v2198_v63  ;;  %v9020_v51 = vld [vmem:[#allocation36_spill] sm:$0xff]  ;;  %v9028_v63 = vld [vmem:[#allocation38_spill] sm:$0xff] }
 0x336   : > { %v2186_v10 = vmul.f32 %v9020_v51, %v7108_v5 }
 0x337   : > { %1938 = vst.msk [vmem:[#allocation2 + $0x48] sm:$0xff] %vm448_vm1, %v1925_v4  ;;  %v9021_v4 = vld [vmem:[#allocation45_spill] sm:$0xff]  ;;  %v7347_v44 = vpop.permute.xlu0 %2542 }
 0x338   : > { %v2277_v15 = vmul.f32 %v9021_v4, %v7244_v46  ;;  %v2199_v2 = vadd.f32 %v2186_v10, %v2108_v20 }
 0x339   : > { %v7316_v17 = vpop.permute.xlu1 %2464  ;;  %2728 = vperm.xlu2 %5313, %v7147_v14   ;;  %v7319_v31 = vpop.permute.xlu2 %2530 }
 0x33a   : > { %2724 = vperm.xlu1 %5312, %v7204_v27   ;;  %v2290_v46 = vadd.f32 %v2277_v15, %v2199_v2  ;;  %v2188_v15 = vmul.f32 %v9034_v34, %v7164_v9  ;;  %v9035_v2 = vld [vmem:[#allocation48_spill] sm:$0xff]  ;;  %v8783_v9 = vmov 22  }
 0x33b   : > { %3046 = vperm.xlu0 %5319, %v7159_v42   ;;  %v5017_v34 = vld [vmem:[%s8687_s2 + $0x48] sm:$0xff] }
 0x33c   : > { %v1907_v40 = vpop.f32.mrf.mxu2  ;;  %2850 = vmatpush.msrb.mxu0 %v5017_v34  ;;  %v7466_v34 = vld [vmem:[%s5889_s11] sm:$0xff] }
 0x33d   : > { %v1926_v22 = vadd.f32 %v1907_v40, %v1815_v58  ;;  %4972 = vmatmul.msk.f32.gmra.mxu3 %vm844_vm0, %v2288_v41  ;;  %v2018_v41 = vmul.f32 %v9026_v25, %v9025_v7  ;;  %v1817_v58 = vld [vmem:[#allocation2 + $0x60] sm:$0xff]  ;;  %v2279_v7 = vmul.f32 %v9035_v2, %v7229_v36  ;;  %9041 = vst [vmem:[#allocation8_spill] sm:$0xff] %v7466_v34 }
 0x33f   : > { %1939 = vst.msk [vmem:[#allocation2 + $0x50] sm:$0xff] %vm448_vm1, %v1926_v22  ;;  %v2109_v62 = vadd.f32 %v2096_v61, %v2018_v41  ;;  %v9027_v22 = vld [vmem:[#allocation44_spill] sm:$0xff] }
 0x340   : > { %v2187_v56 = vmul.f32 %v9028_v63, %v9027_v22 }
 0x341   : > { %v7331_v38 = vpop.permute.xlu1 %2476  ;;  %2740 = vperm.xlu2 %5313, %v7159_v42   ;;  %v7334_v19 = vpop.permute.xlu2 %2538 }
 0x342   : > { %2736 = vperm.xlu1 %5312, %v7222_v8   ;;  %v2200_v10 = vadd.f32 %v2187_v56, %v2109_v62  ;;  %v2293_v56 = vld [vmem:[#allocation2] sm:$0xff] }
 0x343   : > { %3058 = vperm.xlu0 %5319, %v7170_v50  }
 0x344   : > { %v1910_v28 = vpop.f32.mrf.mxu2  ;;  %v2291_v6 = vadd.f32 %v2278_v26, %v2200_v10 }
 0x345   : > { %v1927_v24 = vadd.f32 %v1910_v28, %v1816_v48  ;;  %4973 = vmatmul.msk.f32.gmra.mxu3 %vm844_vm0, %v2289_v16  ;;  %v2019_v16 = vmul.f32 %v9031_v54, %v9030_v53  ;;  %v9032_v48 = vld [vmem:[#allocation40_spill] sm:$0xff]  ;;  %v9033_v28 = vld [vmem:[#allocation41_spill] sm:$0xff] }
 0x346   : > { %v2097_v51 = vmul.f32 %v9033_v28, %v9032_v48 }
 0x347   : > { %1940 = vst.msk [vmem:[#allocation2 + $0x58] sm:$0xff] %vm448_vm1, %v1927_v24  ;;  %v7371_v24 = vpop.permute.xlu0 %2554 }
 0x348   : > { %v2110_v13 = vadd.f32 %v2097_v51, %v2019_v16  ;;  %v2294_v16 = vld [vmem:[#allocation2 + $0x8] sm:$0xff] }
 0x349   : > { %v7352_v49 = vpop.permute.xlu1 %2488  ;;  %2752 = vperm.xlu2 %5313, %v7170_v50   ;;  %v7355_v5 = vpop.permute.xlu2 %2550 }
 0x34a   : > { %9024 = vst [vmem:[#allocation9_spill] sm:$0xff] %v7352_v49  ;;  %2748 = vperm.xlu1 %5312, %v7247_v43   ;;  %v2201_v61 = vadd.f32 %v2188_v15, %v2110_v13 }
 0x34b   : > { %5323 = vset.pattern.permute.xlu0 %v8783_v9 }
 0x34c   : > { %v1913_v40 = vpop.f32.mrf.mxu2  ;;  %v2292_v41 = vadd.f32 %v2279_v7, %v2201_v61  ;;  %3109 = vperm.xlu0 %5323, %v7189_v55  }
 0x34d   : > { %v1928_v23 = vadd.f32 %v1913_v40, %v1817_v58  ;;  %4974 = vmatmul.msk.f32.gmra.mxu3 %vm844_vm0, %v2290_v46 }
 0x34f   : > { %1941 = vst.msk [vmem:[#allocation2 + $0x60] sm:$0xff] %vm448_vm1, %v1928_v23  ;;  %v7391_v46 = vpop.permute.xlu0 %2566 }
 0x350   : > { %9036 = vst [vmem:[#allocation5_spill] sm:$0xff] %v7391_v46 }
 0x351   : > { %5317 = vset.pattern.permute.xlu2 %v5530_v60  ;;  %v7374_v20 = vpop.permute.xlu2 %2562 }
 0x352   : > { %5316 = vset.pattern.permute.xlu1 %v5530_v60  ;;  %v7377_v4 = vpop.permute.xlu1 %2526  ;;  %2940 = vperm.xlu2 %5317, %v7189_v55  }
 0x353   : > { %2936 = vperm.xlu1 %5316, %v7115_v12  }
 0x354   : > { %3129 = vperm.xlu0 %5323, %v7232_v45  }
 0x355   : > { %4975 = vmatmul.msk.f32.gmra.mxu3 %vm844_vm0, %v2291_v6  ;;  %v8781_v6 = vmov 23  }
 0x357   : > { %v7402_v40 = vpop.permute.xlu0 %2617 }
 0x35a   : > { %v7386_v25 = vpop.permute.xlu1 %2534  ;;  %2948 = vperm.xlu2 %5317, %v7126_v33   ;;  %v7389_v60 = vpop.permute.xlu2 %2613 }
 0x35b   : > { %2944 = vperm.xlu1 %5316, %v7135_v39  }
 0x35c   : > { %3141 = vperm.xlu0 %5323, %v7259_v18  }
 0x35d   : > { %4976 = vmatmul.msk.f32.gmra.mxu3 %vm844_vm0, %v2292_v41 }
 0x35f   : > { %v7411_v63 = vpop.permute.xlu0 %2637 }
 0x362   : > { %v7397_v58 = vpop.permute.xlu1 %2546  ;;  %2960 = vperm.xlu2 %5317, %v7232_v45   ;;  %v7400_v36 = vpop.permute.xlu2 %2625 }
 0x363   : > { %2956 = vperm.xlu1 %5316, %v7147_v14  }
 0x364   : > { %5324 = vset.pattern.permute.xlu0 %v8781_v6  ;;  %v7473_v6 = vld [vmem:[%s5889_s11 + $0xd0] sm:$0xff] }
 0x365   : > { %3192 = vperm.xlu0 %5324, %v7277_v57   ;;  %9043 = vst [vmem:[#allocation13_spill] sm:$0xff] %v7473_v6 }
 0x367   : > { %v7423_v54 = vpop.permute.xlu0 %2649 }
 0x36a   : > { %v7406_v62 = vpop.permute.xlu1 %2558  ;;  %2972 = vperm.xlu2 %5317, %v7259_v18   ;;  %v7409_v22 = vpop.permute.xlu2 %2633 }
 0x36b   : > { %2968 = vperm.xlu1 %5316, %v7159_v42  }
 0x36d   : > { %3212 = vperm.xlu0 %5324, %v7204_v27  }
 0x36f   : > { %v2365_v23 = vpop.f32.mrf.mxu3  ;;  %v7436_v15 = vpop.permute.xlu0 %2661 }
 0x370   : > { %v2404_v21 = vadd.f32 %v2365_v23, %v2293_v56  ;;  %9039 = vst [vmem:[#allocation11_spill] sm:$0xff] %v7436_v15  ;;  %v2295_v56 = vld [vmem:[#allocation2 + $0x10] sm:$0xff]  ;;  %v2664_v15 = vmul.f32 %v7473_v6, %v7389_v60  ;;  %v7509_v6 = vld [vmem:[%s5889_s11 + $0x140] sm:$0xff] }
 0x371   : > { %9049 = vst [vmem:[#allocation18_spill] sm:$0xff] %v7509_v6 }
 0x372   : > { %2417 = vst.msk [vmem:[#allocation2] sm:$0xff] %vm448_vm1, %v2404_v21  ;;  %v7416_v26 = vpop.permute.xlu1 %2570  ;;  %5318 = vset.pattern.permute.xlu2 %v5531_v0  ;;  %v7419_v53 = vpop.permute.xlu2 %2645 }
 0x373   : > { %9037 = vst [vmem:[#allocation6_spill] sm:$0xff] %v7416_v26  ;;  %2980 = vperm.xlu1 %5316, %v7170_v50   ;;  %3010 = vperm.xlu2 %5318, %v7277_v57   ;;  %v7483_v26 = vld [vmem:[%s5889_s11 + $0x70] sm:$0xff] }
 0x374   : > { %9044 = vst [vmem:[#allocation14_spill] sm:$0xff] %v7483_v26 }
 0x375   : > { %3224 = vperm.xlu0 %5324, %v7222_v8  }
 0x377   : > { %v2368_v48 = vpop.f32.mrf.mxu3  ;;  %v7448_v2 = vpop.permute.xlu0 %2712 }
 0x378   : > { %v2405_v28 = vadd.f32 %v2368_v48, %v2294_v16 }
 0x37a   : > { %2418 = vst.msk [vmem:[#allocation2 + $0x8] sm:$0xff] %vm448_vm1, %v2405_v28  ;;  %v7426_v51 = vpop.permute.xlu2 %2657 }
 0x37b   : > { %9038 = vst [vmem:[#allocation7_spill] sm:$0xff] %v7426_v51  ;;  %5320 = vset.pattern.permute.xlu1 %v5531_v0  ;;  %v7429_v10 = vpop.permute.xlu1 %2621  ;;  %3022 = vperm.xlu2 %5318, %v7135_v39   ;;  %v5016_v0 = vld [vmem:[%s8687_s2 + $0x40] sm:$0xff] }
 0x37c   : > { %3018 = vperm.xlu1 %5320, %v7189_v55   ;;  %2851 = vmatpush.msrb.mxu0 %v5016_v0  ;;  %v7469_v0 = vld [vmem:[%s5889_s11 + $0x68] sm:$0xff]  ;;  %v7486_v51 = vld [vmem:[%s5889_s11 + $0x138] sm:$0xff] }
 0x37d   : > { %9042 = vst [vmem:[#allocation12_spill] sm:$0xff] %v7469_v0  ;;  %3236 = vperm.xlu0 %5324, %v7247_v43  }
 0x37f   : > { %v7457_v21 = vpop.permute.xlu0 %2732 }
 0x383   : > { %v7443_v13 = vpop.permute.xlu1 %2629  ;;  %3030 = vperm.xlu2 %5318, %v7204_v27   ;;  %v2709_v61 = vpop.permute.xlu2 %2708 }
 0x384   : > { %3026 = vperm.xlu1 %5320, %v7126_v33  }
 0x387   : > { %v7488_v49 = vpop.permute.xlu0 %2744 }
 0x388   : > { %9045 = vst [vmem:[#allocation15_spill] sm:$0xff] %v7488_v49 }
 0x38b   : > { %v7450_v7 = vpop.permute.xlu1 %2641  ;;  %3042 = vperm.xlu2 %5318, %v7222_v8   ;;  %v7453_v41 = vpop.permute.xlu2 %2720 }
 0x38c   : > { %3038 = vperm.xlu1 %5320, %v7232_v45  }
 0x390   : > { %v2371_v23 = vpop.f32.mrf.mxu3 }
 0x391   : > { %v2406_v16 = vadd.f32 %v2371_v23, %v2295_v56  ;;  %v2495_v56 = vmul.f32 %v7273_v32, %v7466_v34  ;;  %v2573_v23 = vmul.f32 %v7469_v0, %v7328_v1  ;;  %v9046_v32 = vmov 22   ;;  %v7495_v0 = vld [vmem:[%s5889_s11 + $0x8] sm:$0xff]  ;;  %v2297_v34 = vld [vmem:[#allocation2 + $0x20] sm:$0xff] }
 0x392   : > { %9047 = vst [vmem:[#allocation16_spill] sm:$0xff] %v7495_v0 }
 0x393   : > { %2419 = vst.msk [vmem:[#allocation2 + $0x10] sm:$0xff] %vm448_vm1, %v2406_v16  ;;  %v7460_v48 = vpop.permute.xlu1 %2653  ;;  %3054 = vperm.xlu2 %5318, %v7247_v43   ;;  %v7463_v28 = vpop.permute.xlu2 %2728  ;;  %v2296_v16 = vld [vmem:[#allocation2 + $0x18] sm:$0xff]  ;;  %v2586_v46 = vadd.f32 %v2573_v23, %v2495_v56 }
 0x394   : > { %9040 = vst [vmem:[#allocation10_spill] sm:$0xff] %v7460_v48  ;;  %3050 = vperm.xlu1 %5320, %v7259_v18  }
 0x395   : > { %v2677_v56 = vadd.f32 %v2664_v15, %v2586_v46  ;;  %v7515_v15 = vld [vmem:[%s5889_s11 + $0x10] sm:$0xff] }
 0x398   : > { %v2374_v9 = vpop.f32.mrf.mxu3 }
 0x399   : > { %v2407_v35 = vadd.f32 %v2374_v9, %v2296_v16  ;;  %v2574_v9 = vmul.f32 %v7483_v26, %v7377_v4  ;;  %v2496_v16 = vmul.f32 %v7207_v37, %v7495_v0  ;;  %v2756_v26 = vmul.f32 %v7509_v6, %v2709_v61  ;;  %v7522_v37 = vpop.permute.xlu0 %2932 }
 0x39b   : > { %2420 = vst.msk [vmem:[#allocation2 + $0x18] sm:$0xff] %vm448_vm1, %v2407_v35  ;;  %5322 = vset.pattern.permute.xlu2 %v9046_v32  ;;  %v7492_v1 = vpop.permute.xlu2 %2740  ;;  %v7504_v35 = vld [vmem:[%s5889_s11 + $0xd8] sm:$0xff]  ;;  %v2587_v48 = vadd.f32 %v2574_v9, %v2496_v16 }
 0x39c   : > { %5321 = vset.pattern.permute.xlu1 %v9046_v32  ;;  %v2705_v60 = vpop.permute.xlu1 %2704  ;;  %3105 = vperm.xlu2 %5322, %v7115_v12   ;;  %9048 = vst [vmem:[#allocation17_spill] sm:$0xff] %v7504_v35  ;;  %v2665_v4 = vmul.f32 %v7504_v35, %v7402_v40 }
 0x39d   : > { %v2755_v23 = vmul.f32 %v7486_v51, %v2705_v60  ;;  %3101 = vperm.xlu1 %5321, %v7277_v57   ;;  %v7518_v60 = vld [vmem:[%s5889_s11 + $0x78] sm:$0xff] }
 0x39e   : > { %v2575_v40 = vmul.f32 %v7518_v60, %v7319_v31 }
 0x39f   : > { %v2768_v32 = vadd.f32 %v2755_v23, %v2677_v56  ;;  %v7525_v56 = vld [vmem:[%s5889_s11 + $0xe0] sm:$0xff] }
 0x3a0   : > { %v2377_v49 = vpop.f32.mrf.mxu3  ;;  %v2666_v61 = vmul.f32 %v7525_v56, %v7429_v10 }
 0x3a1   : > { %v2408_v46 = vadd.f32 %v2377_v49, %v2297_v34  ;;  %5018 = vmatmul.msk.f32.vlgmr.msrb.gmra.mxu0 %vm844_vm0, %v2768_v32  ;;  %v2497_v49 = vmul.f32 %v7256_v29, %v7515_v15  ;;  %v2678_v34 = vadd.f32 %v2665_v4, %v2587_v48  ;;  %v7538_v32 = vld [vmem:[%s5889_s11 + $0x148] sm:$0xff]  ;;  %v7545_v48 = vld [vmem:[%s5889_s11 + $0x80] sm:$0xff] }
 0x3a2   : > { %9050 = vst [vmem:[#allocation19_spill] sm:$0xff] %v7538_v32  ;;  %v2757_v31 = vmul.f32 %v7538_v32, %v7448_v2  ;;  %v7557_v4 = vld [vmem:[%s5889_s11 + $0xe8] sm:$0xff]  ;;  %v8792_v2 = vmov 24  }
 0x3a3   : > { %2421 = vst.msk [vmem:[#allocation2 + $0x20] sm:$0xff] %vm448_vm1, %v2408_v46  ;;  %v7527_v9 = vpop.permute.xlu2 %2752  ;;  %v2769_v16 = vadd.f32 %v2756_v26, %v2678_v34  ;;  %v2298_v46 = vld [vmem:[#allocation2 + $0x28] sm:$0xff]  ;;  %v2588_v35 = vadd.f32 %v2575_v40, %v2497_v49  ;;  %5328 = vset.pattern.permute.xlu0 %v8792_v2  ;;  %v7566_v40 = vld [vmem:[%s5889_s11 + $0x150] sm:$0xff]  ;;  %v2299_v34 = vld [vmem:[#allocation2 + $0x30] sm:$0xff] }
 0x3a4   : > { %v2717_v23 = vpop.permute.xlu1 %2716  ;;  %3117 = vperm.xlu2 %5322, %v7126_v33   ;;  %9051 = vst [vmem:[#allocation20_spill] sm:$0xff] %v7545_v48  ;;  %3424 = vperm.xlu0 %5328, %v7115_v12  }
 0x3a5   : > { %3113 = vperm.xlu1 %5321, %v7135_v39   ;;  %v2679_v29 = vadd.f32 %v2666_v61, %v2588_v35  ;;  %9053 = vst [vmem:[#allocation22_spill] sm:$0xff] %v7557_v4  ;;  %v7559_v35 = vpop.permute.xlu0 %2952 }
 0x3a6   : > { %9054 = vst [vmem:[#allocation23_spill] sm:$0xff] %v7559_v35 }
 0x3a7   : > { %v2770_v49 = vadd.f32 %v2757_v31, %v2679_v29  ;;  %9055 = vst [vmem:[#allocation28_spill] sm:$0xff] %v7566_v40  ;;  %v2758_v29 = vmul.f32 %v7566_v40, %v2717_v23  ;;  %v7576_v31 = vld [vmem:[%s5889_s11 + $0x88] sm:$0xff] }
 0x3a8   : > { %v2380_v6 = vpop.f32.mrf.mxu3  ;;  %9056 = vst [vmem:[#allocation30_spill] sm:$0xff] %v7576_v31  ;;  %v2577_v23 = vmul.f32 %v7576_v31, %v7334_v19  ;;  %v7610_v31 = vld [vmem:[%s5889_s11 + $0x90] sm:$0xff] }
 0x3a9   : > { %v2409_v0 = vadd.f32 %v2380_v6, %v2298_v46  ;;  %5019 = vmatmul.msk.f32.gmra.mxu0 %vm844_vm0, %v2769_v16  ;;  %v7554_v6 = vld [vmem:[%s5889_s11 + $0x18] sm:$0xff]  ;;  %v2667_v46 = vmul.f32 %v7557_v4, %v7400_v36  ;;  %v7585_v36 = vld [vmem:[%s5889_s11 + $0x20] sm:$0xff]  ;;  %9062 = vst [vmem:[#allocation49_spill] sm:$0xff] %v7610_v31  ;;  %v8814_v4 = vmov 26  }
 0x3aa   : > { %9052 = vst [vmem:[#allocation21_spill] sm:$0xff] %v7554_v6  ;;  %v2498_v16 = vmul.f32 %v7296_v30, %v7554_v6 }
 0x3ab   : > { %2422 = vst.msk [vmem:[#allocation2 + $0x28] sm:$0xff] %vm448_vm1, %v2409_v0  ;;  %v2576_v0 = vmul.f32 %v7545_v48, %v7386_v25 }
 0x3ac   : > { %v7547_v10 = vpop.permute.xlu1 %2724  ;;  %3125 = vperm.xlu2 %5322, %v7147_v14   ;;  %v7550_v26 = vpop.permute.xlu2 %2940  ;;  %9058 = vst [vmem:[#allocation32_spill] sm:$0xff] %v7585_v36  ;;  %3444 = vperm.xlu0 %5328, %v7147_v14  }
 0x3ad   : > { %3121 = vperm.xlu1 %5321, %v7204_v27   ;;  %v2589_v25 = vadd.f32 %v2576_v0, %v2498_v16  ;;  %v7594_v0 = vld [vmem:[%s5889_s11 + $0x158] sm:$0xff] }
 0x3ae   : > { %9060 = vst [vmem:[#allocation24_spill] sm:$0xff] %v7594_v0 }
 0x3af   : > { %v2680_v30 = vadd.f32 %v2667_v46, %v2589_v25  ;;  %v2499_v46 = vmul.f32 %v7225_v3, %v7585_v36  ;;  %v7824_v36 = vld [vmem:[%s5889_s11 + $0xc8] sm:$0xff] }
 0x3b0   : > { %v2383_v61 = vpop.f32.mrf.mxu3 }
 0x3b1   : > { %v2410_v35 = vadd.f32 %v2383_v61, %v2299_v34  ;;  %5020 = vmatmul.msk.f32.gmra.mxu0 %vm844_vm0, %v2770_v49  ;;  %v7588_v49 = vld [vmem:[%s5889_s11 + $0xf0] sm:$0xff]  ;;  %v7596_v34 = vpop.permute.xlu0 %2964  ;;  %v2590_v19 = vadd.f32 %v2577_v23, %v2499_v46  ;;  %v7619_v23 = vld [vmem:[%s5889_s11 + $0xf8] sm:$0xff] }
 0x3b2   : > { %9059 = vst [vmem:[#allocation25_spill] sm:$0xff] %v7588_v49  ;;  %v2300_v61 = vld [vmem:[#allocation2 + $0x38] sm:$0xff]  ;;  %v2668_v25 = vmul.f32 %v7588_v49, %v7443_v13 }
 0x3b3   : > { %2423 = vst.msk [vmem:[#allocation2 + $0x30] sm:$0xff] %vm448_vm1, %v2410_v35  ;;  %v2771_v35 = vadd.f32 %v2758_v29, %v2680_v30  ;;  %v2759_v29 = vmul.f32 %v7594_v0, %v7453_v41  ;;  %v7607_v30 = vld [vmem:[%s5889_s11 + $0x28] sm:$0xff]  ;;  %v9083_v0 = vld [vmem:[#allocation7_spill] sm:$0xff] }
 0x3b4   : > { %v7578_v2 = vpop.permute.xlu1 %2736  ;;  %3137 = vperm.xlu2 %5322, %v7159_v42   ;;  %v7581_v48 = vpop.permute.xlu2 %2948  ;;  %9061 = vst [vmem:[#allocation31_spill] sm:$0xff] %v7607_v30  ;;  %v2681_v13 = vadd.f32 %v2668_v25, %v2590_v19  ;;  %v2500_v41 = vmul.f32 %v7316_v17, %v7607_v30  ;;  %3456 = vperm.xlu0 %5328, %v7159_v42  }
 0x3b5   : > { %9057 = vst [vmem:[#allocation27_spill] sm:$0xff] %v7581_v48  ;;  %3133 = vperm.xlu1 %5321, %v7222_v8   ;;  %v2669_v25 = vmul.f32 %v7619_v23, %v7409_v22 }
 0x3b6   : > { %9064 = vst [vmem:[#allocation37_spill] sm:$0xff] %v7619_v23  ;;  %v7666_v23 = vld [vmem:[%s5889_s11 + $0x38] sm:$0xff] }
 0x3b7   : > { %9068 = vst [vmem:[#allocation45_spill] sm:$0xff] %v7666_v23 }
 0x3b8   : > { %v2386_v16 = vpop.f32.mrf.mxu3 }
 0x3b9   : > { %v2411_v48 = vadd.f32 %v2386_v16, %v2300_v61  ;;  %5021 = vmatmul.msk.f32.gmra.mxu0 %vm844_vm0, %v2771_v35  ;;  %v2772_v35 = vadd.f32 %v2759_v29, %v2681_v13  ;;  %v7627_v61 = vld [vmem:[%s5889_s11 + $0x160] sm:$0xff]  ;;  %v2301_v16 = vld [vmem:[#allocation2 + $0x40] sm:$0xff]  ;;  %v7635_v17 = vpop.permute.xlu0 %2976  ;;  %v7641_v29 = vld [vmem:[%s5889_s11 + $0x30] sm:$0xff]  ;;  %v9066_v13 = vmov 23  }
 0x3ba   : > { %9065 = vst [vmem:[#allocation33_spill] sm:$0xff] %v7627_v61 }
 0x3bb   : > { %2424 = vst.msk [vmem:[#allocation2 + $0x38] sm:$0xff] %vm448_vm1, %v2411_v48  ;;  %v2578_v48 = vmul.f32 %v7610_v31, %v7347_v44  ;;  %v2760_v44 = vmul.f32 %v7627_v61, %v7547_v10  ;;  %v7653_v10 = vld [vmem:[%s5889_s11 + $0x100] sm:$0xff] }
 0x3bc   : > { %v7612_v40 = vpop.permute.xlu1 %2748  ;;  %3149 = vperm.xlu2 %5322, %v7170_v50   ;;  %v7615_v3 = vpop.permute.xlu2 %2960  ;;  %3468 = vperm.xlu0 %5328, %v7170_v50   ;;  %v7796_v31 = vld [vmem:[%s5889_s11 + $0xc0] sm:$0xff] }
 0x3bd   : > { %9063 = vst [vmem:[#allocation34_spill] sm:$0xff] %v7615_v3  ;;  %3145 = vperm.xlu1 %5321, %v7247_v43   ;;  %v7633_v3 = vld [vmem:[%s5889_s11 + $0x98] sm:$0xff]  ;;  %v2591_v30 = vadd.f32 %v2578_v48, %v2500_v41  ;;  %v2501_v48 = vmul.f32 %v7250_v52, %v7641_v29 }
 0x3c0   : > { %v2389_v46 = vpop.f32.mrf.mxu3 }
 0x3c1   : > { %v2412_v19 = vadd.f32 %v2389_v46, %v2301_v16  ;;  %5022 = vmatmul.msk.f32.gmra.mxu0 %vm844_vm0, %v2772_v35  ;;  %v2579_v35 = vmul.f32 %v7633_v3, %v7397_v58  ;;  %v2682_v16 = vadd.f32 %v2669_v25, %v2591_v30  ;;  %v7660_v58 = vld [vmem:[%s5889_s11 + $0x168] sm:$0xff]  ;;  %v2302_v30 = vld [vmem:[#allocation2 + $0x48] sm:$0xff] }
 0x3c2   : > { %9067 = vst [vmem:[#allocation36_spill] sm:$0xff] %v7660_v58  ;;  %v2761_v52 = vmul.f32 %v7660_v58, %v7463_v28 }
 0x3c3   : > { %2425 = vst.msk [vmem:[#allocation2 + $0x40] sm:$0xff] %vm448_vm1, %v2412_v19  ;;  %v2773_v46 = vadd.f32 %v2760_v44, %v2682_v16  ;;  %v2592_v19 = vadd.f32 %v2579_v35, %v2501_v48  ;;  %v7675_v44 = vld [vmem:[%s5889_s11 + $0x108] sm:$0xff]  ;;  %v7677_v16 = vpop.permute.xlu0 %3014 }
 0x3c4   : > { %5326 = vset.pattern.permute.xlu2 %v9066_v13  ;;  %v7644_v22 = vpop.permute.xlu2 %2972  ;;  %9070 = vst [vmem:[#allocation47_spill] sm:$0xff] %v7675_v44  ;;  %v2671_v28 = vmul.f32 %v7675_v44, %v7450_v7 }
 0x3c5   : > { %5325 = vset.pattern.permute.xlu1 %v9066_v13  ;;  %v7649_v41 = vpop.permute.xlu1 %2936  ;;  %3200 = vperm.xlu2 %5326, %v7189_v55   ;;  %v2670_v13 = vmul.f32 %v7653_v10, %v7411_v63  ;;  %v2502_v63 = vmul.f32 %v7284_v47, %v7666_v23  ;;  %v7693_v47 = vld [vmem:[%s5889_s11 + $0x170] sm:$0xff] }
 0x3c6   : > { %3196 = vperm.xlu1 %5325, %v7115_v12   ;;  %v7669_v12 = vld [vmem:[%s5889_s11 + $0xa0] sm:$0xff]  ;;  %9072 = vst [vmem:[#allocation29_spill] sm:$0xff] %v7693_v47  ;;  %v2762_v7 = vmul.f32 %v7693_v47, %v7457_v21 }
 0x3c7   : > { %9069 = vst [vmem:[#allocation43_spill] sm:$0xff] %v7669_v12  ;;  %v2580_v35 = vmul.f32 %v7669_v12, %v7355_v5  ;;  %v2683_v48 = vadd.f32 %v2670_v13, %v2592_v19  ;;  %v2303_v5 = vld [vmem:[#allocation2 + $0x50] sm:$0xff] }
 0x3c8   : > { %v2392_v25 = vpop.f32.mrf.mxu3 }
 0x3c9   : > { %v2413_v61 = vadd.f32 %v2392_v25, %v2302_v30  ;;  %5023 = vmatmul.msk.f32.gmra.mxu0 %vm844_vm0, %v2773_v46  ;;  %v8800_v25 = vmov 25  }
 0x3ca   : > { %5332 = vset.pattern.permute.xlu0 %v8800_v25 }
 0x3cb   : > { %2426 = vst.msk [vmem:[#allocation2 + $0x48] sm:$0xff] %vm448_vm1, %v2413_v61  ;;  %v2774_v61 = vadd.f32 %v2761_v52, %v2683_v48  ;;  %3506 = vperm.xlu0 %5332, %v7189_v55   ;;  %v7701_v52 = vld [vmem:[%s5889_s11 + $0x40] sm:$0xff]  ;;  %v7704_v48 = vld [vmem:[%s5889_s11 + $0xa8] sm:$0xff]  ;;  %v7706_v25 = vpop.permute.xlu0 %3034 }
 0x3cc   : > { %v2503_v21 = vmul.f32 %v7331_v38, %v7701_v52 }
 0x3cd   : > { %v7683_v46 = vpop.permute.xlu1 %2944  ;;  %3208 = vperm.xlu2 %5326, %v7126_v33   ;;  %v7686_v30 = vpop.permute.xlu2 %3010  ;;  %v2593_v33 = vadd.f32 %v2580_v35, %v2502_v63  ;;  %v7714_v35 = vld [vmem:[%s5889_s11 + $0x110] sm:$0xff] }
 0x3ce   : > { %9071 = vst [vmem:[#allocation35_spill] sm:$0xff] %v7683_v46  ;;  %3204 = vperm.xlu1 %5325, %v7135_v39  }
 0x3cf   : > { %v2684_v39 = vadd.f32 %v2671_v28, %v2593_v33  ;;  %v2581_v28 = vmul.f32 %v7704_v48, %v7371_v24 }
 0x3d0   : > { %v2395_v19 = vpop.f32.mrf.mxu3 }
 0x3d1   : > { %v2414_v13 = vadd.f32 %v2395_v19, %v2303_v5  ;;  %5024 = vmatmul.msk.f32.gmra.mxu0 %vm844_vm0, %v2774_v61  ;;  %v2775_v61 = vadd.f32 %v2762_v7, %v2684_v39  ;;  %v7722_v5 = vld [vmem:[%s5889_s11 + $0x178] sm:$0xff]  ;;  %v2304_v19 = vld [vmem:[#allocation2 + $0x58] sm:$0xff]  ;;  %v2594_v38 = vadd.f32 %v2581_v28, %v2503_v21  ;;  %v7735_v39 = vld [vmem:[%s5889_s11 + $0x48] sm:$0xff] }
 0x3d2   : > { %9074 = vst [vmem:[#allocation38_spill] sm:$0xff] %v7722_v5  ;;  %v2763_v24 = vmul.f32 %v7722_v5, %v7578_v2  ;;  %v7745_v21 = vld [vmem:[%s5889_s11 + $0x118] sm:$0xff]  ;;  %v2504_v2 = vmul.f32 %v7270_v59, %v7735_v39 }
 0x3d3   : > { %2427 = vst.msk [vmem:[#allocation2 + $0x50] sm:$0xff] %vm448_vm1, %v2414_v13  ;;  %3526 = vperm.xlu0 %5332, %v7232_v45   ;;  %v2672_v13 = vmul.f32 %v7714_v35, %v7419_v53  ;;  %v7750_v28 = vpop.permute.xlu0 %3046  ;;  %v7763_v59 = vld [vmem:[%s5889_s11 + $0xb8] sm:$0xff] }
 0x3d4   : > { %v9079_v5 = vld [vmem:[#allocation15_spill] sm:$0xff] }
 0x3d5   : > { %v7708_v44 = vpop.permute.xlu1 %2956  ;;  %3220 = vperm.xlu2 %5326, %v7232_v45   ;;  %v7711_v63 = vpop.permute.xlu2 %3022  ;;  %v2685_v23 = vadd.f32 %v2672_v13, %v2594_v38  ;;  %v2673_v13 = vmul.f32 %v7745_v21, %v7423_v54  ;;  %v2583_v54 = vmul.f32 %v7763_v59, %v7374_v20 }
 0x3d6   : > { %9073 = vst [vmem:[#allocation44_spill] sm:$0xff] %v7711_v63  ;;  %3216 = vperm.xlu1 %5325, %v7147_v14   ;;  %v7729_v14 = vld [vmem:[%s5889_s11 + $0xb0] sm:$0xff]  ;;  %v7851_v63 = vld [vmem:[%s5889_s11 + $0x198] sm:$0xff] }
 0x3d7   : > { %v2582_v7 = vmul.f32 %v7729_v14, %v7406_v62  ;;  %v7753_v62 = vld [vmem:[%s5889_s11 + $0x180] sm:$0xff] }
 0x3d8   : > { %v2398_v33 = vpop.f32.mrf.mxu3  ;;  %9076 = vst [vmem:[#allocation46_spill] sm:$0xff] %v7753_v62 }
 0x3d9   : > { %v2415_v47 = vadd.f32 %v2398_v33, %v2304_v19  ;;  %5025 = vmatmul.msk.f32.gmra.mxu0 %vm844_vm0, %v2775_v61  ;;  %v2305_v61 = vld [vmem:[#allocation2 + $0x60] sm:$0xff]  ;;  %v2595_v33 = vadd.f32 %v2582_v7, %v2504_v2 }
 0x3db   : > { %2428 = vst.msk [vmem:[#allocation2 + $0x58] sm:$0xff] %vm448_vm1, %v2415_v47  ;;  %v2776_v47 = vadd.f32 %v2763_v24, %v2685_v23  ;;  %3538 = vperm.xlu0 %5332, %v7259_v18   ;;  %v2764_v23 = vmul.f32 %v7753_v62, %v7492_v1  ;;  %v7769_v24 = vld [vmem:[%s5889_s11 + $0x120] sm:$0xff]  ;;  %v2686_v2 = vadd.f32 %v2673_v13, %v2595_v33  ;;  %v9078_v1 = vld [vmem:[#allocation10_spill] sm:$0xff]  ;;  %v7785_v62 = vld [vmem:[%s5889_s11 + $0x188] sm:$0xff]  ;;  %v7787_v33 = vpop.permute.xlu0 %3058 }
 0x3dc   : > { %v2765_v58 = vmul.f32 %v7785_v62, %v9079_v5 }
 0x3dd   : > { %v7739_v12 = vpop.permute.xlu1 %2968  ;;  %3232 = vperm.xlu2 %5326, %v7259_v18   ;;  %v7742_v53 = vpop.permute.xlu2 %3030 }
 0x3de   : > { %9075 = vst [vmem:[#allocation39_spill] sm:$0xff] %v7742_v53  ;;  %3228 = vperm.xlu1 %5325, %v7159_v42   ;;  %v7760_v42 = vld [vmem:[%s5889_s11 + $0x50] sm:$0xff] }
 0x3df   : > { %v2505_v7 = vmul.f32 %v7306_v11, %v7760_v42  ;;  %v2674_v11 = vmul.f32 %v7769_v24, %v9078_v1  ;;  %v9081_v1 = vld [vmem:[#allocation5_spill] sm:$0xff] }
 0x3e0   : > { %v2401_v19 = vpop.f32.mrf.mxu3 }
 0x3e1   : > { %v2416_v38 = vadd.f32 %v2401_v19, %v2305_v61  ;;  %5026 = vmatmul.msk.f32.gmra.mxu0 %vm844_vm0, %v2776_v47  ;;  %v9077_v61 = vmov 24   ;;  %v2596_v20 = vadd.f32 %v2583_v54, %v2505_v7  ;;  %v7807_v54 = vld [vmem:[%s5716_s4 + $0x18] sm:$0xff] }
 0x3e3   : > { %2429 = vst.msk [vmem:[#allocation2 + $0x60] sm:$0xff] %vm448_vm1, %v2416_v38  ;;  %v2777_v38 = vadd.f32 %v2764_v23, %v2686_v2  ;;  %v2687_v13 = vadd.f32 %v2674_v11, %v2596_v20  ;;  %v7801_v23 = vld [vmem:[%s5889_s11 + $0x128] sm:$0xff]  ;;  %v2584_v11 = vmul.f32 %v7796_v31, %v9081_v1  ;;  %v7816_v20 = vld [vmem:[%s5889_s11 + $0x190] sm:$0xff]  ;;  %v7820_v49 = vpop.permute.xlu0 %3109  ;;  %5333 = vset.pattern.permute.xlu0 %v8814_v4 }
 0x3e4   : > { %v9080_v2 = vld [vmem:[#allocation9_spill] sm:$0xff]  ;;  %9082 = vst [vmem:[#allocation42_spill] sm:$0xff] %v7816_v20  ;;  %3589 = vperm.xlu0 %5333, %v7277_v57   ;;  %v9084_v1 = vld [vmem:[#allocation6_spill] sm:$0xff] }
 0x3e5   : > { %v7775_v47 = vpop.permute.xlu1 %2980  ;;  %5327 = vset.pattern.permute.xlu2 %v9077_v61  ;;  %v7778_v19 = vpop.permute.xlu2 %3042 }
 0x3e6   : > { %3240 = vperm.xlu1 %5325, %v7170_v50   ;;  %3420 = vperm.xlu2 %5327, %v7277_v57   ;;  %v7793_v50 = vld [vmem:[%s5889_s11 + $0x58] sm:$0xff] }
 0x3e7   : > { %v2506_v5 = vmul.f32 %v9080_v2, %v7793_v50 }
 0x3e9   : > { %5027 = vmatmul.msk.f32.gmra.mxu0 %vm844_vm0, %v2777_v38  ;;  %v2778_v38 = vadd.f32 %v2765_v58, %v2687_v13  ;;  %v2597_v2 = vadd.f32 %v2584_v11, %v2506_v5  ;;  %v2442_v58 = vld [vmem:[%s5889_s11 + $0x60] sm:$0xff]  ;;  %v5070_v13 = vld [vmem:[%s8687_s2 + $0x50] sm:$0xff]  ;;  %v2585_v5 = vmul.f32 %v7824_v36, %v9084_v1  ;;  %v9087_v1 = vld [vmem:[#allocation11_spill] sm:$0xff] }
 0x3ec   : > { %3609 = vperm.xlu0 %5333, %v7204_v27  }
 0x3ed   : > { %v7798_v53 = vpop.permute.xlu2 %3054 }
 0x3ee   : > { %5329 = vset.pattern.permute.xlu1 %v9077_v61  ;;  %v7804_v7 = vpop.permute.xlu1 %3018  ;;  %3432 = vperm.xlu2 %5327, %v7807_v54   ;;  %v2675_v61 = vmul.f32 %v7801_v23, %v9083_v0  ;;  %v5071_v0 = vld [vmem:[%s8687_s2 + $0x58] sm:$0xff] }
 0x3ef   : > { %3428 = vperm.xlu1 %5329, %v7189_v55   ;;  %v2766_v55 = vmul.f32 %v7816_v20, %v7612_v40  ;;  %3338 = vmatpush.msrb.mxu1 %v5071_v0  ;;  %v9086_v20 = vld [vmem:[#allocation4_spill] sm:$0xff]  ;;  %v7847_v0 = vld [vmem:[%s5716_s4 + $0x20] sm:$0xff] }
 0x3f0   : > { %v2688_v11 = vadd.f32 %v2675_v61, %v2597_v2  ;;  %v2507_v46 = vmul.f32 %v9086_v20, %v2442_v58  ;;  %v7855_v2 = vpop.permute.xlu0 %3129 }
 0x3f1   : > { %5028 = vmatmul.msk.f32.gmra.mxu0 %vm844_vm0, %v2778_v38  ;;  %v5002_v38 = vld [vmem:[%s5889_s11 + $0x130] sm:$0xff]  ;;  %3339 = vmatpush.msrb.mxu1 %v5070_v13 }
 0x3f2   : > { %v2779_v6 = vadd.f32 %v2766_v55, %v2688_v11  ;;  %v2598_v32 = vadd.f32 %v2585_v5, %v2507_v46  ;;  %v2676_v61 = vmul.f32 %v5002_v38, %v9087_v1 }
 0x3f4   : > { %v2689_v20 = vadd.f32 %v2676_v61, %v2598_v32  ;;  %3621 = vperm.xlu0 %5333, %v7222_v8  }
 0x3f6   : > { %v7840_v4 = vpop.permute.xlu1 %3026  ;;  %3440 = vperm.xlu2 %5327, %v7204_v27   ;;  %v7843_v40 = vpop.permute.xlu2 %3105 }
 0x3f7   : > { %9085 = vst [vmem:[#allocation40_spill] sm:$0xff] %v7840_v4  ;;  %3436 = vperm.xlu1 %5329, %v7847_v0   ;;  %v2767_v4 = vmul.f32 %v7851_v63, %v7527_v9  ;;  %v3067_v9 = vmul.f32 %v7633_v3, %v7706_v25  ;;  %v2992_v3 = vmul.f32 %v7739_v12, %v7735_v39  ;;  %v9089_v25 = vld [vmem:[#allocation12_spill] sm:$0xff] }
 0x3f8   : > { %v7871_v46 = vpop.permute.xlu0 %3141  ;;  %v3061_v1 = vmul.f32 %v9089_v25, %v7686_v30  ;;  %v7894_v39 = vld [vmem:[%s5716_s4 + $0x8] sm:$0xff] }
 0x3f9   : > { %5029 = vmatmul.msk.f32.gmra.mxu0 %vm844_vm0, %v2779_v6  ;;  %v2780_v11 = vadd.f32 %v2767_v4, %v2689_v20  ;;  %v2989_v6 = vmul.f32 %v7708_v44, %v7641_v29  ;;  %v3070_v29 = vmul.f32 %v7729_v14, %v7750_v28  ;;  %v9091_v14 = vld [vmem:[#allocation13_spill] sm:$0xff]  ;;  %v7925_v25 = vld [vmem:[%s5716_s4 + $0x28] sm:$0xff] }
 0x3fb   : > { %v3080_v4 = vadd.f32 %v3067_v9, %v2989_v6  ;;  %v3083_v20 = vadd.f32 %v3070_v29, %v2992_v3  ;;  %v2995_v9 = vmul.f32 %v7775_v47, %v2442_v58  ;;  %v8819_v47 = vmov 27  }
 0x3fc   : > { %3633 = vperm.xlu0 %5333, %v7247_v43  }
 0x3fe   : > { %v7860_v55 = vpop.permute.xlu1 %3038  ;;  %3452 = vperm.xlu2 %5327, %v7222_v8   ;;  %v7863_v13 = vpop.permute.xlu2 %3117  ;;  %v9088_v8 = vld [vmem:[#allocation8_spill] sm:$0xff] }
 0x3ff   : > { %3448 = vperm.xlu1 %5329, %v7232_v45   ;;  %v2983_v44 = vmul.f32 %v7522_v37, %v9088_v8  ;;  %v7919_v8 = vld [vmem:[%s5716_s4 + $0x30] sm:$0xff] }
 0x400   : > { %v3193_v61 = vpop.permute.xlu0 %3192 }
 0x401   : > { %5030 = vmatmul.msk.f32.gmra.mxu0 %vm844_vm0, %v2780_v11  ;;  %v3243_v30 = vmul.f32 %v7486_v51, %v3193_v61  ;;  %v2991_v61 = vmul.f32 %v7596_v34, %v7701_v52  ;;  %v7944_v34 = vld [vmem:[%s5716_s4 + $0x40] sm:$0xff] }
 0x404   : > { %5337 = vset.pattern.permute.xlu0 %v8819_v47 }
 0x405   : > { %3684 = vperm.xlu0 %5337, %v7894_v39  }
 0x406   : > { %v7874_v27 = vpop.permute.xlu1 %3050  ;;  %3464 = vperm.xlu2 %5327, %v7247_v43   ;;  %v3126_v32 = vpop.permute.xlu2 %3125  ;;  %v3074_v43 = vadd.f32 %v3061_v1, %v2983_v44 }
 0x407   : > { %v3158_v45 = vmul.f32 %v7653_v10, %v3126_v32  ;;  %3460 = vperm.xlu1 %5329, %v7259_v18   ;;  %v9090_v10 = vmov 25  }
 0x408   : > { %v7912_v51 = vpop.permute.xlu0 %3212 }
 0x409   : > { %v7879_v5 = vadd.f32 %v3158_v45, %v3080_v4 }
 0x40d   : > { %3704 = vperm.xlu0 %5337, %v7919_v8  }
 0x40e   : > { %5331 = vset.pattern.permute.xlu2 %v9090_v10  ;;  %v3138_v18 = vpop.permute.xlu2 %3137 }
 0x40f   : > { %v3161_v11 = vmul.f32 %v7745_v21, %v3138_v18  ;;  %5330 = vset.pattern.permute.xlu1 %v9090_v10  ;;  %v3102_v12 = vpop.permute.xlu1 %3101  ;;  %3502 = vperm.xlu2 %5331, %v7894_v39   ;;  %v3073_v21 = vmul.f32 %v7824_v36, %v7787_v33  ;;  %v2781_v36 = vld [vmem:[#allocation2] sm:$0xff]  ;;  %v3069_v10 = vmul.f32 %v7704_v48, %v7778_v19  ;;  %v2782_v18 = vld [vmem:[#allocation2 + $0x8] sm:$0xff] }
 0x410   : > { %v3152_v37 = vmul.f32 %v9091_v14, %v3102_v12  ;;  %3498 = vperm.xlu1 %5330, %v7277_v57   ;;  %v7929_v1 = vpop.permute.xlu0 %3224  ;;  %v2994_v48 = vmul.f32 %v7635_v17, %v7793_v50  ;;  %v3072_v19 = vmul.f32 %v7796_v31, %v7798_v53  ;;  %v3071_v17 = vmul.f32 %v7763_v59, %v7874_v27  ;;  %v7967_v53 = vld [vmem:[%s5716_s4 + $0x58] sm:$0xff] }
 0x411   : > { %v7900_v28 = vadd.f32 %v3161_v11, %v3083_v20  ;;  %v3086_v45 = vadd.f32 %v3073_v21, %v2995_v9  ;;  %v2993_v50 = vmul.f32 %v7644_v22, %v7760_v42 }
 0x412   : > { %v3165_v6 = vadd.f32 %v3152_v37, %v3074_v43  ;;  %v7937_v43 = vld [vmem:[%s5716_s4 + $0x48] sm:$0xff]  ;;  %v3082_v37 = vadd.f32 %v3069_v10, %v2991_v61  ;;  %v9093_v61 = vld [vmem:[#allocation14_spill] sm:$0xff]  ;;  %v9094_v10 = vld [vmem:[#allocation17_spill] sm:$0xff] }
 0x413   : > { %v3062_v59 = vmul.f32 %v9093_v61, %v7677_v16  ;;  %v3084_v27 = vadd.f32 %v3071_v17, %v2993_v50  ;;  %v9097_v17 = vld [vmem:[#allocation19_spill] sm:$0xff] }
 0x414   : > { %v3256_v32 = vadd.f32 %v3243_v30, %v3165_v6 }
 0x415   : > { %3716 = vperm.xlu0 %5337, %v7937_v43  }
 0x416   : > { %5072 = vmatmul.msk.f32.vlgmr.msrb.gmra.mxu1 %vm844_vm0, %v3256_v32  ;;  %v3150_v4 = vpop.permute.xlu2 %3149 }
 0x417   : > { %v3164_v3 = vmul.f32 %v5002_v38, %v3150_v4  ;;  %v7906_v29 = vpop.permute.xlu1 %3113  ;;  %3514 = vperm.xlu2 %5331, %v7847_v0   ;;  %v7958_v4 = vld [vmem:[%s5716_s4 + $0x60] sm:$0xff] }
 0x418   : > { %3510 = vperm.xlu1 %5330, %v7807_v54   ;;  %v7955_v6 = vpop.permute.xlu0 %3236 }
 0x419   : > { %v7910_v57 = vadd.f32 %v3164_v3, %v3086_v45  ;;  %v3085_v3 = vadd.f32 %v3072_v19, %v2994_v48  ;;  %v7989_v19 = vld [vmem:[%s5716_s4 + $0x10] sm:$0xff] }
 0x41e   : > { %v2853_v33 = vpop.f32.mrf.mxu0 }
 0x41f   : > { %v2892_v58 = vadd.f32 %v2853_v33, %v2781_v36  ;;  %v7916_v38 = vpop.permute.xlu1 %3121  ;;  %3522 = vperm.xlu2 %5331, %v7919_v8   ;;  %v7922_v44 = vpop.permute.xlu2 %3200  ;;  %v9092_v33 = vld [vmem:[#allocation16_spill] sm:$0xff] }
 0x420   : > { %3518 = vperm.xlu1 %5330, %v7925_v25  }
 0x421   : > { %2905 = vst.msk [vmem:[#allocation2] sm:$0xff] %vm448_vm1, %v2892_v58  ;;  %v2984_v58 = vmul.f32 %v7649_v41, %v9092_v33 }
 0x423   : > { %v3075_v42 = vadd.f32 %v3062_v59, %v2984_v58 }
 0x426   : > { %v2856_v20 = vpop.f32.mrf.mxu0 }
 0x427   : > { %v2893_v11 = vadd.f32 %v2856_v20, %v2782_v18  ;;  %v3134_v12 = vpop.permute.xlu1 %3133  ;;  %3534 = vperm.xlu2 %5331, %v7937_v43   ;;  %v7940_v14 = vpop.permute.xlu2 %3208  ;;  %v3153_v18 = vmul.f32 %v9094_v10, %v7843_v40  ;;  %v9102_v10 = vld [vmem:[#allocation22_spill] sm:$0xff] }
 0x428   : > { %v3160_v30 = vmul.f32 %v7714_v35, %v3134_v12  ;;  %3530 = vperm.xlu1 %5330, %v7944_v34   ;;  %v2783_v35 = vld [vmem:[#allocation2 + $0x10] sm:$0xff]  ;;  %v7983_v20 = vpop.permute.xlu0 %3424 }
 0x429   : > { %2906 = vst.msk [vmem:[#allocation2 + $0x8] sm:$0xff] %vm448_vm1, %v2893_v11  ;;  %v2784_v11 = vld [vmem:[#allocation2 + $0x18] sm:$0xff]  ;;  %v3166_v40 = vadd.f32 %v3153_v18, %v3075_v42  ;;  %v3155_v18 = vmul.f32 %v9102_v10, %v7906_v29  ;;  %v9112_v10 = vld [vmem:[#allocation39_spill] sm:$0xff] }
 0x42a   : > { %v7948_v52 = vadd.f32 %v3160_v30, %v3082_v37  ;;  %v9095_v37 = vmov 26  }
 0x42e   : > { %v2859_v9 = vpop.f32.mrf.mxu0 }
 0x42f   : > { %v2894_v21 = vadd.f32 %v2859_v9, %v2783_v35  ;;  %v3146_v32 = vpop.permute.xlu1 %3145  ;;  %3546 = vperm.xlu2 %5331, %v7958_v4   ;;  %v7961_v45 = vpop.permute.xlu2 %3220 }
 0x430   : > { %v3163_v31 = vmul.f32 %v7801_v23, %v3146_v32  ;;  %3542 = vperm.xlu1 %5330, %v7967_v53   ;;  %v3162_v23 = vmul.f32 %v7769_v24, %v7871_v46  ;;  %v3063_v24 = vmul.f32 %v7518_v60, %v7804_v7  ;;  %v9096_v46 = vld [vmem:[#allocation18_spill] sm:$0xff]  ;;  %v2785_v60 = vld [vmem:[#allocation2 + $0x20] sm:$0xff]  ;;  %v8006_v33 = vpop.permute.xlu0 %3444 }
 0x431   : > { %2907 = vst.msk [vmem:[#allocation2 + $0x10] sm:$0xff] %vm448_vm1, %v2894_v21 }
 0x432   : > { %v7973_v36 = vadd.f32 %v3163_v31, %v3085_v3  ;;  %v3175_v30 = vadd.f32 %v3162_v23, %v3084_v27  ;;  %v3154_v3 = vmul.f32 %v7525_v56, %v7820_v49  ;;  %v3245_v31 = vmul.f32 %v9097_v17, %v7922_v44  ;;  %v9098_v56 = vld [vmem:[#allocation44_spill] sm:$0xff]  ;;  %v9100_v27 = vld [vmem:[#allocation21_spill] sm:$0xff]  ;;  %v9101_v44 = vld [vmem:[#allocation35_spill] sm:$0xff] }
 0x433   : > { %v9099_v49 = vld [vmem:[#allocation20_spill] sm:$0xff]  ;;  %v2986_v23 = vmul.f32 %v9101_v44, %v9100_v27  ;;  %v9110_v44 = vld [vmem:[#allocation31_spill] sm:$0xff] }
 0x434   : > { %v3064_v61 = vmul.f32 %v9099_v49, %v9098_v56 }
 0x436   : > { %v2862_v22 = vpop.f32.mrf.mxu0  ;;  %v3077_v42 = vadd.f32 %v3064_v61, %v2986_v23  ;;  %v9111_v23 = vld [vmem:[#allocation23_spill] sm:$0xff] }
 0x437   : > { %v2895_v12 = vadd.f32 %v2862_v22, %v2784_v11  ;;  %5335 = vset.pattern.permute.xlu2 %v9095_v37  ;;  %v3233_v41 = vpop.permute.xlu2 %3232  ;;  %v2786_v11 = vld [vmem:[#allocation2 + $0x28] sm:$0xff] }
 0x438   : > { %v3253_v48 = vmul.f32 %v7785_v62, %v3233_v41  ;;  %5334 = vset.pattern.permute.xlu1 %v9095_v37  ;;  %v3197_v16 = vpop.permute.xlu1 %3196  ;;  %3597 = vperm.xlu2 %5335, %v7989_v19   ;;  %v2985_v62 = vmul.f32 %v7550_v26, %v7515_v15  ;;  %v8030_v29 = vpop.permute.xlu0 %3456 }
 0x439   : > { %2908 = vst.msk [vmem:[#allocation2 + $0x18] sm:$0xff] %vm448_vm1, %v2895_v12  ;;  %v3244_v35 = vmul.f32 %v9096_v46, %v3197_v16  ;;  %3593 = vperm.xlu1 %5334, %v7894_v39   ;;  %v9103_v12 = vld [vmem:[#allocation28_spill] sm:$0xff] }
 0x43a   : > { %v7997_v9 = vadd.f32 %v3253_v48, %v3175_v30  ;;  %v3076_v32 = vadd.f32 %v3063_v24, %v2985_v62  ;;  %v8022_v48 = vld [vmem:[%s5716_s4 + $0x38] sm:$0xff]  ;;  %v8822_v24 = vmov 29   ;;  %v9104_v46 = vld [vmem:[#allocation40_spill] sm:$0xff] }
 0x43b   : > { %v3257_v21 = vadd.f32 %v3244_v35, %v3166_v40  ;;  %5343 = vset.pattern.permute.xlu0 %v8822_v24  ;;  %v3168_v40 = vadd.f32 %v3155_v18, %v3077_v42  ;;  %v9105_v35 = vld [vmem:[#allocation30_spill] sm:$0xff]  ;;  %v9113_v18 = vld [vmem:[#allocation49_spill] sm:$0xff] }
 0x43c   : > { %v3167_v26 = vadd.f32 %v3154_v3, %v3076_v32  ;;  %3990 = vperm.xlu0 %5343, %v7894_v39   ;;  %v3065_v62 = vmul.f32 %v9105_v35, %v9104_v46  ;;  %v9106_v32 = vld [vmem:[#allocation32_spill] sm:$0xff]  ;;  %v9107_v3 = vld [vmem:[#allocation27_spill] sm:$0xff]  ;;  %v9114_v42 = vld [vmem:[#allocation37_spill] sm:$0xff] }
 0x43d   : > { %5073 = vmatmul.msk.f32.gmra.mxu1 %vm844_vm0, %v3257_v21  ;;  %v2788_v46 = vld [vmem:[#allocation2 + $0x38] sm:$0xff] }
 0x43e   : > { %v2865_v7 = vpop.f32.mrf.mxu0  ;;  %v3258_v59 = vadd.f32 %v3245_v31, %v3167_v26  ;;  %v2787_v31 = vld [vmem:[#allocation2 + $0x30] sm:$0xff]  ;;  %v9109_v26 = vld [vmem:[#allocation24_spill] sm:$0xff] }
 0x43f   : > { %v2896_v50 = vadd.f32 %v2865_v7, %v2785_v60  ;;  %v2987_v60 = vmul.f32 %v9107_v3, %v9106_v32  ;;  %v9108_v7 = vld [vmem:[#allocation25_spill] sm:$0xff]  ;;  %v3247_v56 = vmul.f32 %v9109_v26, %v7940_v14  ;;  %v8824_v14 = vmov 30  }
 0x440   : > { %v3205_v58 = vpop.permute.xlu1 %3204  ;;  %3605 = vperm.xlu2 %5335, %v7847_v0   ;;  %v8009_v15 = vpop.permute.xlu2 %3420  ;;  %v3156_v17 = vmul.f32 %v9108_v7, %v7863_v13  ;;  %v2988_v13 = vmul.f32 %v9111_v23, %v9110_v44  ;;  %v8084_v23 = vld [vmem:[%s5889_s11 + $0x10] sm:$0xff] }
 0x441   : > { %2909 = vst.msk [vmem:[#allocation2 + $0x20] sm:$0xff] %vm448_vm1, %v2896_v50  ;;  %3601 = vperm.xlu1 %5334, %v7807_v54   ;;  %v3246_v37 = vmul.f32 %v9103_v12, %v3205_v58  ;;  %v3078_v58 = vadd.f32 %v3065_v62, %v2987_v60  ;;  %v3157_v12 = vmul.f32 %v9114_v42, %v7916_v38  ;;  %v8073_v38 = vld [vmem:[%s5716_s4] sm:$0xff]  ;;  %v9118_v42 = vld [vmem:[#allocation45_spill] sm:$0xff] }
 0x443   : > { %v3259_v21 = vadd.f32 %v3246_v37, %v3168_v40 }
 0x444   : > { %5348 = vset.pattern.permute.xlu0 %v8824_v14 }
 0x445   : > { %5074 = vmatmul.msk.f32.gmra.mxu1 %vm844_vm0, %v3258_v59  ;;  %v8045_v59 = vld [vmem:[%s5716_s4 + $0x50] sm:$0xff]  ;;  %4085 = vperm.xlu0 %5348, %v7989_v19  }
 0x446   : > { %v2868_v22 = vpop.f32.mrf.mxu0 }
 0x447   : > { %v2897_v41 = vadd.f32 %v2868_v22, %v2786_v11  ;;  %v3066_v11 = vmul.f32 %v9113_v18, %v9112_v10  ;;  %v3169_v22 = vadd.f32 %v3156_v17, %v3078_v58  ;;  %v8820_v17 = vmov 31   ;;  %v2789_v58 = vld [vmem:[#allocation2 + $0x40] sm:$0xff] }
 0x448   : > { %v3217_v30 = vpop.permute.xlu1 %3216  ;;  %3617 = vperm.xlu2 %5335, %v8022_v48   ;;  %v8025_v16 = vpop.permute.xlu2 %3432  ;;  %v9117_v18 = vld [vmem:[#allocation43_spill] sm:$0xff] }
 0x449   : > { %2910 = vst.msk [vmem:[#allocation2 + $0x28] sm:$0xff] %vm448_vm1, %v2897_v41  ;;  %3613 = vperm.xlu1 %5334, %v7919_v8   ;;  %v3260_v37 = vadd.f32 %v3247_v56, %v3169_v22  ;;  %v8060_v41 = vpop.permute.xlu0 %3468  ;;  %v3079_v40 = vadd.f32 %v3066_v11, %v2988_v13  ;;  %v9116_v56 = vld [vmem:[#allocation36_spill] sm:$0xff]  ;;  %v3068_v11 = vmul.f32 %v9117_v18, %v7860_v55 }
 0x44b   : > { %v3170_v62 = vadd.f32 %v3157_v12, %v3079_v40  ;;  %v9119_v12 = vld [vmem:[#allocation34_spill] sm:$0xff] }
 0x44d   : > { %5075 = vmatmul.msk.f32.gmra.mxu1 %vm844_vm0, %v3259_v21  ;;  %v9115_v21 = vld [vmem:[#allocation33_spill] sm:$0xff]  ;;  %5353 = vset.pattern.permute.xlu0 %v8820_v17 }
 0x44e   : > { %v2871_v50 = vpop.f32.mrf.mxu0  ;;  %v3248_v32 = vmul.f32 %v9115_v21, %v7912_v51  ;;  %4180 = vperm.xlu0 %5353, %v7807_v54  }
 0x44f   : > { %v2898_v49 = vadd.f32 %v2871_v50, %v2787_v31  ;;  %v8080_v50 = vld [vmem:[%s5889_s11 + $0x78] sm:$0xff] }
 0x450   : > { %v8042_v61 = vpop.permute.xlu1 %3228  ;;  %3629 = vperm.xlu2 %5335, %v8045_v59   ;;  %v8048_v27 = vpop.permute.xlu2 %3440  ;;  %v3261_v51 = vadd.f32 %v3248_v32, %v3170_v62  ;;  %v9120_v62 = vld [vmem:[#allocation47_spill] sm:$0xff]  ;;  %v8106_v32 = vld [vmem:[%s5889_s11 + $0x8] sm:$0xff] }
 0x451   : > { %2911 = vst.msk [vmem:[#allocation2 + $0x30] sm:$0xff] %vm448_vm1, %v2898_v49  ;;  %3625 = vperm.xlu1 %5334, %v7937_v43   ;;  %v3507_v31 = vpop.permute.xlu0 %3506  ;;  %v3249_v49 = vmul.f32 %v9116_v56, %v3217_v30  ;;  %v3159_v21 = vmul.f32 %v9120_v62, %v7855_v2  ;;  %v3472_v56 = vmul.f32 %v7983_v20, %v8106_v32  ;;  %v8125_v20 = vld [vmem:[%s5889_s11 + $0xa0] sm:$0xff]  ;;  %v8136_v62 = vld [vmem:[%s5889_s11 + $0x88] sm:$0xff] }
 0x452   : > { %v3551_v10 = vmul.f32 %v8080_v50, %v3507_v31  ;;  %v9121_v31 = vld [vmem:[#allocation29_spill] sm:$0xff] }
 0x453   : > { %v3262_v40 = vadd.f32 %v3249_v49, %v7879_v5  ;;  %v3250_v5 = vmul.f32 %v9121_v31, %v7961_v45 }
 0x455   : > { %5076 = vmatmul.msk.f32.gmra.mxu1 %vm844_vm0, %v3260_v37  ;;  %v2990_v37 = vmul.f32 %v9119_v12, %v9118_v42  ;;  %v9122_v42 = vld [vmem:[#allocation38_spill] sm:$0xff] }
 0x456   : > { %v2874_v35 = vpop.f32.mrf.mxu0  ;;  %v3251_v12 = vmul.f32 %v9122_v42, %v7929_v1  ;;  %v3416_v42 = vld [vmem:[%s5889_s11 + $0x50] sm:$0xff] }
 0x457   : > { %v2899_v3 = vadd.f32 %v2874_v35, %v2788_v46  ;;  %v8826_v46 = vmov 28   ;;  %v3081_v35 = vadd.f32 %v3068_v11, %v2990_v37  ;;  %v8130_v37 = vld [vmem:[%s5889_s11 + $0x20] sm:$0xff] }
 0x458   : > { %v8065_v60 = vpop.permute.xlu1 %3240  ;;  %5336 = vset.pattern.permute.xlu2 %v8819_v47  ;;  %v8068_v7 = vpop.permute.xlu2 %3452  ;;  %5354 = vset.pattern.permute.xlu0 %v8826_v46 }
 0x459   : > { %2912 = vst.msk [vmem:[#allocation2 + $0x38] sm:$0xff] %vm448_vm1, %v2899_v3  ;;  %3637 = vperm.xlu1 %5334, %v7958_v4   ;;  %3680 = vperm.xlu2 %5336, %v8073_v38   ;;  %v2790_v3 = vld [vmem:[#allocation2 + $0x48] sm:$0xff]  ;;  %v3172_v49 = vadd.f32 %v3159_v21, %v3081_v35  ;;  %v3527_v18 = vpop.permute.xlu0 %3526  ;;  %v8133_v35 = vld [vmem:[%s5889_s11 + $0x38] sm:$0xff] }
 0x45a   : > { %3908 = vperm.xlu0 %5354, %v8073_v38   ;;  %9123 = vst [vmem:[#allocation41_spill] sm:$0xff] %v8133_v35  ;;  %v3556_v21 = vmul.f32 %v8125_v20, %v3527_v18 }
 0x45b   : > { %v3263_v45 = vadd.f32 %v3250_v5, %v3172_v49 }
 0x45d   : > { %5077 = vmatmul.msk.f32.gmra.mxu1 %vm844_vm0, %v3261_v51 }
 0x45e   : > { %v2877_v26 = vpop.f32.mrf.mxu0 }
 0x45f   : > { %v2900_v44 = vadd.f32 %v2877_v26, %v2789_v58  ;;  %v8112_v26 = vld [vmem:[%s5889_s11 + $0x70] sm:$0xff] }
 0x460   : > { %v8086_v13 = vpop.permute.xlu2 %3464 }
 0x461   : > { %2913 = vst.msk [vmem:[#allocation2 + $0x40] sm:$0xff] %vm448_vm1, %v2900_v44  ;;  %5338 = vset.pattern.permute.xlu1 %v8819_v47  ;;  %v3429_v22 = vpop.permute.xlu1 %3428  ;;  %3692 = vperm.xlu2 %5336, %v7807_v54  }
 0x462   : > { %v3473_v30 = vmul.f32 %v3429_v22, %v8084_v23  ;;  %3688 = vperm.xlu1 %5338, %v7989_v19   ;;  %3928 = vperm.xlu0 %5354, %v7925_v25   ;;  %v2791_v22 = vld [vmem:[#allocation2 + $0x50] sm:$0xff] }
 0x464   : > { %v8100_v55 = vadd.f32 %v3551_v10, %v3473_v30 }
 0x465   : > { %5078 = vmatmul.msk.f32.gmra.mxu1 %vm844_vm0, %v3262_v40 }
 0x466   : > { %v2880_v51 = vpop.f32.mrf.mxu0 }
 0x467   : > { %v2901_v58 = vadd.f32 %v2880_v51, %v2790_v3 }
 0x469   : > { %2914 = vst.msk [vmem:[#allocation2 + $0x48] sm:$0xff] %vm448_vm1, %v2901_v58  ;;  %v3437_v2 = vpop.permute.xlu1 %3436  ;;  %3700 = vperm.xlu2 %5336, %v7925_v25   ;;  %v3503_v44 = vpop.permute.xlu2 %3502  ;;  %v3264_v58 = vadd.f32 %v3251_v12, %v7948_v52  ;;  %v8159_v12 = vld [vmem:[%s5889_s11 + $0x98] sm:$0xff] }
 0x46a   : > { %v3550_v10 = vmul.f32 %v8112_v26, %v3503_v44  ;;  %3696 = vperm.xlu1 %5338, %v7847_v0   ;;  %v3475_v31 = vmul.f32 %v3437_v2, %v8130_v37  ;;  %5363 = vset.pattern.permute.xlu0 %v8822_v24  ;;  %v3412_v44 = vld [vmem:[%s5889_s11 + $0x30] sm:$0xff]  ;;  %v3539_v2 = vpop.permute.xlu0 %3538 }
 0x46b   : > { %4010 = vperm.xlu0 %5363, %v7919_v8  }
 0x46c   : > { %v8120_v11 = vadd.f32 %v3550_v10, %v3472_v56  ;;  %v5095_v10 = vld [vmem:[%s5889_s11 + $0xb8] sm:$0xff] }
 0x46d   : > { %5079 = vmatmul.msk.f32.gmra.mxu1 %vm844_vm0, %v3263_v45  ;;  %v2792_v45 = vld [vmem:[#allocation2 + $0x58] sm:$0xff] }
 0x46e   : > { %v2883_v30 = vpop.f32.mrf.mxu0 }
 0x46f   : > { %v2902_v40 = vadd.f32 %v2883_v30, %v2791_v22  ;;  %v9124_v22 = vld [vmem:[#allocation46_spill] sm:$0xff] }
 0x470   : > { %v3252_v30 = vmul.f32 %v9124_v22, %v8042_v61 }
 0x471   : > { %2915 = vst.msk [vmem:[#allocation2 + $0x50] sm:$0xff] %vm448_vm1, %v2902_v40  ;;  %v3449_v3 = vpop.permute.xlu1 %3448  ;;  %3712 = vperm.xlu2 %5336, %v7944_v34   ;;  %v3515_v51 = vpop.permute.xlu2 %3514  ;;  %v3477_v40 = vmul.f32 %v8006_v33, %v3412_v44  ;;  %v3415_v33 = vld [vmem:[%s5889_s11 + $0x48] sm:$0xff]  ;;  %v2793_v44 = vld [vmem:[#allocation2 + $0x60] sm:$0xff] }
 0x472   : > { %v3478_v1 = vmul.f32 %v3449_v3, %v8133_v35  ;;  %v3553_v5 = vmul.f32 %v8136_v62, %v3515_v51  ;;  %3708 = vperm.xlu1 %5338, %v8022_v48   ;;  %v3265_v61 = vadd.f32 %v3252_v30, %v7900_v28  ;;  %v3480_v28 = vmul.f32 %v8030_v29, %v3415_v33  ;;  %v8189_v29 = vpop.permute.xlu0 %3589 }
 0x473   : > { %5368 = vset.pattern.permute.xlu0 %v8824_v14 }
 0x474   : > { %v8146_v56 = vadd.f32 %v3556_v21, %v3478_v1  ;;  %v8148_v49 = vadd.f32 %v3553_v5, %v3475_v31  ;;  %v3559_v21 = vmul.f32 %v5095_v10, %v3539_v2  ;;  %4105 = vperm.xlu0 %5368, %v8022_v48  }
 0x475   : > { %5080 = vmatmul.msk.f32.gmra.mxu1 %vm844_vm0, %v3264_v58 }
 0x476   : > { %v2886_v18 = vpop.f32.mrf.mxu0 }
 0x477   : > { %v2903_v52 = vadd.f32 %v2886_v18, %v2792_v45  ;;  %v8176_v45 = vld [vmem:[%s5889_s11 + $0xb0] sm:$0xff] }
 0x478   : > { %9125 = vst [vmem:[#allocation26_spill] sm:$0xff] %v8176_v45 }
 0x479   : > { %2916 = vst.msk [vmem:[#allocation2 + $0x58] sm:$0xff] %vm448_vm1, %v2903_v52  ;;  %v3461_v3 = vpop.permute.xlu1 %3460  ;;  %3724 = vperm.xlu2 %5336, %v7967_v53   ;;  %v3523_v51 = vpop.permute.xlu2 %3522 }
 0x47a   : > { %v3481_v31 = vmul.f32 %v3461_v3, %v3416_v42  ;;  %v3555_v1 = vmul.f32 %v8159_v12, %v3523_v51  ;;  %3720 = vperm.xlu1 %5338, %v8045_v59   ;;  %v3418_v42 = vld [vmem:[%s5889_s11 + $0x60] sm:$0xff]  ;;  %v5097_v3 = vld [vmem:[%s5889_s11 + $0xc8] sm:$0xff]  ;;  %v8200_v51 = vld [vmem:[%s5889_s11 + $0x18] sm:$0xff] }
 0x47c   : > { %v8167_v5 = vadd.f32 %v3559_v21, %v3481_v31  ;;  %v8169_v58 = vadd.f32 %v3555_v1, %v3477_v40  ;;  %5373 = vset.pattern.permute.xlu0 %v8820_v17  ;;  %v9126_v40 = vld [vmem:[#allocation42_spill] sm:$0xff]  ;;  %v3483_v31 = vmul.f32 %v8060_v41, %v3418_v42  ;;  %v8204_v1 = vld [vmem:[%s5889_s11 + $0x80] sm:$0xff] }
 0x47d   : > { %5081 = vmatmul.msk.f32.gmra.mxu1 %vm844_vm0, %v3265_v61  ;;  %v3254_v21 = vmul.f32 %v9126_v40, %v7955_v6  ;;  %4200 = vperm.xlu0 %5373, %v7944_v34   ;;  %v3474_v6 = vmul.f32 %v8025_v16, %v8200_v51  ;;  %v8223_v16 = vld [vmem:[%s5889_s11 + $0x28] sm:$0xff] }
 0x47e   : > { %v2889_v2 = vpop.f32.mrf.mxu0  ;;  %v3476_v40 = vmul.f32 %v8048_v27, %v8223_v16 }
 0x47f   : > { %v2904_v10 = vadd.f32 %v2889_v2, %v2793_v44 }
 0x481   : > { %2917 = vst.msk [vmem:[#allocation2 + $0x60] sm:$0xff] %vm448_vm1, %v2904_v10  ;;  %v3535_v18 = vpop.permute.xlu2 %3534  ;;  %5340 = vset.pattern.permute.xlu2 %v8824_v14  ;;  %v3610_v10 = vpop.permute.xlu0 %3609 }
 0x482   : > { %v3558_v22 = vmul.f32 %v8176_v45, %v3535_v18  ;;  %5339 = vset.pattern.permute.xlu1 %v8822_v24  ;;  %v8183_v30 = vpop.permute.xlu1 %3498  ;;  %4077 = vperm.xlu2 %5340, %v8073_v38   ;;  %v8226_v18 = vld [vmem:[%s5889_s11 + $0x90] sm:$0xff]  ;;  %v8445_v45 = vld [vmem:[%s5889_s11 + $0x100] sm:$0xff] }
 0x483   : > { %3986 = vperm.xlu1 %5339, %v8073_v38  }
 0x484   : > { %v8187_v52 = vadd.f32 %v3558_v22, %v3480_v28  ;;  %v8229_v22 = vld [vmem:[%s5889_s11 + $0xf8] sm:$0xff] }
 0x485   : > { %5082 = vmatmul.msk.f32.gmra.mxu1 %vm844_vm0, %v7997_v9  ;;  %v3267_v9 = vadd.f32 %v3254_v21, %v7973_v36  ;;  %v3255_v36 = vmul.f32 %v7851_v63, %v8065_v60  ;;  %5378 = vset.pattern.permute.xlu0 %v8826_v46  ;;  %v3269_v60 = vld [vmem:[#allocation2] sm:$0xff] }
 0x486   : > { %3948 = vperm.xlu0 %5378, %v8045_v59  }
 0x487   : > { %v3268_v21 = vadd.f32 %v3255_v36, %v7910_v57 }
 0x489   : > { %v3547_v61 = vpop.permute.xlu2 %3546  ;;  %v3622_v57 = vpop.permute.xlu0 %3621 }
 0x48a   : > { %v3561_v33 = vmul.f32 %v5097_v3, %v3547_v61  ;;  %v3511_v44 = vpop.permute.xlu1 %3510  ;;  %5342 = vset.pattern.permute.xlu2 %v8826_v46 }
 0x48b   : > { %v3552_v2 = vmul.f32 %v8204_v1, %v3511_v44  ;;  %5341 = vset.pattern.permute.xlu1 %v8820_v17  ;;  %3912 = vperm.xlu2 %5342, %v7894_v39   ;;  %v5124_v44 = vld [vmem:[%s8687_s2 + $0x60] sm:$0xff] }
 0x48c   : > { %v8213_v41 = vadd.f32 %v3561_v33, %v3483_v31  ;;  %4168 = vperm.xlu1 %5341, %v8073_v38   ;;  %v3645_v31 = vmul.f32 %v8229_v22, %v3610_v10  ;;  %v5125_v33 = vld [vmem:[%s8687_s2 + $0x68] sm:$0xff]  ;;  %v8261_v10 = vld [vmem:[%s5889_s11 + $0x110] sm:$0xff] }
 0x48d   : > { %v8216_v28 = vadd.f32 %v3552_v2, %v3474_v6  ;;  %5083 = vmatmul.msk.f32.gmra.mxu1 %vm844_vm0, %v3267_v9  ;;  %v3414_v9 = vld [vmem:[%s5889_s11 + $0x40] sm:$0xff]  ;;  %3826 = vmatpush.msrb.mxu2 %v5125_v33  ;;  %v8255_v2 = vld [vmem:[%s5889_s11 + $0xa8] sm:$0xff]  ;;  %9128 = vst [vmem:[#allocation10_spill] sm:$0xff] %v8261_v10 }
 0x48e   : > { %9127 = vst [vmem:[#allocation48_spill] sm:$0xff] %v8255_v2  ;;  %5383 = vset.pattern.permute.xlu0 %v8822_v24  ;;  %v8286_v33 = vld [vmem:[%s5889_s11 + $0x128] sm:$0xff] }
 0x48f   : > { %3827 = vmatpush.msrb.mxu2 %v5124_v44  ;;  %4030 = vperm.xlu0 %5383, %v7967_v53   ;;  %v3417_v53 = vld [vmem:[%s5889_s11 + $0x58] sm:$0xff]  ;;  %9131 = vst [vmem:[#allocation5_spill] sm:$0xff] %v8286_v33 }
 0x492   : > { %v3519_v42 = vpop.permute.xlu1 %3518  ;;  %v8232_v38 = vpop.permute.xlu2 %3597 }
 0x493   : > { %v3554_v63 = vmul.f32 %v8226_v18, %v3519_v42  ;;  %v3341_v3 = vpop.f32.mrf.mxu1  ;;  %5345 = vset.pattern.permute.xlu2 %v8820_v17 }
 0x494   : > { %v3380_v61 = vadd.f32 %v3341_v3, %v3269_v60  ;;  %5344 = vset.pattern.permute.xlu1 %v8824_v14  ;;  %4172 = vperm.xlu2 %5345, %v7894_v39   ;;  %v3648_v60 = vmul.f32 %v8261_v10, %v3622_v57  ;;  %v3634_v57 = vpop.permute.xlu0 %3633 }
 0x495   : > { %v3567_v27 = vadd.f32 %v3554_v63, %v3476_v40  ;;  %4081 = vperm.xlu1 %5344, %v7894_v39   ;;  %5084 = vmatmul.msk.f32.gmra.mxu1 %vm844_vm0, %v3268_v21  ;;  %v8258_v39 = vld [vmem:[%s5889_s11 + $0xf0] sm:$0xff]  ;;  %v3479_v40 = vmul.f32 %v8068_v7, %v3414_v9  ;;  %v3482_v9 = vmul.f32 %v8086_v13, %v3417_v53  ;;  %v8303_v13 = vld [vmem:[%s5889_s11 + $0x120] sm:$0xff] }
 0x496   : > { %3393 = vst.msk [vmem:[#allocation2] sm:$0xff] %vm448_vm1, %v3380_v61  ;;  %v8280_v61 = vld [vmem:[%s5889_s11 + $0xc0] sm:$0xff] }
 0x497   : > { %v8252_v6 = vadd.f32 %v3645_v31, %v3567_v27  ;;  %9129 = vst [vmem:[#allocation15_spill] sm:$0xff] %v8280_v61  ;;  %v8283_v27 = vld [vmem:[%s5889_s11 + $0x108] sm:$0xff]  ;;  %4034 = vperm.xlu0 %5383, %v7958_v4  }
 0x498   : > { %9130 = vst [vmem:[#allocation9_spill] sm:$0xff] %v8283_v27 }
 0x499   : > { %9132 = vst [vmem:[#allocation7_spill] sm:$0xff] %v8303_v13 }
 0x49a   : > { %v3531_v36 = vpop.permute.xlu1 %3530  ;;  %v3606_v42 = vpop.permute.xlu2 %3605 }
 0x49b   : > { %v3557_v21 = vmul.f32 %v8255_v2, %v3531_v36  ;;  %v3644_v63 = vmul.f32 %v8258_v39, %v3606_v42 }
 0x49c   : > { %5347 = vset.pattern.permute.xlu2 %v8822_v24 }
 0x49d   : > { %v3570_v3 = vadd.f32 %v3557_v21, %v3479_v40  ;;  %v8271_v31 = vadd.f32 %v3644_v63, %v8148_v49  ;;  %5346 = vset.pattern.permute.xlu1 %v8826_v46  ;;  %3994 = vperm.xlu2 %5347, %v7989_v19   ;;  %v3651_v40 = vmul.f32 %v8286_v33, %v3634_v57  ;;  %v8402_v33 = vld [vmem:[%s5889_s11 + $0xe8] sm:$0xff] }
 0x49e   : > { %3916 = vperm.xlu1 %5346, %v7989_v19  }
 0x49f   : > { %v8277_v7 = vadd.f32 %v3648_v60, %v3570_v3  ;;  %v8306_v60 = vld [vmem:[%s5889_s11 + $0x68] sm:$0xff]  ;;  %5390 = vset.pattern.permute.xlu0 %v8820_v17  ;;  %v8310_v3 = vld [vmem:[%s5889_s11] sm:$0xff] }
 0x4a2   : > { %v3543_v49 = vpop.permute.xlu1 %3542  ;;  %v3618_v44 = vpop.permute.xlu2 %3617 }
 0x4a3   : > { %v3560_v36 = vmul.f32 %v8280_v61, %v3543_v49  ;;  %v3647_v42 = vmul.f32 %v8283_v27, %v3618_v44  ;;  %v3549_v49 = vmul.f32 %v8306_v60, %v8183_v30  ;;  %v8316_v44 = vld [vmem:[%s5889_s11 + $0xd0] sm:$0xff]  ;;  %v8330_v30 = vld [vmem:[%s5889_s11 + $0x138] sm:$0xff]  ;;  %v9138_v61 = vmov 30  }
 0x4a5   : > { %v3573_v21 = vadd.f32 %v3560_v36, %v3482_v9  ;;  %v8294_v63 = vadd.f32 %v3647_v42, %v8146_v56  ;;  %5350 = vset.pattern.permute.xlu2 %v8826_v46  ;;  %v3471_v9 = vmul.f32 %v8009_v15, %v8310_v3  ;;  %v3640_v42 = vmul.f32 %v8316_v44, %v8189_v29 }
 0x4a6   : > { %5349 = vset.pattern.permute.xlu1 %v8820_v17  ;;  %3920 = vperm.xlu2 %5350, %v7807_v54   ;;  %v3685_v17 = vpop.permute.xlu0 %3684 }
 0x4a7   : > { %v8299_v4 = vadd.f32 %v3651_v40, %v3573_v21  ;;  %4176 = vperm.xlu1 %5349, %v7989_v19   ;;  %v3562_v36 = vadd.f32 %v3549_v49, %v3471_v9  ;;  %v8340_v49 = vld [vmem:[%s5889_s11 + $0x140] sm:$0xff] }
 0x4a8   : > { %v3732_v29 = vmul.f32 %v8340_v49, %v3685_v17  ;;  %v3271_v17 = vld [vmem:[#allocation2 + $0x10] sm:$0xff] }
 0x4a9   : > { %v3653_v21 = vadd.f32 %v3640_v42, %v3562_v36 }
 0x4aa   : > { %v3630_v56 = vpop.permute.xlu2 %3629 }
 0x4ab   : > { %v3650_v53 = vmul.f32 %v8303_v13, %v3630_v56  ;;  %v3594_v57 = vpop.permute.xlu1 %3593 }
 0x4ad   : > { %v8319_v19 = vadd.f32 %v3650_v53, %v8167_v5  ;;  %v8333_v5 = vld [vmem:[%s5889_s11 + $0xd8] sm:$0xff] }
 0x4ae   : > { %5352 = vset.pattern.permute.xlu2 %v8824_v14  ;;  %v3641_v53 = vmul.f32 %v8333_v5, %v3594_v57  ;;  %v3270_v57 = vld [vmem:[#allocation2 + $0x8] sm:$0xff] }
 0x4af   : > { %5351 = vset.pattern.permute.xlu1 %v8822_v24  ;;  %4089 = vperm.xlu2 %5352, %v7807_v54  }
 0x4b0   : > { %3998 = vperm.xlu1 %5351, %v7807_v54   ;;  %v3654_v54 = vadd.f32 %v3641_v53, %v8120_v11 }
 0x4b3   : > { %v8335_v40 = vpop.permute.xlu1 %3601  ;;  %v3681_v15 = vpop.permute.xlu2 %3680 }
 0x4b4   : > { %v3731_v56 = vmul.f32 %v8330_v30, %v3681_v15  ;;  %v3745_v15 = vadd.f32 %v3732_v29, %v3654_v54 }
 0x4b6   : > { %v3744_v47 = vadd.f32 %v3731_v56, %v3653_v21  ;;  %v9134_v21 = vmov 31   ;;  %v8360_v56 = vpop.permute.xlu0 %3704 }
 0x4b7   : > { %5356 = vset.pattern.permute.xlu2 %v8822_v24 }
 0x4b8   : > { %5355 = vset.pattern.permute.xlu1 %v8826_v46  ;;  %5126 = vmatmul.msk.f32.vlgmr.msrb.gmra.mxu2 %vm844_vm0, %v3744_v47  ;;  %v8355_v47 = vld [vmem:[%s5889_s11 + $0x118] sm:$0xff]  ;;  %v8390_v46 = vld [vmem:[%s5889_s11 + $0x148] sm:$0xff] }
 0x4b9   : > { %3924 = vperm.xlu1 %5355, %v7847_v0   ;;  %4002 = vperm.xlu2 %5356, %v7847_v0   ;;  %9133 = vst [vmem:[#allocation6_spill] sm:$0xff] %v8355_v47 }
 0x4ba   : > { %v3344_v9 = vpop.f32.mrf.mxu1 }
 0x4bb   : > { %v3381_v36 = vadd.f32 %v3344_v9, %v3270_v57  ;;  %v8349_v42 = vpop.permute.xlu1 %3613  ;;  %v3693_v54 = vpop.permute.xlu2 %3692 }
 0x4bd   : > { %3394 = vst.msk [vmem:[#allocation2 + $0x8] sm:$0xff] %vm448_vm1, %v3381_v36  ;;  %v5179_v36 = vld [vmem:[%s8687_s2 + $0x78] sm:$0xff] }
 0x4be   : > { %4314 = vmatpush.msrb.mxu3 %v5179_v36 }
 0x4c0   : > { %5127 = vmatmul.msk.f32.gmra.mxu2 %vm844_vm0, %v3745_v15  ;;  %v8371_v15 = vld [vmem:[%s5889_s11 + $0x130] sm:$0xff] }
 0x4c1   : > { %5357 = vset.pattern.permute.xlu1 %v8824_v14  ;;  %5358 = vset.pattern.permute.xlu2 %v9134_v21  ;;  %9135 = vst [vmem:[#allocation4_spill] sm:$0xff] %v8371_v15 }
 0x4c2   : > { %4093 = vperm.xlu1 %5357, %v7847_v0   ;;  %v3347_v11 = vpop.f32.mrf.mxu1  ;;  %4184 = vperm.xlu2 %5358, %v7847_v0   ;;  %v3272_v0 = vld [vmem:[#allocation2 + $0x18] sm:$0xff] }
 0x4c3   : > { %v3382_v53 = vadd.f32 %v3347_v11, %v3271_v17  ;;  %v3626_v57 = vpop.permute.xlu1 %3625  ;;  %v3701_v36 = vpop.permute.xlu2 %3700 }
 0x4c4   : > { %v3649_v29 = vmul.f32 %v8355_v47, %v3626_v57  ;;  %v8378_v57 = vpop.permute.xlu0 %3716 }
 0x4c5   : > { %3395 = vst.msk [vmem:[#allocation2 + $0x10] sm:$0xff] %vm448_vm1, %v3382_v53 }
 0x4c6   : > { %v8365_v9 = vadd.f32 %v3649_v29, %v8187_v52  ;;  %v8382_v29 = vld [vmem:[%s5889_s11 + $0xe0] sm:$0xff] }
 0x4ca   : > { %5359 = vset.pattern.permute.xlu1 %v8822_v24  ;;  %v3350_v17 = vpop.f32.mrf.mxu1  ;;  %5360 = vset.pattern.permute.xlu2 %v8824_v14 }
 0x4cb   : > { %v3383_v11 = vadd.f32 %v3350_v17, %v3272_v0  ;;  %4006 = vperm.xlu1 %5359, %v7925_v25   ;;  %v3638_v53 = vpop.permute.xlu1 %3637  ;;  %4097 = vperm.xlu2 %5360, %v7925_v25   ;;  %v3642_v0 = vmul.f32 %v8382_v29, %v8232_v38  ;;  %v3273_v17 = vld [vmem:[#allocation2 + $0x20] sm:$0xff] }
 0x4cc   : > { %v3652_v52 = vmul.f32 %v8371_v15, %v3638_v53  ;;  %v9137_v15 = vmov 28  }
 0x4cd   : > { %3396 = vst.msk [vmem:[#allocation2 + $0x18] sm:$0xff] %vm448_vm1, %v3383_v11 }
 0x4ce   : > { %v8385_v24 = vadd.f32 %v3652_v52, %v8213_v41  ;;  %v3655_v41 = vadd.f32 %v3642_v0, %v8100_v55  ;;  %v8399_v52 = vpop.permute.xlu0 %3990  ;;  %v3274_v55 = vld [vmem:[#allocation2 + $0x28] sm:$0xff] }
 0x4d0   : > { %9136 = vst [vmem:[#allocation11_spill] sm:$0xff] %v8385_v24  ;;  %v8407_v24 = vpop.permute.xlu2 %3712 }
 0x4d2   : > { %v3353_v14 = vpop.f32.mrf.mxu1 }
 0x4d3   : > { %v3384_v53 = vadd.f32 %v3353_v14, %v3273_v17  ;;  %5361 = vset.pattern.permute.xlu1 %v9134_v21  ;;  %5362 = vset.pattern.permute.xlu2 %v9137_v15  ;;  %v8405_v17 = vld [vmem:[%s5889_s11 + $0x150] sm:$0xff] }
 0x4d4   : > { %4188 = vperm.xlu1 %5361, %v7925_v25   ;;  %v3689_v11 = vpop.permute.xlu1 %3688  ;;  %3932 = vperm.xlu2 %5362, %v7919_v8   ;;  %v3643_v25 = vmul.f32 %v8402_v33, %v8335_v40 }
 0x4d5   : > { %3397 = vst.msk [vmem:[#allocation2 + $0x20] sm:$0xff] %vm448_vm1, %v3384_v53  ;;  %v3733_v38 = vmul.f32 %v8390_v46, %v3689_v11  ;;  %v3734_v53 = vmul.f32 %v8405_v17, %v3693_v54  ;;  %v5178_v54 = vld [vmem:[%s8687_s2 + $0x70] sm:$0xff] }
 0x4d6   : > { %4315 = vmatpush.msrb.mxu3 %v5178_v54  ;;  %v3276_v54 = vld [vmem:[#allocation2 + $0x38] sm:$0xff] }
 0x4d7   : > { %v3746_v14 = vadd.f32 %v3733_v38, %v3655_v41  ;;  %v3656_v41 = vadd.f32 %v3643_v25, %v8216_v28  ;;  %v8419_v38 = vpop.permute.xlu0 %4085  ;;  %v3275_v28 = vld [vmem:[#allocation2 + $0x30] sm:$0xff] }
 0x4d9   : > { %5128 = vmatmul.msk.f32.gmra.mxu2 %vm844_vm0, %v3746_v14  ;;  %v3747_v40 = vadd.f32 %v3734_v53, %v3656_v41  ;;  %v8422_v14 = vld [vmem:[%s5889_s11 + $0x158] sm:$0xff] }
 0x4da   : > { %v3356_v0 = vpop.f32.mrf.mxu1 }
 0x4db   : > { %v3385_v11 = vadd.f32 %v3356_v0, %v3274_v55  ;;  %v8428_v55 = vpop.permute.xlu2 %3724 }
 0x4dc   : > { %5364 = vset.pattern.permute.xlu1 %v9138_v61  ;;  %v3697_v13 = vpop.permute.xlu1 %3696  ;;  %5365 = vset.pattern.permute.xlu2 %v9134_v21 }
 0x4dd   : > { %3398 = vst.msk [vmem:[#allocation2 + $0x28] sm:$0xff] %vm448_vm1, %v3385_v11  ;;  %4101 = vperm.xlu1 %5364, %v7919_v8   ;;  %4192 = vperm.xlu2 %5365, %v7919_v8   ;;  %v3735_v0 = vmul.f32 %v8422_v14, %v3697_v13  ;;  %v9139_v11 = vmov 29  }
 0x4df   : > { %v3748_v41 = vadd.f32 %v3735_v0, %v8271_v31  ;;  %v8441_v13 = vpop.permute.xlu0 %4180  ;;  %v3646_v31 = vmul.f32 %v8445_v45, %v8349_v42 }
 0x4e1   : > { %5129 = vmatmul.msk.f32.gmra.mxu2 %vm844_vm0, %v3747_v40  ;;  %v8438_v40 = vld [vmem:[%s5889_s11 + $0x160] sm:$0xff] }
 0x4e2   : > { %v3359_v25 = vpop.f32.mrf.mxu1 }
 0x4e3   : > { %v3386_v8 = vadd.f32 %v3359_v25, %v3275_v28  ;;  %v4078_v25 = vpop.permute.xlu2 %4077 }
 0x4e4   : > { %v3709_v53 = vpop.permute.xlu1 %3708 }
 0x4e5   : > { %3399 = vst.msk [vmem:[#allocation2 + $0x30] sm:$0xff] %vm448_vm1, %v3386_v8  ;;  %5366 = vset.pattern.permute.xlu1 %v9137_v15  ;;  %5367 = vset.pattern.permute.xlu2 %v9139_v11  ;;  %v3736_v8 = vmul.f32 %v8438_v40, %v3701_v36  ;;  %v8458_v36 = vld [vmem:[%s5889_s11 + $0x168] sm:$0xff] }
 0x4e6   : > { %3936 = vperm.xlu1 %5366, %v8022_v48   ;;  %4014 = vperm.xlu2 %5367, %v8022_v48  }
 0x4e7   : > { %v3749_v0 = vadd.f32 %v3736_v8, %v8252_v6  ;;  %v3909_v42 = vpop.permute.xlu0 %3908 }
 0x4e8   : > { %v3959_v35 = vmul.f32 %v3909_v42, %v8310_v3  ;;  %v4128_v3 = vmul.f32 %v8316_v44, %v4078_v25  ;;  %v3279_v44 = vld [vmem:[#allocation2 + $0x50] sm:$0xff]  ;;  %v4038_v25 = vmul.f32 %v8112_v26, %v8399_v52 }
 0x4e9   : > { %5130 = vmatmul.msk.f32.gmra.mxu2 %vm844_vm0, %v3748_v41  ;;  %v3277_v41 = vld [vmem:[#allocation2 + $0x40] sm:$0xff] }
 0x4ea   : > { %v3362_v28 = vpop.f32.mrf.mxu1 }
 0x4eb   : > { %v3387_v47 = vadd.f32 %v3362_v28, %v3276_v54  ;;  %v3659_v54 = vadd.f32 %v3646_v31, %v8169_v58  ;;  %v3737_v28 = vmul.f32 %v8458_v36, %v8360_v56  ;;  %v3913_v27 = vpop.permute.xlu2 %3912  ;;  %v3278_v58 = vld [vmem:[#allocation2 + $0x48] sm:$0xff] }
 0x4ec   : > { %v8447_v2 = vpop.permute.xlu1 %3720 }
 0x4ed   : > { %3400 = vst.msk [vmem:[#allocation2 + $0x38] sm:$0xff] %vm448_vm1, %v3387_v47  ;;  %v3750_v6 = vadd.f32 %v3737_v28, %v3659_v54 }
 0x4ee   : > { %5369 = vset.pattern.permute.xlu1 %v9134_v21  ;;  %5370 = vset.pattern.permute.xlu2 %v9137_v15 }
 0x4ef   : > { %4196 = vperm.xlu1 %5369, %v8022_v48   ;;  %3940 = vperm.xlu2 %5370, %v7944_v34  }
 0x4f1   : > { %5131 = vmatmul.msk.f32.gmra.mxu2 %vm844_vm0, %v3749_v0  ;;  %v8470_v0 = vld [vmem:[%s5889_s11 + $0x170] sm:$0xff] }
 0x4f2   : > { %v3365_v47 = vpop.f32.mrf.mxu1  ;;  %v3738_v56 = vmul.f32 %v8470_v0, %v3709_v53 }
 0x4f3   : > { %v3388_v10 = vadd.f32 %v3365_v47, %v3277_v41  ;;  %v4173_v47 = vpop.permute.xlu2 %4172 }
 0x4f4   : > { %v3751_v54 = vadd.f32 %v3738_v56, %v8294_v63 }
 0x4f5   : > { %3401 = vst.msk [vmem:[#allocation2 + $0x40] sm:$0xff] %vm448_vm1, %v3388_v10  ;;  %v3987_v48 = vpop.permute.xlu1 %3986 }
 0x4f6   : > { %v4037_v8 = vmul.f32 %v8306_v60, %v3987_v48  ;;  %v3960_v48 = vmul.f32 %v3913_v27, %v8106_v32  ;;  %v5482_v32 = vld [vmem:[%s5716_s4 + $0x48] sm:$0xff]  ;;  %v3280_v27 = vld [vmem:[#allocation2 + $0x58] sm:$0xff] }
 0x4f7   : > { %5371 = vset.pattern.permute.xlu1 %v9139_v11  ;;  %5372 = vset.pattern.permute.xlu2 %v9138_v61 }
 0x4f8   : > { %4018 = vperm.xlu1 %5371, %v7944_v34   ;;  %4109 = vperm.xlu2 %5372, %v7944_v34   ;;  %v4050_v60 = vadd.f32 %v4037_v8, %v3959_v35  ;;  %v8481_v34 = vld [vmem:[%s5889_s11 + $0x178] sm:$0xff] }
 0x4f9   : > { %5132 = vmatmul.msk.f32.gmra.mxu2 %vm844_vm0, %v3750_v6  ;;  %v3739_v63 = vmul.f32 %v8481_v34, %v8407_v24  ;;  %v4220_v24 = vmul.f32 %v8340_v49, %v4173_v47 }
 0x4fa   : > { %v3368_v10 = vpop.f32.mrf.mxu1  ;;  %v4141_v28 = vadd.f32 %v4128_v3, %v4050_v60  ;;  %v8511_v3 = vld [vmem:[%s5889_s11 + $0x188] sm:$0xff] }
 0x4fb   : > { %v3389_v31 = vadd.f32 %v3368_v10, %v3278_v58  ;;  %v3752_v6 = vadd.f32 %v3739_v63, %v8277_v7  ;;  %v8497_v58 = vld [vmem:[%s5889_s11 + $0x180] sm:$0xff]  ;;  %v3995_v56 = vpop.permute.xlu2 %3994 }
 0x4fc   : > { %v3740_v7 = vmul.f32 %v8497_v58, %v8378_v57  ;;  %v4039_v47 = vmul.f32 %v8080_v50, %v3995_v56  ;;  %v4130_v50 = vmul.f32 %v8382_v29, %v8419_v38 }
 0x4fd   : > { %3402 = vst.msk [vmem:[#allocation2 + $0x48] sm:$0xff] %vm448_vm1, %v3389_v31 }
 0x4fe   : > { %v4169_v41 = vpop.permute.xlu1 %4168  ;;  %v3753_v49 = vadd.f32 %v3740_v7, %v8365_v9 }
 0x4ff   : > { %v4219_v42 = vmul.f32 %v8330_v30, %v4169_v41 }
 0x500   : > { %5374 = vset.pattern.permute.xlu1 %v9137_v15  ;;  %5375 = vset.pattern.permute.xlu2 %v9139_v11 }
 0x501   : > { %v4232_v35 = vadd.f32 %v4219_v42, %v4141_v28  ;;  %3944 = vperm.xlu1 %5374, %v7937_v43   ;;  %5133 = vmatmul.msk.f32.gmra.mxu2 %vm844_vm0, %v3751_v54  ;;  %v3281_v54 = vld [vmem:[#allocation2 + $0x60] sm:$0xff]  ;;  %v3741_v42 = vmul.f32 %v8511_v3, %v8447_v2 }
 0x502   : > { %v3371_v53 = vpop.f32.mrf.mxu1  ;;  %4022 = vperm.xlu2 %5375, %v7937_v43   ;;  %v4051_v43 = vadd.f32 %v4038_v25, %v3960_v48 }
 0x503   : > { %v3390_v30 = vadd.f32 %v3371_v53, %v3279_v44  ;;  %5180 = vmatmul.msk.f32.vlgmr.msrb.gmra.mxu3 %vm844_vm0, %v4232_v35  ;;  %v3921_v41 = vpop.permute.xlu2 %3920  ;;  %v3754_v9 = vadd.f32 %v3741_v42, %v8319_v19  ;;  %v5483_v19 = vld [vmem:[%s5716_s4 + $0x58] sm:$0xff] }
 0x504   : > { %v3962_v38 = vmul.f32 %v3921_v41, %v8200_v51 }
 0x505   : > { %3403 = vst.msk [vmem:[#allocation2 + $0x50] sm:$0xff] %vm448_vm1, %v3390_v30 }
 0x507   : > { %v4082_v8 = vpop.permute.xlu1 %4081 }
 0x508   : > { %v4129_v10 = vmul.f32 %v8333_v5, %v4082_v8  ;;  %v4222_v8 = vmul.f32 %v8405_v17, %v8441_v13 }
 0x509   : > { %5376 = vset.pattern.permute.xlu1 %v9138_v61  ;;  %5134 = vmatmul.msk.f32.gmra.mxu2 %vm844_vm0, %v3752_v6  ;;  %v9140_v6 = vmov 27  }
 0x50a   : > { %v4142_v26 = vadd.f32 %v4129_v10, %v4051_v43  ;;  %4113 = vperm.xlu1 %5376, %v5482_v32   ;;  %v3374_v52 = vpop.f32.mrf.mxu1  ;;  %5377 = vset.pattern.permute.xlu2 %v9134_v21  ;;  %v5484_v10 = vld [vmem:[%s5716_s4 + $0x60] sm:$0xff] }
 0x50b   : > { %v3391_v60 = vadd.f32 %v3374_v52, %v3280_v27  ;;  %4204 = vperm.xlu2 %5377, %v5482_v32   ;;  %v4090_v63 = vpop.permute.xlu2 %4089 }
 0x50c   : > { %v4233_v5 = vadd.f32 %v4220_v24, %v4142_v26  ;;  %v4131_v48 = vmul.f32 %v8402_v33, %v4090_v63 }
 0x50d   : > { %3404 = vst.msk [vmem:[#allocation2 + $0x58] sm:$0xff] %vm448_vm1, %v3391_v60  ;;  %v3929_v60 = vpop.permute.xlu0 %3928 }
 0x50e   : > { %5181 = vmatmul.msk.f32.gmra.mxu3 %vm844_vm0, %v4233_v5 }
 0x510   : > { %v3917_v31 = vpop.permute.xlu1 %3916 }
 0x511   : > { %5135 = vmatmul.msk.f32.gmra.mxu2 %vm844_vm0, %v3753_v49  ;;  %v3961_v57 = vmul.f32 %v3917_v31, %v8084_v23  ;;  %v3758_v31 = vld [vmem:[#allocation2 + $0x8] sm:$0xff] }
 0x512   : > { %5379 = vset.pattern.permute.xlu1 %v9139_v11  ;;  %v3377_v28 = vpop.f32.mrf.mxu1  ;;  %v8527_v11 = vld [vmem:[%s5889_s11 + $0x190] sm:$0xff] }
 0x513   : > { %v3392_v35 = vadd.f32 %v3377_v28, %v3281_v54  ;;  %4026 = vperm.xlu1 %5379, %v8045_v59   ;;  %5380 = vset.pattern.permute.xlu2 %v9138_v61  ;;  %v4052_v23 = vadd.f32 %v4039_v47, %v3961_v57  ;;  %v3742_v30 = vmul.f32 %v8527_v11, %v8428_v55 }
 0x514   : > { %4117 = vperm.xlu2 %5380, %v8045_v59  }
 0x515   : > { %3405 = vst.msk [vmem:[#allocation2 + $0x60] sm:$0xff] %vm448_vm1, %v3392_v35  ;;  %v4143_v2 = vadd.f32 %v4130_v50, %v4052_v23  ;;  %v3755_v29 = vadd.f32 %v3742_v30, %v8299_v4  ;;  %v3900_v35 = vld [vmem:[%s5889_s11 + $0x30] sm:$0xff]  ;;  %v4011_v50 = vpop.permute.xlu0 %4010 }
 0x519   : > { %v4177_v44 = vpop.permute.xlu1 %4176  ;;  %5136 = vmatmul.msk.f32.gmra.mxu2 %vm844_vm0, %v3754_v9 }
 0x51a   : > { %v4221_v53 = vmul.f32 %v8390_v46, %v4177_v44 }
 0x51b   : > { %5381 = vset.pattern.permute.xlu1 %v9134_v21 }
 0x51c   : > { %v4234_v25 = vadd.f32 %v4221_v53, %v4143_v2  ;;  %4208 = vperm.xlu1 %5381, %v8045_v59   ;;  %5382 = vset.pattern.permute.xlu2 %v9137_v15  ;;  %v4003_v59 = vpop.permute.xlu2 %4002 }
 0x51d   : > { %3952 = vperm.xlu2 %5382, %v5483_v19  }
 0x51e   : > { %5182 = vmatmul.msk.f32.gmra.mxu3 %vm844_vm0, %v4234_v25 }
 0x521   : > { %5137 = vmatmul.msk.f32.gmra.mxu2 %vm844_vm0, %v3755_v29 }
 0x522   : > { %v3999_v46 = vpop.permute.xlu1 %3998 }
 0x523   : > { %v4040_v55 = vmul.f32 %v8204_v1, %v3999_v46  ;;  %v4041_v1 = vmul.f32 %v8136_v62, %v4003_v59  ;;  %v3757_v62 = vld [vmem:[#allocation2] sm:$0xff]  ;;  %v4106_v46 = vpop.permute.xlu0 %4105 }
 0x524   : > { %5384 = vset.pattern.permute.xlu1 %v9140_v6  ;;  %v4185_v51 = vpop.permute.xlu2 %4184 }
 0x525   : > { %v4053_v43 = vadd.f32 %v4040_v55, %v3962_v38  ;;  %3728 = vperm.xlu1 %5384, %v5484_v10   ;;  %5385 = vset.pattern.permute.xlu2 %v9138_v61  ;;  %v4223_v32 = vmul.f32 %v8422_v14, %v4185_v51  ;;  %v3759_v38 = vld [vmem:[#allocation2 + $0x10] sm:$0xff]  ;;  %v3902_v51 = vld [vmem:[%s5889_s11 + $0x40] sm:$0xff] }
 0x526   : > { %4121 = vperm.xlu2 %5385, %v5483_v19  }
 0x527   : > { %v4144_v4 = vadd.f32 %v4131_v48, %v4053_v43 }
 0x529   : > { %v4235_v24 = vadd.f32 %v4222_v8, %v4144_v4  ;;  %v3760_v4 = vld [vmem:[#allocation2 + $0x18] sm:$0xff] }
 0x52b   : > { %v3925_v56 = vpop.permute.xlu1 %3924  ;;  %5183 = vmatmul.msk.f32.gmra.mxu3 %vm844_vm0, %v4235_v24 }
 0x52c   : > { %v3963_v33 = vmul.f32 %v3925_v56, %v8130_v37  ;;  %v4098_v27 = vpop.permute.xlu2 %4097 }
 0x52d   : > { %5386 = vset.pattern.permute.xlu1 %v9134_v21 }
 0x52e   : > { %4212 = vperm.xlu1 %5386, %v5483_v19   ;;  %5387 = vset.pattern.permute.xlu2 %v9137_v15  ;;  %v4054_v13 = vadd.f32 %v4041_v1, %v3963_v33  ;;  %v9141_v19 = vld [vmem:[#allocation41_spill] sm:$0xff]  ;;  %v4201_v33 = vpop.permute.xlu0 %4200 }
 0x52f   : > { %3956 = vperm.xlu2 %5387, %v5484_v10  }
 0x534   : > { %v4094_v17 = vpop.permute.xlu1 %4093  ;;  %v3933_v14 = vpop.permute.xlu2 %3932 }
 0x535   : > { %v4132_v26 = vmul.f32 %v8258_v39, %v4094_v17 }
 0x536   : > { %5388 = vset.pattern.permute.xlu1 %v9138_v61  ;;  %v3964_v61 = vmul.f32 %v3929_v60, %v8223_v16  ;;  %v3965_v16 = vmul.f32 %v3933_v14, %v3900_v35 }
 0x537   : > { %v4145_v52 = vadd.f32 %v4132_v26, %v4054_v13  ;;  %4125 = vperm.xlu1 %5388, %v5484_v10   ;;  %5389 = vset.pattern.permute.xlu2 %v9134_v21  ;;  %v4133_v21 = vmul.f32 %v8229_v22, %v4098_v27  ;;  %v9143_v13 = vld [vmem:[#allocation10_spill] sm:$0xff] }
 0x538   : > { %4216 = vperm.xlu2 %5389, %v5484_v10  }
 0x539   : > { %v4236_v15 = vadd.f32 %v4223_v32, %v4145_v52  ;;  %v9144_v32 = vld [vmem:[#allocation48_spill] sm:$0xff]  ;;  %v3761_v52 = vld [vmem:[#allocation2 + $0x20] sm:$0xff] }
 0x53b   : > { %5184 = vmatmul.msk.f32.gmra.mxu3 %vm844_vm0, %v4236_v15  ;;  %v3829_v7 = vpop.f32.mrf.mxu2 }
 0x53c   : > { %v3868_v37 = vadd.f32 %v3829_v7, %v3757_v62  ;;  %v4193_v23 = vpop.permute.xlu2 %4192  ;;  %v4227_v7 = vmul.f32 %v8481_v34, %v4201_v33 }
 0x53d   : > { %v4007_v5 = vpop.permute.xlu1 %4006  ;;  %v4225_v2 = vmul.f32 %v8458_v36, %v4193_v23 }
 0x53e   : > { %3881 = vst.msk [vmem:[#allocation2] sm:$0xff] %vm448_vm1, %v3868_v37  ;;  %v4042_v39 = vmul.f32 %v8226_v18, %v4007_v5  ;;  %v4043_v18 = vmul.f32 %v8159_v12, %v4011_v50  ;;  %v9146_v50 = vld [vmem:[#allocation6_spill] sm:$0xff] }
 0x540   : > { %v4055_v49 = vadd.f32 %v4042_v39, %v3964_v61  ;;  %v4056_v22 = vadd.f32 %v4043_v18, %v3965_v16  ;;  %v3762_v61 = vld [vmem:[#allocation2 + $0x28] sm:$0xff] }
 0x542   : > { %v4146_v54 = vadd.f32 %v4133_v21, %v4055_v49  ;;  %v3903_v21 = vld [vmem:[%s5889_s11 + $0x48] sm:$0xff] }
 0x543   : > { %v3832_v41 = vpop.f32.mrf.mxu2 }
 0x544   : > { %v3869_v47 = vadd.f32 %v3832_v41, %v3758_v31  ;;  %v4015_v30 = vpop.permute.xlu2 %4014  ;;  %v9145_v31 = vld [vmem:[#allocation26_spill] sm:$0xff] }
 0x545   : > { %v4044_v25 = vmul.f32 %v8125_v20, %v4015_v30  ;;  %v3904_v30 = vld [vmem:[%s5889_s11 + $0x50] sm:$0xff] }
 0x546   : > { %3882 = vst.msk [vmem:[#allocation2 + $0x8] sm:$0xff] %vm448_vm1, %v3869_v47  ;;  %v4189_v57 = vpop.permute.xlu1 %4188 }
 0x547   : > { %v4224_v28 = vmul.f32 %v8438_v40, %v4189_v57 }
 0x549   : > { %v4237_v42 = vadd.f32 %v4224_v28, %v4146_v54  ;;  %v3763_v54 = vld [vmem:[#allocation2 + $0x30] sm:$0xff] }
 0x54b   : > { %5185 = vmatmul.msk.f32.gmra.mxu3 %vm844_vm0, %v4237_v42 }
 0x54c   : > { %v3941_v12 = vpop.permute.xlu2 %3940 }
 0x54d   : > { %v3967_v17 = vmul.f32 %v3941_v12, %v3902_v51 }
 0x54f   : > { %v4102_v9 = vpop.permute.xlu1 %4101 }
 0x550   : > { %v4134_v44 = vmul.f32 %v8445_v45, %v4102_v9  ;;  %v9142_v45 = vld [vmem:[#allocation9_spill] sm:$0xff] }
 0x551   : > { %v4135_v59 = vmul.f32 %v9142_v45, %v4106_v46 }
 0x552   : > { %v4147_v53 = vadd.f32 %v4134_v44, %v4056_v22  ;;  %v3949_v22 = vpop.permute.xlu0 %3948 }
 0x553   : > { %v3969_v46 = vmul.f32 %v3949_v22, %v3904_v30 }
 0x554   : > { %v4238_v63 = vadd.f32 %v4225_v2, %v4147_v53  ;;  %v4110_v56 = vpop.permute.xlu2 %4109  ;;  %v3764_v2 = vld [vmem:[#allocation2 + $0x38] sm:$0xff] }
 0x555   : > { %v4136_v26 = vmul.f32 %v9143_v13, %v4110_v56  ;;  %v4246_v56 = vld [vmem:[#allocation2 + $0x8] sm:$0xff] }
 0x556   : > { %5186 = vmatmul.msk.f32.gmra.mxu3 %vm844_vm0, %v4238_v63  ;;  %v5149_v63 = vld [vmem:[%s5889_s11 + $0xb8] sm:$0xff] }
 0x558   : > { %v3937_v40 = vpop.permute.xlu1 %3936 }
 0x559   : > { %v3966_v29 = vmul.f32 %v3937_v40, %v9141_v19  ;;  %v4245_v19 = vld [vmem:[#allocation2] sm:$0xff] }
 0x55b   : > { %v4057_v6 = vadd.f32 %v4044_v25, %v3966_v29 }
 0x55c   : > { %v3835_v55 = vpop.f32.mrf.mxu2  ;;  %v4023_v60 = vpop.permute.xlu2 %4022 }
 0x55d   : > { %v3870_v48 = vadd.f32 %v3835_v55, %v3759_v38  ;;  %v4148_v8 = vadd.f32 %v4135_v59, %v4057_v6  ;;  %v4046_v41 = vmul.f32 %v9145_v31, %v4023_v60  ;;  %v9147_v55 = vld [vmem:[#allocation7_spill] sm:$0xff] }
 0x55e   : > { %v3765_v6 = vld [vmem:[#allocation2 + $0x40] sm:$0xff] }
 0x55f   : > { %3883 = vst.msk [vmem:[#allocation2 + $0x10] sm:$0xff] %vm448_vm1, %v3870_v48  ;;  %v9149_v60 = vld [vmem:[#allocation11_spill] sm:$0xff] }
 0x561   : > { %v4197_v36 = vpop.permute.xlu1 %4196 }
 0x562   : > { %v4226_v43 = vmul.f32 %v8470_v0, %v4197_v36 }
 0x564   : > { %v4239_v10 = vadd.f32 %v4226_v43, %v4148_v8  ;;  %v3838_v20 = vpop.f32.mrf.mxu2 }
 0x565   : > { %v3871_v24 = vadd.f32 %v3838_v20, %v3760_v4  ;;  %v4205_v57 = vpop.permute.xlu2 %4204 }
 0x566   : > { %5187 = vmatmul.msk.f32.gmra.mxu3 %vm844_vm0, %v4239_v10  ;;  %v4228_v35 = vmul.f32 %v8497_v58, %v4205_v57 }
 0x567   : > { %3884 = vst.msk [vmem:[#allocation2 + $0x18] sm:$0xff] %vm448_vm1, %v3871_v24 }
 0x56a   : > { %v4019_v1 = vpop.permute.xlu1 %4018 }
 0x56b   : > { %v4045_v27 = vmul.f32 %v9144_v32, %v4019_v1  ;;  %v5123_v32 = vld [vmem:[%s5889_s11 + $0x198] sm:$0xff] }
 0x56c   : > { %v3841_v0 = vpop.f32.mrf.mxu2 }
 0x56d   : > { %v4058_v15 = vadd.f32 %v4045_v27, %v3967_v17  ;;  %v3872_v62 = vadd.f32 %v3841_v0, %v3761_v52  ;;  %v3766_v17 = vld [vmem:[#allocation2 + $0x48] sm:$0xff]  ;;  %v3905_v27 = vld [vmem:[%s5889_s11 + $0x58] sm:$0xff] }
 0x56e   : > { %v4118_v44 = vpop.permute.xlu2 %4117 }
 0x56f   : > { %3885 = vst.msk [vmem:[#allocation2 + $0x20] sm:$0xff] %vm448_vm1, %v3872_v62  ;;  %v4149_v37 = vadd.f32 %v4136_v26, %v4058_v15  ;;  %v4138_v12 = vmul.f32 %v9147_v55, %v4118_v44  ;;  %v5151_v44 = vld [vmem:[%s5889_s11 + $0xc8] sm:$0xff] }
 0x571   : > { %v4240_v5 = vadd.f32 %v4227_v7, %v4149_v37  ;;  %v9148_v7 = vld [vmem:[#allocation15_spill] sm:$0xff] }
 0x573   : > { %v3945_v39 = vpop.permute.xlu1 %3944  ;;  %5188 = vmatmul.msk.f32.gmra.mxu3 %vm844_vm0, %v4240_v5 }
 0x574   : > { %v3844_v14 = vpop.f32.mrf.mxu2  ;;  %v3968_v47 = vmul.f32 %v3945_v39, %v3903_v21  ;;  %v3767_v21 = vld [vmem:[#allocation2 + $0x50] sm:$0xff] }
 0x575   : > { %v3873_v49 = vadd.f32 %v3844_v14, %v3762_v61 }
 0x576   : > { %v4059_v42 = vadd.f32 %v4046_v41, %v3968_v47  ;;  %v9150_v47 = vld [vmem:[#allocation5_spill] sm:$0xff] }
 0x577   : > { %3886 = vst.msk [vmem:[#allocation2 + $0x28] sm:$0xff] %vm448_vm1, %v3873_v49  ;;  %v3953_v36 = vpop.permute.xlu2 %3952 }
 0x578   : > { %v3970_v62 = vmul.f32 %v3953_v36, %v3905_v27 }
 0x57c   : > { %v4114_v34 = vpop.permute.xlu1 %4113  ;;  %v3847_v28 = vpop.f32.mrf.mxu2 }
 0x57d   : > { %v4137_v23 = vmul.f32 %v9146_v50, %v4114_v34  ;;  %v3874_v16 = vadd.f32 %v3847_v28, %v3763_v54 }
 0x57f   : > { %v4150_v18 = vadd.f32 %v4137_v23, %v4059_v42  ;;  %3887 = vst.msk [vmem:[#allocation2 + $0x30] sm:$0xff] %vm448_vm1, %v3874_v16  ;;  %v4247_v23 = vld [vmem:[#allocation2 + $0x10] sm:$0xff] }
 0x580   : > { %v4122_v0 = vpop.permute.xlu2 %4121 }
 0x581   : > { %v4241_v9 = vadd.f32 %v4228_v35, %v4150_v18  ;;  %v4139_v57 = vmul.f32 %v9150_v47, %v4122_v0 }
 0x583   : > { %5189 = vmatmul.msk.f32.gmra.mxu3 %vm844_vm0, %v4241_v9  ;;  %v3906_v9 = vld [vmem:[%s5889_s11 + $0x60] sm:$0xff] }
 0x584   : > { %v3850_v53 = vpop.f32.mrf.mxu2 }
 0x585   : > { %v3875_v40 = vadd.f32 %v3850_v53, %v3764_v2  ;;  %v4027_v25 = vpop.permute.xlu1 %4026 }
 0x586   : > { %v4317_v29 = vpop.f32.mrf.mxu3  ;;  %v4047_v58 = vmul.f32 %v5149_v63, %v4027_v25  ;;  %v3768_v63 = vld [vmem:[#allocation2 + $0x58] sm:$0xff] }
 0x587   : > { %3888 = vst.msk [vmem:[#allocation2 + $0x38] sm:$0xff] %vm448_vm1, %v3875_v40  ;;  %v4356_v38 = vadd.f32 %v4317_v29, %v4245_v19 }
 0x588   : > { %v4060_v48 = vadd.f32 %v4047_v58, %v3969_v46 }
 0x589   : > { %4369 = vst.msk [vmem:[#allocation2] sm:$0xff] %vm448_vm1, %v4356_v38  ;;  %v3957_v28 = vpop.permute.xlu2 %3956 }
 0x58a   : > { %v4151_v43 = vadd.f32 %v4138_v12, %v4060_v48  ;;  %v3971_v19 = vmul.f32 %v3957_v28, %v3906_v9 }
 0x58c   : > { %v3853_v45 = vpop.f32.mrf.mxu2 }
 0x58d   : > { %v3876_v59 = vadd.f32 %v3853_v45, %v3765_v6 }
 0x58e   : > { %v4209_v8 = vpop.permute.xlu1 %4208 }
 0x58f   : > { %3889 = vst.msk [vmem:[#allocation2 + $0x40] sm:$0xff] %vm448_vm1, %v3876_v59  ;;  %v4229_v10 = vmul.f32 %v8511_v3, %v4209_v8  ;;  %v4031_v3 = vpop.permute.xlu0 %4030  ;;  %v9151_v8 = vld [vmem:[#allocation4_spill] sm:$0xff] }
 0x590   : > { %v8597_v4 = vld [vmem:[#allocation2] sm:$0xff]  ;;  %v4048_v37 = vmul.f32 %v9148_v7, %v4031_v3 }
 0x591   : > { %v4395_v20 = vsub.f32 0.0, %v8597_v4  ;;  %v4242_v24 = vadd.f32 %v4229_v10, %v4151_v43  ;;  %v4320_v51 = vpop.f32.mrf.mxu3 }
 0x592   : > { %v4357_v1 = vadd.f32 %v4320_v51, %v4246_v56  ;;  %v4061_v41 = vadd.f32 %v4048_v37, %v3970_v62  ;;  %v4217_v55 = vpop.permute.xlu2 %4216 }
 0x593   : > { %v4408_v33 = vmul.f32 1.442695, %v4395_v20  ;;  %5190 = vmatmul.msk.f32.gmra.mxu3 %vm844_vm0, %v4242_v24  ;;  %v4231_v10 = vmul.f32 %v5123_v32, %v4217_v55 }
 0x594   : > { %4370 = vst.msk [vmem:[#allocation2 + $0x8] sm:$0xff] %vm448_vm1, %v4357_v1  ;;  %v3856_v13 = vpop.f32.mrf.mxu2  ;;  %v4152_v35 = vadd.f32 %v4139_v57, %v4061_v41 }
 0x595   : > { %5391 = vpow2.f32 %v4408_v33  ;;  %v3877_v26 = vadd.f32 %v3856_v13, %v3766_v17  ;;  %v4248_v17 = vld [vmem:[#allocation2 + $0x18] sm:$0xff] }
 0x597   : > { %3890 = vst.msk [vmem:[#allocation2 + $0x48] sm:$0xff] %vm448_vm1, %v3877_v26  ;;  %v3729_v52 = vpop.permute.xlu1 %3728  ;;  %v4035_v22 = vpop.permute.xlu0 %4034 }
 0x598   : > { %v3743_v15 = vmul.f32 %v5123_v32, %v3729_v52  ;;  %v4049_v29 = vmul.f32 %v5151_v44, %v4035_v22 }
 0x59a   : > { %v3756_v5 = vadd.f32 %v3743_v15, %v9149_v60  ;;  %v4062_v45 = vadd.f32 %v4049_v29, %v3971_v19 }
 0x59b   : > { %v5392_v39 = vpop.eup %5391  ;;  %v8607_v61 = vld [vmem:[#allocation2 + $0x8] sm:$0xff] }
 0x59c   : > { %v4434_v14 = vadd.f32 1.0, %v5392_v39  ;;  %v4396_v49 = vsub.f32 0.0, %v8607_v61  ;;  %v3859_v31 = vpop.f32.mrf.mxu2  ;;  %5138 = vmatmul.msk.f32.gmra.mxu2 %vm844_vm0, %v3756_v5 }
 0x59d   : > { %v3878_v34 = vadd.f32 %v3859_v31, %v3767_v21 }
 0x59e   : > { %5393 = vrcp.f32 %v4434_v14  ;;  %v4410_v54 = vmul.f32 1.442695, %v4396_v49  ;;  %v4458_v46 = vand.u32 2147483648, %v4434_v14  ;;  %v4456_v48 = vand.u32 2147483647, %v4434_v14 }
 0x59f   : > { %3891 = vst.msk [vmem:[#allocation2 + $0x50] sm:$0xff] %vm448_vm1, %v3878_v34  ;;  %vm4452_vm3 = vweird.f32 %v4434_v14  ;;  %v4249_v34 = vld [vmem:[#allocation2 + $0x20] sm:$0xff] }
 0x5a0   : > { %v4213_v42 = vpop.permute.xlu1 %4212  ;;  %5395 = vpow2.f32 %v4410_v54  ;;  %v4459_v20 = vor.u32 1.1754944e-38, %v4458_v46  ;;  %vm4457_vm5 = vcmp.eq.f32.partialorder %v4456_v48, 8.507059e+37 }
 0x5a1   : > { %v4230_v50 = vmul.f32 %v8527_v11, %v4213_v42  ;;  %v4323_v16 = vpop.f32.mrf.mxu3 }
 0x5a2   : > { %v4358_v18 = vadd.f32 %v4323_v16, %v4247_v23 }
 0x5a3   : > { %v4243_v2 = vadd.f32 %v4230_v50, %v4152_v35 }
 0x5a4   : > { %v5394_v53 = vpop.eup %5393  ;;  %4371 = vst.msk [vmem:[#allocation2 + $0x10] sm:$0xff] %vm448_vm1, %v4358_v18  ;;  %v3862_v30 = vpop.f32.mrf.mxu2 }
 0x5a5   : > { %v4448_v40 = vmul.f32 %v5394_v53, %v4434_v14  ;;  %v3879_v25 = vadd.f32 %v3862_v30, %v3768_v63  ;;  %5191 = vmatmul.msk.f32.gmra.mxu3 %vm844_vm0, %v4243_v2  ;;  %vm4453_vm2 = vweird.f32 %v5394_v53 }
 0x5a6   : > { %v5396_v58 = vpop.eup %5395  ;;  %vm4454_vm4 = vmor %vm4452_vm3, %vm4453_vm2 }
 0x5a7   : > { %v4449_v11 = vsub.f32 1.0, %v4448_v40  ;;  %3892 = vst.msk [vmem:[#allocation2 + $0x58] sm:$0xff] %vm448_vm1, %v3879_v25  ;;  %v4435_v38 = vadd.f32 1.0, %v5396_v58 }
 0x5a9   : > { %v4450_v12 = vmul.f32 %v5394_v53, %v4449_v11  ;;  %v4126_v6 = vpop.permute.xlu1 %4125  ;;  %5397 = vrcp.f32 %v4435_v38  ;;  %v4473_v15 = vand.u32 2147483648, %v4435_v38  ;;  %v4471_v7 = vand.u32 2147483647, %v4435_v38  ;;  %v4250_v11 = vld [vmem:[#allocation2 + $0x28] sm:$0xff] }
 0x5aa   : > { %v4140_v43 = vmul.f32 %v9151_v8, %v4126_v6  ;;  %vm4467_vm7 = vweird.f32 %v4435_v38 }
 0x5ab   : > { %v4451_v59 = vadd.f32 %v5394_v53, %v4450_v12  ;;  %v8619_v36 = vld [vmem:[#allocation2 + $0x10] sm:$0xff]  ;;  %v4474_v39 = vor.u32 1.1754944e-38, %v4473_v15  ;;  %vm4472_vm9 = vcmp.eq.f32.partialorder %v4471_v7, 8.507059e+37 }
 0x5ac   : > { %v4397_v24 = vsub.f32 0.0, %v8619_v36  ;;  %v4153_v51 = vadd.f32 %v4140_v43, %v4062_v45 }
 0x5ad   : > { %v4455_v56 = vsel %vm4454_vm4, %v5394_v53, %v4451_v59 }
 0x5ae   : > { %v4460_v1 = vsel %vm4457_vm5, %v4459_v20, %v4455_v56  ;;  %v4412_v33 = vmul.f32 1.442695, %v4397_v24  ;;  %v4326_v13 = vpop.f32.mrf.mxu3  ;;  %v4244_v27 = vadd.f32 %v4231_v10, %v4153_v51  ;;  %v4251_v51 = vld [vmem:[#allocation2 + $0x30] sm:$0xff] }
 0x5af   : > { %v4642_v26 = vmul.f32 %v4460_v1, %v8597_v4  ;;  %v4359_v3 = vadd.f32 %v4326_v13, %v4248_v17  ;;  %v5398_v52 = vpop.eup %5397 }
 0x5b0   : > { %5399 = vpow2.f32 %v4412_v33  ;;  %v4463_v0 = vmul.f32 %v5398_v52, %v4435_v38  ;;  %5192 = vmatmul.msk.f32.gmra.mxu3 %vm844_vm0, %v4244_v27  ;;  %vm4468_vm6 = vweird.f32 %v5398_v52 }
 0x5b1   : > { %v4655_v32 = vmul.f32 1.6666666, %v4642_v26  ;;  %4372 = vst.msk [vmem:[#allocation2 + $0x18] sm:$0xff] %vm448_vm1, %v4359_v3  ;;  %vm4469_vm8 = vmor %vm4467_vm7, %vm4468_vm6 }
 0x5b2   : > { %v4464_v4 = vsub.f32 1.0, %v4463_v0 }
 0x5b3   : > { %4668 = vst.msk [vmem:[%s8629_s23] sm:$0xff] %vm448_vm1, %v4655_v32 }
 0x5b4   : > { %v4465_v62 = vmul.f32 %v5398_v52, %v4464_v4 }
 0x5b6   : > { %v5400_v37 = vpop.eup %5399  ;;  %v4466_v60 = vadd.f32 %v5398_v52, %v4465_v62 }
 0x5b7   : > { %v4436_v5 = vadd.f32 1.0, %v5400_v37 }
 0x5b8   : > { %v4385_v14 = vld [vmem:[#allocation2 + $0x18] sm:$0xff]  ;;  %v4470_v49 = vsel %vm4469_vm8, %v5398_v52, %v4466_v60 }
 0x5b9   : > { %5401 = vrcp.f32 %v4436_v5  ;;  %v4475_v21 = vsel %vm4472_vm9, %v4474_v39, %v4470_v49  ;;  %v4398_v31 = vsub.f32 0.0, %v4385_v14  ;;  %v4488_v23 = vand.u32 2147483648, %v4436_v5 }
 0x5ba   : > { %v4643_v41 = vmul.f32 %v4475_v21, %v8607_v61  ;;  %v4486_v9 = vand.u32 2147483647, %v4436_v5  ;;  %vm4482_vm11 = vweird.f32 %v4436_v5 }
 0x5bb   : > { %v4414_v47 = vmul.f32 1.442695, %v4398_v31  ;;  %v4489_v44 = vor.u32 1.1754944e-38, %v4488_v23  ;;  %v4252_v31 = vld [vmem:[#allocation2 + $0x38] sm:$0xff] }
 0x5bc   : > { %v4656_v57 = vmul.f32 1.6666666, %v4643_v41  ;;  %vm4487_vm13 = vcmp.eq.f32.partialorder %v4486_v9, 8.507059e+37 }
 0x5bd   : > { %5403 = vpow2.f32 %v4414_v47 }
 0x5be   : > { %v4329_v54 = vpop.f32.mrf.mxu3  ;;  %4669 = vst.msk [vmem:[%s8629_s23 + $0x8] sm:$0xff] %vm448_vm1, %v4656_v57 }
 0x5bf   : > { %v5402_v28 = vpop.eup %5401  ;;  %v4360_v42 = vadd.f32 %v4329_v54, %v4249_v34 }
 0x5c0   : > { %v4478_v35 = vmul.f32 %v5402_v28, %v4436_v5  ;;  %vm4483_vm10 = vweird.f32 %v5402_v28 }
 0x5c1   : > { %4373 = vst.msk [vmem:[#allocation2 + $0x20] sm:$0xff] %vm448_vm1, %v4360_v42  ;;  %vm4484_vm12 = vmor %vm4482_vm11, %vm4483_vm10 }
 0x5c2   : > { %v4479_v50 = vsub.f32 1.0, %v4478_v35 }
 0x5c3   : > { %v5404_v16 = vpop.eup %5403 }
 0x5c4   : > { %v4480_v18 = vmul.f32 %v5402_v28, %v4479_v50  ;;  %v4437_v22 = vadd.f32 1.0, %v5404_v16 }
 0x5c6   : > { %v4481_v61 = vadd.f32 %v5402_v28, %v4480_v18  ;;  %5405 = vrcp.f32 %v4437_v22  ;;  %v4503_v12 = vand.u32 2147483648, %v4437_v22  ;;  %v4501_v6 = vand.u32 2147483647, %v4437_v22 }
 0x5c7   : > { %vm4497_vm15 = vweird.f32 %v4437_v22 }
 0x5c8   : > { %v4485_v2 = vsel %vm4484_vm12, %v5402_v28, %v4481_v61  ;;  %v4386_v53 = vld [vmem:[#allocation2 + $0x20] sm:$0xff]  ;;  %v4504_v8 = vor.u32 1.1754944e-38, %v4503_v12  ;;  %vm4502_vm2 = vcmp.eq.f32.partialorder %v4501_v6, 8.507059e+37 }
 0x5c9   : > { %v4490_v63 = vsel %vm4487_vm13, %v4489_v44, %v4485_v2  ;;  %v4399_v30 = vsub.f32 0.0, %v4386_v53 }
 0x5ca   : > { %v4644_v40 = vmul.f32 %v4490_v63, %v8619_v36 }
 0x5cb   : > { %v4416_v25 = vmul.f32 1.442695, %v4399_v30 }
 0x5cc   : > { %v4657_v19 = vmul.f32 1.6666666, %v4644_v40  ;;  %v5406_v29 = vpop.eup %5405 }
 0x5cd   : > { %5407 = vpow2.f32 %v4416_v25  ;;  %v4493_v58 = vmul.f32 %v5406_v29, %v4437_v22  ;;  %vm4498_vm14 = vweird.f32 %v5406_v29 }
 0x5ce   : > { %4670 = vst.msk [vmem:[%s8629_s23 + $0x10] sm:$0xff] %vm448_vm1, %v4657_v19  ;;  %v4332_v46 = vpop.f32.mrf.mxu3  ;;  %vm4499_vm0 = vmor %vm4497_vm15, %vm4498_vm14 }
 0x5cf   : > { %v4361_v38 = vadd.f32 %v4332_v46, %v4250_v11  ;;  %v4494_v55 = vsub.f32 1.0, %v4493_v58 }
 0x5d1   : > { %4374 = vst.msk [vmem:[#allocation2 + $0x28] sm:$0xff] %vm448_vm1, %v4361_v38  ;;  %v4495_v48 = vmul.f32 %v5406_v29, %v4494_v55 }
 0x5d3   : > { %v5408_v45 = vpop.eup %5407  ;;  %v4496_v59 = vadd.f32 %v5406_v29, %v4495_v48 }
 0x5d4   : > { %v4438_v36 = vadd.f32 1.0, %v5408_v45 }
 0x5d5   : > { %v4500_v43 = vsel %vm4499_vm0, %v5406_v29, %v4496_v59 }
 0x5d6   : > { %5409 = vrcp.f32 %v4438_v36  ;;  %v4505_v10 = vsel %vm4502_vm2, %v4504_v8, %v4500_v43  ;;  %v4518_v52 = vand.u32 2147483648, %v4438_v36  ;;  %v4516_v0 = vand.u32 2147483647, %v4438_v36 }
 0x5d7   : > { %v4645_v20 = vmul.f32 %v4505_v10, %v4385_v14  ;;  %vm4512_vm4 = vweird.f32 %v4438_v36 }
 0x5d8   : > { %v4387_v24 = vld [vmem:[#allocation2 + $0x28] sm:$0xff]  ;;  %v4519_v62 = vor.u32 1.1754944e-38, %v4518_v52  ;;  %vm4517_vm6 = vcmp.eq.f32.partialorder %v4516_v0, 8.507059e+37 }
 0x5d9   : > { %v4400_v56 = vsub.f32 0.0, %v4387_v24  ;;  %v4335_v1 = vpop.f32.mrf.mxu3  ;;  %v4658_v33 = vmul.f32 1.6666666, %v4645_v20 }
 0x5da   : > { %v4362_v17 = vadd.f32 %v4335_v1, %v4251_v51 }
 0x5db   : > { %v4418_v13 = vmul.f32 1.442695, %v4400_v56  ;;  %4671 = vst.msk [vmem:[%s8629_s23 + $0x18] sm:$0xff] %vm448_vm1, %v4658_v33 }
 0x5dc   : > { %v5410_v26 = vpop.eup %5409  ;;  %4375 = vst.msk [vmem:[#allocation2 + $0x30] sm:$0xff] %vm448_vm1, %v4362_v17 }
 0x5dd   : > { %v4508_v27 = vmul.f32 %v5410_v26, %v4438_v36  ;;  %5411 = vpow2.f32 %v4418_v13  ;;  %vm4513_vm3 = vweird.f32 %v5410_v26 }
 0x5de   : > { %vm4514_vm5 = vmor %vm4512_vm4, %vm4513_vm3 }
 0x5df   : > { %v4509_v3 = vsub.f32 1.0, %v4508_v27 }
 0x5e1   : > { %v4510_v32 = vmul.f32 %v5410_v26, %v4509_v3 }
 0x5e3   : > { %v5412_v4 = vpop.eup %5411  ;;  %v4511_v15 = vadd.f32 %v5410_v26, %v4510_v32  ;;  %v4388_v37 = vld [vmem:[#allocation2 + $0x30] sm:$0xff] }
 0x5e4   : > { %v4439_v7 = vadd.f32 1.0, %v5412_v4  ;;  %v4401_v5 = vsub.f32 0.0, %v4388_v37 }
 0x5e5   : > { %v4515_v60 = vsel %vm4514_vm5, %v5410_v26, %v4511_v15 }
 0x5e6   : > { %v4520_v39 = vsel %vm4517_vm6, %v4519_v62, %v4515_v60  ;;  %5413 = vrcp.f32 %v4439_v7  ;;  %v4420_v49 = vmul.f32 1.442695, %v4401_v5  ;;  %v4533_v42 = vand.u32 2147483648, %v4439_v7 }
 0x5e7   : > { %v4646_v14 = vmul.f32 %v4520_v39, %v4386_v53  ;;  %v4531_v23 = vand.u32 2147483647, %v4439_v7  ;;  %vm4527_vm8 = vweird.f32 %v4439_v7  ;;  %v4253_v53 = vld [vmem:[#allocation2 + $0x40] sm:$0xff] }
 0x5e8   : > { %5415 = vpow2.f32 %v4420_v49  ;;  %v4534_v9 = vor.u32 1.1754944e-38, %v4533_v42  ;;  %v4255_v49 = vld [vmem:[#allocation2 + $0x50] sm:$0xff] }
 0x5e9   : > { %v4659_v21 = vmul.f32 1.6666666, %v4646_v14  ;;  %v4338_v41 = vpop.f32.mrf.mxu3  ;;  %vm4532_vm10 = vcmp.eq.f32.partialorder %v4531_v23, 8.507059e+37 }
 0x5ea   : > { %v4363_v47 = vadd.f32 %v4338_v41, %v4252_v31 }
 0x5eb   : > { %4672 = vst.msk [vmem:[%s8629_s23 + $0x20] sm:$0xff] %vm448_vm1, %v4659_v21 }
 0x5ec   : > { %v5414_v57 = vpop.eup %5413  ;;  %4376 = vst.msk [vmem:[#allocation2 + $0x38] sm:$0xff] %vm448_vm1, %v4363_v47 }
 0x5ed   : > { %v4523_v34 = vmul.f32 %v5414_v57, %v4439_v7  ;;  %vm4528_vm7 = vweird.f32 %v5414_v57 }
 0x5ee   : > { %v5416_v54 = vpop.eup %5415  ;;  %vm4529_vm9 = vmor %vm4527_vm8, %vm4528_vm7 }
 0x5ef   : > { %v4524_v28 = vsub.f32 1.0, %v4523_v34  ;;  %v4440_v35 = vadd.f32 1.0, %v5416_v54 }
 0x5f1   : > { %v4525_v50 = vmul.f32 %v5414_v57, %v4524_v28  ;;  %5417 = vrcp.f32 %v4440_v35  ;;  %v4548_v11 = vand.u32 2147483648, %v4440_v35  ;;  %v4546_v38 = vand.u32 2147483647, %v4440_v35 }
 0x5f2   : > { %vm4542_vm12 = vweird.f32 %v4440_v35 }
 0x5f3   : > { %v4526_v16 = vadd.f32 %v5414_v57, %v4525_v50  ;;  %v8649_v18 = vld [vmem:[#allocation2 + $0x38] sm:$0xff]  ;;  %v4549_v6 = vor.u32 1.1754944e-38, %v4548_v11  ;;  %vm4547_vm14 = vcmp.eq.f32.partialorder %v4546_v38, 8.507059e+37 }
 0x5f4   : > { %v4402_v22 = vsub.f32 0.0, %v8649_v18 }
 0x5f5   : > { %v4530_v61 = vsel %vm4529_vm9, %v5414_v57, %v4526_v16  ;;  %v3769_v16 = vld [vmem:[#allocation2 + $0x60] sm:$0xff] }
 0x5f6   : > { %v4535_v44 = vsel %vm4532_vm10, %v4534_v9, %v4530_v61  ;;  %v4422_v2 = vmul.f32 1.442695, %v4402_v22  ;;  %v4341_v63 = vpop.f32.mrf.mxu3 }
 0x5f7   : > { %v4647_v30 = vmul.f32 %v4535_v44, %v4387_v24  ;;  %v4364_v40 = vadd.f32 %v4341_v63, %v4253_v53  ;;  %v5418_v25 = vpop.eup %5417  ;;  %v4254_v24 = vld [vmem:[#allocation2 + $0x48] sm:$0xff] }
 0x5f8   : > { %5419 = vpow2.f32 %v4422_v2  ;;  %v4538_v29 = vmul.f32 %v5418_v25, %v4440_v35  ;;  %vm4543_vm11 = vweird.f32 %v5418_v25 }
 0x5f9   : > { %v4660_v19 = vmul.f32 1.6666666, %v4647_v30  ;;  %4377 = vst.msk [vmem:[#allocation2 + $0x40] sm:$0xff] %vm448_vm1, %v4364_v40  ;;  %vm4544_vm13 = vmor %vm4542_vm12, %vm4543_vm11 }
 0x5fa   : > { %v4539_v58 = vsub.f32 1.0, %v4538_v29 }
 0x5fb   : > { %4673 = vst.msk [vmem:[%s8629_s23 + $0x28] sm:$0xff] %vm448_vm1, %v4660_v19  ;;  %v4256_v19 = vld [vmem:[#allocation2 + $0x58] sm:$0xff] }
 0x5fc   : > { %v4540_v46 = vmul.f32 %v5418_v25, %v4539_v58 }
 0x5fe   : > { %v5420_v55 = vpop.eup %5419  ;;  %v4541_v12 = vadd.f32 %v5418_v25, %v4540_v46 }
 0x5ff   : > { %v4441_v48 = vadd.f32 1.0, %v5420_v55 }
 0x600   : > { %v4390_v45 = vld [vmem:[#allocation2 + $0x40] sm:$0xff]  ;;  %v4545_v59 = vsel %vm4544_vm13, %v5418_v25, %v4541_v12 }
 0x601   : > { %5421 = vrcp.f32 %v4441_v48  ;;  %v4550_v36 = vsel %vm4547_vm14, %v4549_v6, %v4545_v59  ;;  %v4403_v8 = vsub.f32 0.0, %v4390_v45  ;;  %v4563_v13 = vand.u32 2147483648, %v4441_v48 }
 0x602   : > { %v4648_v43 = vmul.f32 %v4550_v36, %v4388_v37  ;;  %v4561_v3 = vand.u32 2147483647, %v4441_v48  ;;  %vm4557_vm0 = vweird.f32 %v4441_v48 }
 0x603   : > { %v4424_v10 = vmul.f32 1.442695, %v4403_v8  ;;  %v4564_v0 = vor.u32 1.1754944e-38, %v4563_v13 }
 0x604   : > { %v4661_v20 = vmul.f32 1.6666666, %v4648_v43  ;;  %vm4562_vm3 = vcmp.eq.f32.partialorder %v4561_v3, 8.507059e+37 }
 0x605   : > { %5423 = vpow2.f32 %v4424_v10 }
 0x606   : > { %v4344_v56 = vpop.f32.mrf.mxu3  ;;  %4674 = vst.msk [vmem:[%s8629_s23 + $0x30] sm:$0xff] %vm448_vm1, %v4661_v20 }
 0x607   : > { %v5422_v51 = vpop.eup %5421  ;;  %v4365_v1 = vadd.f32 %v4344_v56, %v4254_v24 }
 0x608   : > { %v4553_v33 = vmul.f32 %v5422_v51, %v4441_v48  ;;  %vm4558_vm15 = vweird.f32 %v5422_v51 }
 0x609   : > { %4378 = vst.msk [vmem:[#allocation2 + $0x48] sm:$0xff] %vm448_vm1, %v4365_v1  ;;  %vm4559_vm2 = vmor %vm4557_vm0, %vm4558_vm15 }
 0x60a   : > { %v4554_v17 = vsub.f32 1.0, %v4553_v33 }
 0x60b   : > { %v5424_v26 = vpop.eup %5423 }
 0x60c   : > { %v4555_v27 = vmul.f32 %v5422_v51, %v4554_v17  ;;  %v4442_v52 = vadd.f32 1.0, %v5424_v26 }
 0x60e   : > { %v4556_v32 = vadd.f32 %v5422_v51, %v4555_v27  ;;  %5425 = vrcp.f32 %v4442_v52  ;;  %v4578_v47 = vand.u32 2147483648, %v4442_v52  ;;  %v4576_v34 = vand.u32 2147483647, %v4442_v52 }
 0x60f   : > { %vm4572_vm5 = vweird.f32 %v4442_v52 }
 0x610   : > { %v4560_v4 = vsel %vm4559_vm2, %v5422_v51, %v4556_v32  ;;  %v4391_v15 = vld [vmem:[#allocation2 + $0x48] sm:$0xff]  ;;  %v4579_v35 = vor.u32 1.1754944e-38, %v4578_v47  ;;  %vm4577_vm7 = vcmp.eq.f32.partialorder %v4576_v34, 8.507059e+37 }
 0x611   : > { %v4565_v62 = vsel %vm4562_vm3, %v4564_v0, %v4560_v4  ;;  %v4404_v7 = vsub.f32 0.0, %v4391_v15 }
 0x612   : > { %v4649_v37 = vmul.f32 %v4565_v62, %v8649_v18 }
 0x613   : > { %v4426_v60 = vmul.f32 1.442695, %v4404_v7 }
 0x614   : > { %v4662_v5 = vmul.f32 1.6666666, %v4649_v37  ;;  %v5426_v39 = vpop.eup %5425 }
 0x615   : > { %5427 = vpow2.f32 %v4426_v60  ;;  %v4568_v14 = vmul.f32 %v5426_v39, %v4442_v52  ;;  %vm4573_vm4 = vweird.f32 %v5426_v39 }
 0x616   : > { %4675 = vst.msk [vmem:[%s8629_s23 + $0x38] sm:$0xff] %vm448_vm1, %v4662_v5  ;;  %v4347_v21 = vpop.f32.mrf.mxu3  ;;  %vm4574_vm6 = vmor %vm4572_vm5, %vm4573_vm4 }
 0x617   : > { %v4366_v31 = vadd.f32 %v4347_v21, %v4255_v49  ;;  %v4569_v41 = vsub.f32 1.0, %v4568_v14 }
 0x619   : > { %4379 = vst.msk [vmem:[#allocation2 + $0x50] sm:$0xff] %vm448_vm1, %v4366_v31  ;;  %v4570_v57 = vmul.f32 %v5426_v39, %v4569_v41 }
 0x61b   : > { %v5428_v54 = vpop.eup %5427  ;;  %v4571_v28 = vadd.f32 %v5426_v39, %v4570_v57 }
 0x61c   : > { %v4443_v42 = vadd.f32 1.0, %v5428_v54 }
 0x61d   : > { %v4575_v50 = vsel %vm4574_vm6, %v5426_v39, %v4571_v28 }
 0x61e   : > { %5429 = vrcp.f32 %v4443_v42  ;;  %v4580_v23 = vsel %vm4577_vm7, %v4579_v35, %v4575_v50  ;;  %v4593_v25 = vand.u32 2147483648, %v4443_v42  ;;  %v4591_v11 = vand.u32 2147483647, %v4443_v42 }
 0x61f   : > { %v3865_v18 = vpop.f32.mrf.mxu2  ;;  %v4650_v9 = vmul.f32 %v4580_v23, %v4390_v45  ;;  %vm4587_vm9 = vweird.f32 %v4443_v42 }
 0x620   : > { %v4392_v22 = vld [vmem:[#allocation2 + $0x50] sm:$0xff]  ;;  %v3880_v61 = vadd.f32 %v3865_v18, %v3769_v16  ;;  %v4594_v12 = vor.u32 1.1754944e-38, %v4593_v25  ;;  %vm4592_vm11 = vcmp.eq.f32.partialorder %v4591_v11, 8.507059e+37 }
 0x621   : > { %v4405_v44 = vsub.f32 0.0, %v4392_v22  ;;  %v4663_v2 = vmul.f32 1.6666666, %v4650_v9 }
 0x622   : > { %3893 = vst.msk [vmem:[#allocation2 + $0x60] sm:$0xff] %vm448_vm1, %v3880_v61 }
 0x623   : > { %v4428_v53 = vmul.f32 1.442695, %v4405_v44  ;;  %4676 = vst.msk [vmem:[%s8629_s23 + $0x40] sm:$0xff] %vm448_vm1, %v4663_v2 }
 0x624   : > { %v5430_v63 = vpop.eup %5429 }
 0x625   : > { %v4583_v30 = vmul.f32 %v5430_v63, %v4443_v42  ;;  %5431 = vpow2.f32 %v4428_v53  ;;  %vm4588_vm8 = vweird.f32 %v5430_v63 }
 0x626   : > { %vm4589_vm10 = vmor %vm4587_vm9, %vm4588_vm8 }
 0x627   : > { %v4584_v40 = vsub.f32 1.0, %v4583_v30 }
 0x628   : > { %v4350_v29 = vpop.f32.mrf.mxu3 }
 0x629   : > { %v4585_v58 = vmul.f32 %v5430_v63, %v4584_v40  ;;  %v4367_v46 = vadd.f32 %v4350_v29, %v4256_v19  ;;  %v4257_v20 = vld [vmem:[#allocation2 + $0x60] sm:$0xff] }
 0x62b   : > { %v5432_v38 = vpop.eup %5431  ;;  %v4586_v55 = vadd.f32 %v5430_v63, %v4585_v58  ;;  %4380 = vst.msk [vmem:[#allocation2 + $0x58] sm:$0xff] %vm448_vm1, %v4367_v46 }
 0x62c   : > { %v4444_v48 = vadd.f32 1.0, %v5432_v38 }
 0x62d   : > { %v4590_v6 = vsel %vm4589_vm10, %v5430_v63, %v4586_v55 }
 0x62e   : > { %v4595_v45 = vsel %vm4592_vm11, %v4594_v12, %v4590_v6  ;;  %5433 = vrcp.f32 %v4444_v48  ;;  %v4608_v17 = vand.u32 2147483648, %v4444_v48  ;;  %v4606_v26 = vand.u32 2147483647, %v4444_v48 }
 0x62f   : > { %v4651_v59 = vmul.f32 %v4595_v45, %v4391_v15  ;;  %vm4602_vm13 = vweird.f32 %v4444_v48 }
 0x630   : > { %v4609_v3 = vor.u32 1.1754944e-38, %v4608_v17  ;;  %vm4607_vm15 = vcmp.eq.f32.partialorder %v4606_v26, 8.507059e+37 }
 0x631   : > { %v4664_v36 = vmul.f32 1.6666666, %v4651_v59 }
 0x632   : > { %v4393_v8 = vld [vmem:[#allocation2 + $0x58] sm:$0xff] }
 0x633   : > { %4677 = vst.msk [vmem:[%s8629_s23 + $0x48] sm:$0xff] %vm448_vm1, %v4664_v36  ;;  %v4406_v43 = vsub.f32 0.0, %v4393_v8  ;;  %v4353_v24 = vpop.f32.mrf.mxu3 }
 0x634   : > { %v5434_v10 = vpop.eup %5433  ;;  %v4368_v1 = vadd.f32 %v4353_v24, %v4257_v20 }
 0x635   : > { %v4598_v56 = vmul.f32 %v5434_v10, %v4444_v48  ;;  %v4430_v51 = vmul.f32 1.442695, %v4406_v43  ;;  %vm4603_vm12 = vweird.f32 %v5434_v10 }
 0x636   : > { %4381 = vst.msk [vmem:[#allocation2 + $0x60] sm:$0xff] %vm448_vm1, %v4368_v1  ;;  %vm4604_vm14 = vmor %vm4602_vm13, %vm4603_vm12 }
 0x637   : > { %v4599_v33 = vsub.f32 1.0, %v4598_v56  ;;  %5435 = vpow2.f32 %v4430_v51 }
 0x639   : > { %v4600_v13 = vmul.f32 %v5434_v10, %v4599_v33 }
 0x63b   : > { %v4601_v27 = vadd.f32 %v5434_v10, %v4600_v13 }
 0x63d   : > { %v5436_v52 = vpop.eup %5435  ;;  %v4605_v32 = vsel %vm4604_vm14, %v5434_v10, %v4601_v27  ;;  %v4394_v15 = vld [vmem:[#allocation2 + $0x60] sm:$0xff] }
 0x63e   : > { %v4610_v0 = vsel %vm4607_vm15, %v4609_v3, %v4605_v32  ;;  %v4445_v4 = vadd.f32 1.0, %v5436_v52  ;;  %v4407_v7 = vsub.f32 0.0, %v4394_v15 }
 0x63f   : > { %v4652_v62 = vmul.f32 %v4610_v0, %v4392_v22 }
 0x640   : > { %5437 = vrcp.f32 %v4445_v4  ;;  %v4432_v60 = vmul.f32 1.442695, %v4407_v7  ;;  %v4623_v21 = vand.u32 2147483648, %v4445_v4  ;;  %v4621_v47 = vand.u32 2147483647, %v4445_v4 }
 0x641   : > { %v4665_v37 = vmul.f32 1.6666666, %v4652_v62  ;;  %vm4617_vm2 = vweird.f32 %v4445_v4 }
 0x642   : > { %5439 = vpow2.f32 %v4432_v60  ;;  %v4624_v34 = vor.u32 1.1754944e-38, %v4623_v21  ;;  %vm4622_vm4 = vcmp.eq.f32.partialorder %v4621_v47, 8.507059e+37 }
 0x643   : > { %4678 = vst.msk [vmem:[%s8629_s23 + $0x50] sm:$0xff] %vm448_vm1, %v4665_v37 }
 0x646   : > { %v5438_v5 = vpop.eup %5437 }
 0x647   : > { %v4613_v39 = vmul.f32 %v5438_v5, %v4445_v4  ;;  %vm4618_vm0 = vweird.f32 %v5438_v5 }
 0x648   : > { %v5440_v14 = vpop.eup %5439  ;;  %vm4619_vm3 = vmor %vm4617_vm2, %vm4618_vm0 }
 0x649   : > { %v4614_v49 = vsub.f32 1.0, %v4613_v39  ;;  %v4446_v31 = vadd.f32 1.0, %v5440_v14 }
 0x64b   : > { %v4615_v41 = vmul.f32 %v5438_v5, %v4614_v49  ;;  %5441 = vrcp.f32 %v4446_v31  ;;  %v4638_v18 = vand.u32 2147483648, %v4446_v31  ;;  %v4636_v22 = vand.u32 2147483647, %v4446_v31 }
 0x64c   : > { %vm4632_vm6 = vweird.f32 %v4446_v31 }
 0x64d   : > { %v4616_v57 = vadd.f32 %v5438_v5, %v4615_v41  ;;  %v4639_v44 = vor.u32 1.1754944e-38, %v4638_v18  ;;  %vm4637_vm8 = vcmp.eq.f32.partialorder %v4636_v22, 8.507059e+37 }
 0x64f   : > { %v4620_v54 = vsel %vm4619_vm3, %v5438_v5, %v4616_v57 }
 0x650   : > { %v4625_v28 = vsel %vm4622_vm4, %v4624_v34, %v4620_v54 }
 0x651   : > { %v4653_v42 = vmul.f32 %v4625_v28, %v4393_v8  ;;  %v5442_v35 = vpop.eup %5441 }
 0x652   : > { %v4628_v23 = vmul.f32 %v5442_v35, %v4446_v31  ;;  %vm4633_vm5 = vweird.f32 %v5442_v35 }
 0x653   : > { %v4666_v50 = vmul.f32 1.6666666, %v4653_v42  ;;  %vm4634_vm7 = vmor %vm4632_vm6, %vm4633_vm5 }
 0x654   : > { %v4629_v16 = vsub.f32 1.0, %v4628_v23 }
 0x655   : > { %4679 = vst.msk [vmem:[%s8629_s23 + $0x58] sm:$0xff] %vm448_vm1, %v4666_v50 }
 0x656   : > { %v4630_v9 = vmul.f32 %v5442_v35, %v4629_v16 }
 0x658   : > { %v4631_v61 = vadd.f32 %v5442_v35, %v4630_v9 }
 0x65a   : > { %v4635_v2 = vsel %vm4634_vm7, %v5442_v35, %v4631_v61 }
 0x65b   : > { %v4640_v53 = vsel %vm4637_vm8, %v4639_v44, %v4635_v2 }
 0x65c   : > { %v4654_v63 = vmul.f32 %v4640_v53, %v4394_v15 }
 0x65e   : > { %v4667_v30 = vmul.f32 1.6666666, %v4654_v63 }
 0x660   : > { %4680 = vst.msk [vmem:[%s8629_s23 + $0x60] sm:$0xff] %vm448_vm1, %v4667_v30 }
 0x661 PF: > { %p10_p9 = scmp.ge.s32.totalorder %s5579_s16, 4   ;;  %s9152_s12 = smov %s5503_s13 }
 0x662   : > { %s9153_s13 = smov %s5588_s19  ;;  %s9154_s14 = smov %s5579_s16 }
 0x663   :  { %12 = sbr.rel (!%p10_p9) target bundleno = 2 (0x2), region = 118 }

</bundles_post_ra>
